<compile_context>
chip_gen: v7x
topology: tpu7x:2x2x1
jax: 0.10.0
libtpu: 0.0.40
codegen_flags: <defaults>
</compile_context>

<pallas_src>
import math
from functools import partial

import jax
import jax.numpy as jnp
from jax.experimental import pallas as pl
from jax.experimental.pallas import tpu as pltpu


def _ms_calc_kernel(delta_t, x_ref, bits_ref, a_t_ref, sigma_ref, y_ref, noise_ref):
    sqrt_dt = math.sqrt(delta_t)

    # ---- map_iteration: deterministic Euler drift  x1 = x + dt * (x @ A^T)  (MXU) ----
    x = x_ref[...]                                            # f32 [tm, D]
    drift = jnp.dot(x.astype(jnp.bfloat16), a_t_ref[...],     # bf16 x bf16 -> f32 acc
                    preferred_element_type=jnp.float32)
    x1 = x + delta_t * drift                                  # f32 update

    # ---- noise_generation: uniform bits -> full Box-Muller pair (VPU + EUP) ----
    tm = x.shape[0]
    half = tm // 2
    bits = bits_ref[...]                                      # uint32 [tm, D]
    # top 24 bits -> exact f32 in [0, 1)
    frac = (bits >> 8).astype(jnp.float32) * jnp.float32(2.0 ** -24)
    u1 = 1.0 - frac[:half, :]                                 # (0, 1] -> log() safe, no clamp bias
    u2 = frac[half:, :]                                       # [0, 1)
    r = jnp.sqrt(-2.0 * jnp.log(u1))
    theta = jnp.float32(2.0 * math.pi) * u2
    z0 = r * jnp.cos(theta)                                   # [half, D]
    z1 = r * jnp.sin(theta)                                   # [half, D]  (reuse of r: free normals)

    # ---- maruyama: stochastic diffusion update  x2 = x1 + sqrt(dt) * sigma * z ----
    sig = sigma_ref[...]                                      # [1, D] broadcasts over rows
    noise_ref[0:half, :] = z0
    noise_ref[half:, :] = z1
    y_ref[0:half, :] = x1[0:half, :] + sqrt_dt * sig * z0
    y_ref[half:, :] = x1[half:, :] + sqrt_dt * sig * z1


def ms_calc_step(x, a_t, sigma, bits, *, delta_t, tm=None):
    """One MS_calc forward step. Returns (new_state, noise), both f32 [N, D]."""
    n, d = x.shape
    if tm is None:
        # MXU-friendly row tiles: 256 preferred (v6e/v7x), 128 fallback (v5e-friendly).
        tm = 256 if n % 256 == 0 else (128 if n % 128 == 0 else n)
    assert n % tm == 0, "N must be divisible by the row tile"
    assert tm % 2 == 0, "row tile must be even for the Box-Muller pair split"

    kernel = partial(_ms_calc_kernel, float(delta_t))
    grid_spec = pltpu.PrefetchScalarGridSpec(
        num_scalar_prefetch=0,
        grid=(n // tm,),
        in_specs=[
            pl.BlockSpec((tm, d), lambda i: (i, 0)),   # x      (tiled over N)
            pl.BlockSpec((tm, d), lambda i: (i, 0)),   # bits   (tiled over N)
            pl.BlockSpec((d, d), lambda i: (0, 0)),    # A^T    (VMEM-resident, bf16)
            pl.BlockSpec((1, d), lambda i: (0, 0)),    # sigma  (VMEM-resident)
        ],
        out_specs=[
            pl.BlockSpec((tm, d), lambda i: (i, 0)),   # new state
            pl.BlockSpec((tm, d), lambda i: (i, 0)),   # noise
        ],
    )
    return pl.pallas_call(
        kernel,
        out_shape=(
            jax.ShapeDtypeStruct((n, d), jnp.float32),
            jax.ShapeDtypeStruct((n, d), jnp.float32),
        ),
        grid_spec=grid_spec,
        compiler_params=pltpu.CompilerParams(
            dimension_semantics=("parallel",),         # v7x: shard tiles across both TCs
        ),
        input_output_aliases={0: 0},                   # state updated in place
    )(x, bits, a_t, sigma)


def ms_calc_forward(std_input, a_t, sigma, bits, *, delta_t):
    """Mirrors MS_calc.forward: updates slot 1 (state) and slot 6 (noise)."""
    new_state, noise = ms_calc_step(std_input[1], a_t, sigma, bits, delta_t=delta_t)
    std_input[1] = new_state
    std_input[6] = noise
    return std_input


if __name__ == "__main__":
    N, D = 512, 128          # trajectories x state dimension (2 row tiles of 256)
    DELTA_T = 0.01

    key = jax.random.PRNGKey(0)
    kx, ka, ks, kb = jax.random.split(key, 4)

    x0 = jax.random.normal(kx, (N, D), dtype=jnp.float32)
    A = 0.1 * jax.random.normal(ka, (D, D), dtype=jnp.float32)
    a_t = A.T.astype(jnp.bfloat16)                    # pre-transposed, bf16 for the MXU
    sigma = 0.05 * (1.0 + jax.random.uniform(ks, (1, D), dtype=jnp.float32))
    bits = jax.random.bits(kb, (N, D), dtype=jnp.uint32)   # raw uniform bits for the kernel

    # std_input list layout mimicking the original code (slot 1 = state, slot 6 = noise)
    std_input = [None, x0, None, None, None, None, jnp.zeros((N, D), jnp.float32)]

    std_input = ms_calc_forward(std_input, a_t, sigma, bits, delta_t=DELTA_T)
    new_state = jax.block_until_ready(std_input[1])
    noise = jax.block_until_ready(std_input[6])

    assert new_state.shape == (N, D) and noise.shape == (N, D)
    assert bool(jnp.all(jnp.isfinite(new_state))) and bool(jnp.all(jnp.isfinite(noise)))

    # Deterministic drift part must match a pure-JAX reference (same bf16 matmul path).
    drift_ref = x0 + DELTA_T * jnp.dot(
        x0.astype(jnp.bfloat16), a_t, preferred_element_type=jnp.float32)
    recon = new_state - math.sqrt(DELTA_T) * sigma * noise
    assert bool(jnp.allclose(recon, drift_ref, atol=1e-3)), "drift mismatch"

    # Loose sanity check that the in-kernel Box-Muller noise is ~N(0, 1).
    assert abs(float(noise.mean())) < 0.1, "noise mean off"
    assert abs(float(noise.std()) - 1.0) < 0.1, "noise std off"

    print("KERNEL_OK")
</pallas_src>

<mosaic_0001>
module attributes {stable_mosaic.version = 11 : i64} {
  func.func @_ms_calc_kernel(%arg0: i32, %arg1: memref<256x128xf32, #tpu.memory_space<vmem>>, %arg2: memref<256x128xi32, #tpu.memory_space<vmem>>, %arg3: memref<128x128xbf16, #tpu.memory_space<vmem>>, %arg4: memref<1x128xf32, #tpu.memory_space<vmem>>, %arg5: memref<256x128xf32, #tpu.memory_space<vmem>>, %arg6: memref<256x128xf32, #tpu.memory_space<vmem>>) attributes {dimension_semantics = [#tpu.dimension_semantics<parallel>], iteration_bounds = array<i64: 2>, scalar_prefetch = 0 : i64, scratch_operands = 0 : i64, tpu.core_type = #tpu.core_type<tc>, window_params = [{transform_indices = @transform_0, window_bounds = array<i64: 256, 128>}, {transform_indices = @transform_1, window_bounds = array<i64: 256, 128>}, {pipeline_mode = #tpu.pipeline_mode<synchronous>, transform_indices = @transform_2, window_bounds = array<i64: 128, 128>}, {pipeline_mode = #tpu.pipeline_mode<synchronous>, transform_indices = @transform_3, window_bounds = array<i64: 1, 128>}, {transform_indices = @transform_4, window_bounds = array<i64: 256, 128>}, {transform_indices = @transform_5, window_bounds = array<i64: 256, 128>}]} {
    %c0 = arith.constant 0 : index
    %c0_0 = arith.constant 0 : index
    %0 = vector.load %arg1[%c0, %c0_0] : memref<256x128xf32, #tpu.memory_space<vmem>>, vector<256x128xf32>
    %1 = arith.truncf %0 : vector<256x128xf32> to vector<256x128xbf16>
    %c0_1 = arith.constant 0 : index
    %c0_2 = arith.constant 0 : index
    %2 = vector.load %arg3[%c0_1, %c0_2] : memref<128x128xbf16, #tpu.memory_space<vmem>>, vector<128x128xbf16>
    %cst = arith.constant dense<0.000000e+00> : vector<256x128xf32>
    %3 = tpu.matmul %1, %2, %cst {dimension_numbers = #tpu.dot_dimension_numbers<[1], [0], [0], [1], [0, 0, 1, 1], [], []>} : vector<256x128xbf16>, vector<128x128xbf16>, vector<256x128xf32> -> vector<256x128xf32>
    %cst_3 = arith.constant 0.00999999977 : f32
    %4 = vector.broadcast %cst_3 : f32 to vector<256x128xf32>
    %5 = arith.mulf %4, %3 : vector<256x128xf32>
    %6 = arith.addf %0, %5 : vector<256x128xf32>
    %c0_4 = arith.constant 0 : index
    %c0_5 = arith.constant 0 : index
    %7 = vector.load %arg2[%c0_4, %c0_5] : memref<256x128xi32, #tpu.memory_space<vmem>>, vector<256x128xi32>
    %c8_i32 = arith.constant 8 : i32
    %8 = vector.broadcast %c8_i32 : i32 to vector<256x128xi32>
    %9 = arith.shrui %7, %8 : vector<256x128xi32>
    %10 = arith.uitofp %9 : vector<256x128xi32> to vector<256x128xf32>
    %cst_6 = arith.constant 5.96046448E-8 : f32
    %11 = vector.broadcast %cst_6 : f32 to vector<256x128xf32>
    %12 = arith.mulf %10, %11 : vector<256x128xf32>
    %13 = vector.extract_strided_slice %12 {offsets = [0, 0], sizes = [128, 128], strides = [1, 1]} : vector<256x128xf32> to vector<128x128xf32>
    %cst_7 = arith.constant 1.000000e+00 : f32
    %14 = vector.broadcast %cst_7 : f32 to vector<128x128xf32>
    %15 = arith.subf %14, %13 : vector<128x128xf32>
    %16 = vector.extract_strided_slice %12 {offsets = [128, 0], sizes = [128, 128], strides = [1, 1]} : vector<256x128xf32> to vector<128x128xf32>
    %17 = math.log %15 : vector<128x128xf32>
    %cst_8 = arith.constant -2.000000e+00 : f32
    %18 = vector.broadcast %cst_8 : f32 to vector<128x128xf32>
    %19 = arith.mulf %18, %17 : vector<128x128xf32>
    %20 = math.sqrt %19 : vector<128x128xf32>
    %cst_9 = arith.constant 6.28318548 : f32
    %21 = vector.broadcast %cst_9 : f32 to vector<128x128xf32>
    %22 = arith.mulf %21, %16 : vector<128x128xf32>
    %23 = math.cos %22 : vector<128x128xf32>
    %24 = arith.mulf %20, %23 : vector<128x128xf32>
    %25 = math.sin %22 : vector<128x128xf32>
    %26 = arith.mulf %20, %25 : vector<128x128xf32>
    %c0_10 = arith.constant 0 : index
    %c0_11 = arith.constant 0 : index
    %27 = vector.load %arg4[%c0_10, %c0_11] : memref<1x128xf32, #tpu.memory_space<vmem>>, vector<1x128xf32>
    %c0_12 = arith.constant 0 : index
    %c0_13 = arith.constant 0 : index
    %28 = vector.load %arg6[%c0_12, %c0_13] : memref<256x128xf32, #tpu.memory_space<vmem>>, vector<128x128xf32>
    tpu.vector_store %arg6[%c0_12, %c0_13], %24 {strides = array<i32>} : memref<256x128xf32, #tpu.memory_space<vmem>>, vector<128x128xf32>,
    %c128 = arith.constant 128 : index
    %c0_14 = arith.constant 0 : index
    %29 = vector.load %arg6[%c128, %c0_14] : memref<256x128xf32, #tpu.memory_space<vmem>>, vector<128x128xf32>
    tpu.vector_store %arg6[%c128, %c0_14], %26 {strides = array<i32>} : memref<256x128xf32, #tpu.memory_space<vmem>>, vector<128x128xf32>,
    %30 = vector.extract_strided_slice %6 {offsets = [0, 0], sizes = [128, 128], strides = [1, 1]} : vector<256x128xf32> to vector<128x128xf32>
    %cst_15 = arith.constant 1.000000e-01 : f32
    %31 = vector.broadcast %cst_15 : f32 to vector<1x128xf32>
    %32 = arith.mulf %31, %27 : vector<1x128xf32>
    %33 = vector.broadcast %32 : vector<1x128xf32> to vector<128x128xf32>
    %34 = arith.mulf %33, %24 : vector<128x128xf32>
    %35 = arith.addf %30, %34 : vector<128x128xf32>
    %c0_16 = arith.constant 0 : index
    %c0_17 = arith.constant 0 : index
    %36 = vector.load %arg5[%c0_16, %c0_17] : memref<256x128xf32, #tpu.memory_space<vmem>>, vector<128x128xf32>
    tpu.vector_store %arg5[%c0_16, %c0_17], %35 {strides = array<i32>} : memref<256x128xf32, #tpu.memory_space<vmem>>, vector<128x128xf32>,
    %37 = vector.extract_strided_slice %6 {offsets = [128, 0], sizes = [128, 128], strides = [1, 1]} : vector<256x128xf32> to vector<128x128xf32>
    %cst_18 = arith.constant 1.000000e-01 : f32
    %38 = vector.broadcast %cst_18 : f32 to vector<1x128xf32>
    %39 = arith.mulf %38, %27 : vector<1x128xf32>
    %40 = vector.broadcast %39 : vector<1x128xf32> to vector<128x128xf32>
    %41 = arith.mulf %40, %26 : vector<128x128xf32>
    %42 = arith.addf %37, %41 : vector<128x128xf32>
    %c128_19 = arith.constant 128 : index
    %c0_20 = arith.constant 0 : index
    %43 = vector.load %arg5[%c128_19, %c0_20] : memref<256x128xf32, #tpu.memory_space<vmem>>, vector<128x128xf32>
    tpu.vector_store %arg5[%c128_19, %c0_20], %42 {strides = array<i32>} : memref<256x128xf32, #tpu.memory_space<vmem>>, vector<128x128xf32>,
    return
  }
  func.func @transform_0(%arg0: i32) -> (i32, i32) {
    %c0_i32 = arith.constant 0 : i32
    %c0_i32_0 = arith.constant 0 : i32
    return %arg0, %c0_i32 : i32, i32
  }
  func.func @transform_1(%arg0: i32) -> (i32, i32) {
    %c0_i32 = arith.constant 0 : i32
    %c0_i32_0 = arith.constant 0 : i32
    return %arg0, %c0_i32 : i32, i32
  }
  func.func @transform_2(%arg0: i32) -> (i32, i32) {
    %c0_i32 = arith.constant 0 : i32
    %c0_i32_0 = arith.constant 0 : i32
    %c0_i32_1 = arith.constant 0 : i32
    return %c0_i32, %c0_i32_0 : i32, i32
  }
  func.func @transform_3(%arg0: i32) -> (i32, i32) {
    %c0_i32 = arith.constant 0 : i32
    %c0_i32_0 = arith.constant 0 : i32
    %c0_i32_1 = arith.constant 0 : i32
    return %c0_i32, %c0_i32_0 : i32, i32
  }
  func.func @transform_4(%arg0: i32) -> (i32, i32) {
    %c0_i32 = arith.constant 0 : i32
    %c0_i32_0 = arith.constant 0 : i32
    return %arg0, %c0_i32 : i32, i32
  }
  func.func @transform_5(%arg0: i32) -> (i32, i32) {
    %c0_i32 = arith.constant 0 : i32
    %c0_i32_0 = arith.constant 0 : i32
    return %arg0, %c0_i32 : i32, i32
  }
}

</mosaic_0001>

<bundles_post_ra>
// kernel: tpu_custom_call.1
= control target key start
LH: loop header
LB: loop body
LE: loop exit
PB: predicated region body
PF: predicated region fallthrough
CT: control target
= control target key end

     0   :  { %11 = vsyncpa [#allocation3], 0  ;;  %s7822_s0 = inlined_call_operand.hbm [shape: f32[512,128], index: 0, kind: input, shape index: {}, may-alias: {0,4}]   ;;  %s7823_s1 = inlined_call_operand.vmem [shape: u32[512,128], index: 1, kind: input, shape index: {}]   ;;  %s7824_s2 = inlined_call_operand.vmem [shape: bf16[128,128], index: 2, kind: input, shape index: {}]   ;;  %s7825_s3 = inlined_call_operand.vmem [shape: f32[1,128], index: 3, kind: input, shape index: {}]   ;;  %s7826_s4 = inlined_call_operand.hbm [shape: f32[512,128], index: 4, kind: output, shape index: {0}, may-alias: {0,4}]   ;;  %s7827_s5 = inlined_call_operand.hbm [shape: f32[512,128], index: 5, kind: output, shape index: {1}]  }
   0x1   :  { %13 = vsyncpa [#allocation3 + $0x1], 0 }
   0x2   :  { %14 = vsyncpa [#allocation4], 0 }
   0x3   :  { %16 = vsyncpa [#allocation4 + $0x1], 0 }
   0x4   :  { %17 = vsyncpa [#allocation7], 0 }
   0x5   :  { %19 = vsyncpa [#allocation7 + $0x1], 0  ;;  %s5442_s18 = smov 0   ;;  %s5444_s19 = smov 0  }
   0x6   :  { %s5446_s20 = smov 0   ;;  %s5448_s21 = smov 0  }
   0x7 LB: > { %s5463_s22 = sadd.s32 4294967295, %s5397_s21   ;;  %s4729_s23 = sadd.s32 4294967294, %s5397_s21   ;;  %s5397_s21 = sphi %s5448_s21, %s7856_s21   ;;  %s5393_s20 = sphi %s5446_s20, %s7855_s20   ;;  %s5389_s19 = sphi %s5444_s19, %s7854_s19   ;;  %s5385_s18 = sphi %s5442_s18, %s7853_s18  }
   0x8   : > { %s5467_s24 = sadd.s32 1, %s5397_s21   ;;  %s32_s25 = sadd.s32 1, %s5393_s20 }
   0x9   : > { %s29_s26 = ssub.s32 %s5397_s21, %s5467_s24  ;;  %p39_p0 = scmp.ne.s32.totalorder %s5393_s20, %s5389_s19 }
   0xa   : > { %p30_p1 = scmp.eq.s32.totalorder %s29_s26, 0  ;;  %p40_p2 = scmp.eq.s32.totalorder %s5397_s21, 0 }
   0xb   : > { %p45_p3 = scmp.ne.s32.totalorder %s5389_s19, %s5385_s18  ;;  %p46_p4 = scmp.eq.s32.totalorder %s5463_s22, 0 }
   0xc   : > { %s5479_s27 = scalar_select %p30_p1, %s5393_s20, %s32_s25  }
   0xd   : > { %p5481_p5 = por %p40_p2, %p39_p0  ;;  %p5485_p6 = por %p46_p4, %p45_p3 }
   0xe   : > { %p137_p7 = scmp.eq.s32.totalorder %s5463_s22, 1  ;;  %p143_p8 = scmp.eq.s32.totalorder %s4729_s23, 1 }
   0xf   : > { %p5057_p10 = scmp.lt.s32.totalorder %s5397_s21, 2  ;;  %s195_s7 = sand.u32 1, %s5393_s20  }
  0x10   : > { %p5492_p11 = por %p137_p7, %p39_p0  ;;  %p5496_p12 = por %p143_p8, %p45_p3 }
  0x11   : > { %s4885_s8 = sshll.u32 %s5397_s21, 12  ;;  %s4732_s9 = sshll.u32 %s195_s7, 8 }
  0x12   : > { %s7831_s30 = scalar_select %p5492_p11, 1, 0 }
  0x13   : > { %s7832_s6 = scalar_select %p5496_p12, 1, 0 }
  0x14   : > { %s5505_s12 = scalar_lea.hbm %s7822_s0, %s4885_s8  ;;  %s199_s13 = scalar_lea.vmem [#allocation2], %s4732_s9 }
  0x15   : > { %s206_s14 = sshll.u32 %s199_s13, 4  ;;  %p5509_p13 = pnand %p5057_p10, %p5481_p5  ;;  %s5513_s14 = int_to_ptr.vmem [resolvable:$true] %s206_s14 }
  0x16   : > { %s5515_s16 = scalar_lea.sflag [#allocation3], %s195_s7  ;;  %s5269_s17 = scalar_lea.hbm %s5505_s12, 4096 }
  0x17   : > { %p5270_p0 = scmp.ne.s32.totalorder %s5505_s12, %s5269_s17  ;;  %p5271_p1 = pneg %p5509_p13 }
  0x18   : > { %s5274_s26 = scalar_lea.hbm %s7822_s0, 8192  ;;  %p5275_p4 = scmp.lt.u32.totalorder %s5505_s12, %s7822_s0 }
  0x19   : > { %p5272_p2 = pnand %p5271_p1, %p5270_p0  ;;  %p5276_p5 = scmp.lt.u32.totalorder %s5274_s26, %s5269_s17 }
  0x1a   : > { %p5278_p8 = scmp.lt.u32.totalorder %s5269_s17, %s5505_s12 }
  0x1b   : > { %p5273_p3 = pneg %p5272_p2  ;;  %p5277_p7 = por %p5276_p5, %p5275_p4 }
  0x1d   : > { %p5279_p10 = por %p5278_p8, %p5277_p7 }
  0x1f   : > { %p5280_p9 = pnand %p5279_p10, %p5273_p3 }
  0x21   : > { %5283 = shalt.err (!%p5280_p9)
}
  0x22   : > { %s5284_s7 = scalar_lea.vmem %s5513_s14, 4096  ;;  %s5399_s9 = smov [#allocation2]  }
  0x23   : > { %p5285_p0 = scmp.ne.s32.totalorder %s5513_s14, %s5284_s7  ;;  %s5289_s10 = sshll.u32 %s5399_s9, 4  ;;  %s5290_s10 = int_to_ptr.vmem [resolvable:$false] %s5289_s10 }
  0x24   : > { %s5291_s11 = scalar_lea.vmem %s5290_s10, 8192  ;;  %p5292_p11 = scmp.lt.s32.totalorder %s5513_s14, %s5290_s10 }
  0x25   : > { %p5287_p2 = pnand %p5285_p0, %p5271_p1  ;;  %p5293_p4 = scmp.lt.s32.totalorder %s5291_s11, %s5284_s7 }
  0x27   : > { %p5288_p12 = pneg %p5287_p2  ;;  %p5294_p5 = por %p5293_p4, %p5292_p11 }
  0x29   : > { %p5295_p7 = pnand %p5294_p5, %p5288_p12 }
  0x2b   : > { %5298 = shalt.err (!%p5295_p7)
}
  0x2c   : > { %s5400_s13 = smov 128   ;;  %s5401_s17 = smov 8  }
  0x2d   : > { %5049 = dma.hbm_to_vmem [thread:$0]  (!%p5509_p13), %s5505_s12, 4096, %s5513_s14, %s5515_s16, %s5400_s13, %s5400_s13, %s5401_s17  }
  0x2e   : > { %p4735_p9 = scmp.ge.s32.totalorder %s5397_s21, 1  ;;  %p223_p1 = scmp.lt.s32.totalorder %s5397_s21, 3 }
  0x30   : > { %p224_p3 = pnand %p4735_p9, %p223_p1 }
  0x31   : > { %s5546_s23 = sand.u32 (!%p224_p3), 1, %s5389_s19  }
  0x32   : > { %227 = sbr.rel (%p224_p3) target bundleno = 740 (0x2e4), region = 36  ;;  %s5549_s25 = sshll.u32 (!%p224_p3), %s5546_s23, 8 }
  0x33   : > { %s230_s26 = scalar_lea.sflag (!%p224_p3), [#allocation3], %s5546_s23  ;;  %s5553_s28 = scalar_lea.vmem (!%p224_p3), [#allocation2], %s5549_s25 }
  0x39   : > { %5372 = dma.done.wait (%p5485_p6), %s230_s26, 4096  }
  0x3a   : > { %5374 = vsyncadd (%p5485_p6), %s230_s26, 4294963200  ;;  %v5101_v0 = vld [vmem:[%s7824_s2] sm:$0xff]   ;;  %v5102_v1 = vld [vmem:[%s7824_s2 + $0x8] sm:$0xff]   ;;  %s4739_s7 = sshll.u32 %s5463_s22, 5  ;;  %s5911_s10 = scalar_lea.vmem [#allocation6], %s5549_s25 }
  0x3b   : > { %4912 = vmatprep.subr.bf16.mxu0 %v5101_v0  ;;  %4960 = vmatprep.subr.bf16.mxu1 %v5101_v0  ;;  %v5103_v2 = vld [vmem:[%s7824_s2 + $0x10] sm:$0xff]   ;;  %v5104_v3 = vld [vmem:[%s7824_s2 + $0x18] sm:$0xff]   ;;  %v280_v4 = vld [vmem:[%s5553_s28] sm:$0xff]  ;;  %p272_p6 = scmp.lt.s32.totalorder %s4739_s7, 63  ;;  %s6457_s17 = scalar_lea.vmem [#allocation5], %s5549_s25 }
  0x3c   : > { %4913 = vmatpush3.bf16.msra.mxu0 %v5101_v0  ;;  %4968 = vmatpush3.bf16.msra.mxu1 %v5101_v0  ;;  %v281_v5 = vld [vmem:[%s5553_s28 + $0x8] sm:$0xff]  ;;  %v296_v6 = vld [vmem:[%s5553_s28 + $0x80] sm:$0xff]  ;;  %v5107_v12 = vld [vmem:[%s7824_s2 + $0x30] sm:$0xff]   ;;  %s4886_s25 = sshll.u32 %s5463_s22, 12  ;;  %s4612_s26 = sshll.u32 %s5911_s10, 4  ;;  %s7730_s26 = int_to_ptr.vmem [resolvable:$true] %s4612_s26 }
  0x3d   : > { %4914 = vmatprep.subr.bf16.mxu0 %v5102_v1  ;;  %4961 = vmatprep.subr.bf16.mxu1 %v5102_v1  ;;  %v312_v7 = vpack.c.bf16 %v281_v5, %v280_v4  ;;  %v297_v8 = vld [vmem:[%s5553_s28 + $0x88] sm:$0xff]  ;;  %v5105_v10 = vld [vmem:[%s7824_s2 + $0x20] sm:$0xff]   ;;  %s7858_s7 = smov (!%p272_p6, %s4739_s7), 63  ;;  %v5108_v14 = vld [vmem:[%s7824_s2 + $0x38] sm:$0xff]   ;;  %s7728_s15 = scalar_lea.hbm %s7827_s5, %s4886_s25 }
  0x3e   : > { %v320_v9 = vpack.c.bf16 %v297_v8, %v296_v6  ;;  %v5106_v11 = vld [vmem:[%s7824_s2 + $0x28] sm:$0xff]   ;;  %s4740_s12 = sshll.u32 %s7858_s7, 3  ;;  %v282_v17 = vld [vmem:[%s5553_s28 + $0x10] sm:$0xff]  ;;  %v283_v18 = vld [vmem:[%s5553_s28 + $0x18] sm:$0xff]  ;;  %s4596_s16 = sshll.u32 %s6457_s17, 4  ;;  %s7773_s16 = int_to_ptr.vmem [resolvable:$true] %s4596_s16 }
  0x3f   : > { %4928 = vmatprep.mubr.bf16.mxu0 %v312_v7  ;;  %s5588_s8 = scalar_lea.vmem %s7823_s1, %s4740_s12  ;;  %v298_v21 = vld [vmem:[%s5553_s28 + $0x90] sm:$0xff]  ;;  %v299_v22 = vld [vmem:[%s5553_s28 + $0x98] sm:$0xff]  ;;  %v284_v26 = vld [vmem:[%s5553_s28 + $0x20] sm:$0xff]  ;;  %v313_v28 = vpack.c.bf16 %v283_v18, %v282_v17  ;;  %s5299_s29 = scalar_lea.vmem %s7730_s26, 4096 }
  0x40   : > { %4915 = vmatpush3.bf16.msra.mxu0 %v5102_v1  ;;  %4969 = vmatpush3.bf16.msra.mxu1 %v5102_v1  ;;  %v635_v13 = vld [vmem:[%s5588_s8 + $0x90] sm:$0xff]  ;;  %v633_v16 = vld [vmem:[%s5588_s8 + $0x80] sm:$0xff]  ;;  %v636_v20 = vld [vmem:[%s5588_s8 + $0x98] sm:$0xff]  ;;  %v321_v35 = vpack.c.bf16 %v299_v22, %v298_v21  ;;  %p5300_p11 = scmp.ne.s32.totalorder %s7730_s26, %s5299_s29  ;;  %p7850_p12 = scmp.ne.s32.totalorder %s7831_s30, 0 }
  0x41   : > { %4916 = vmatprep.subr.bf16.mxu0 %v5103_v2  ;;  %4962 = vmatprep.subr.bf16.mxu1 %v5103_v2  ;;  %v667_v15 = vshrl.u32 %v635_v13, 8  ;;  %v665_v19 = vshrl.u32 %v633_v16, 8  ;;  %v668_v24 = vshrl.u32 %v636_v20, 8  ;;  %v634_v25 = vld [vmem:[%s5588_s8 + $0x88] sm:$0xff]  ;;  %v300_v30 = vld [vmem:[%s5553_s28 + $0xa0] sm:$0xff]  ;;  %v286_v50 = vld [vmem:[%s5553_s28 + $0x30] sm:$0xff] }
  0x42   : > { %4944 = vmatprep.mubr.bf16.mxu1 %v320_v9  ;;  %v285_v29 = vld [vmem:[%s5553_s28 + $0x28] sm:$0xff]  ;;  %v666_v38 = vshrl.u32 %v634_v25, 8  ;;  %v287_v52 = vld [vmem:[%s5553_s28 + $0x38] sm:$0xff]  ;;  %v302_v53 = vld [vmem:[%s5553_s28 + $0xb0] sm:$0xff]  ;;  %p5301_p13 = pnand %p5300_p11, %p7850_p12 }
  0x43   : > { %v789_v23 = vshrl.u32 %v667_v15, 16  ;;  %v777_v27 = vshrl.u32 %v665_v19, 16  ;;  %v301_v31 = vld [vmem:[%s5553_s28 + $0xa8] sm:$0xff]  ;;  %v790_v32 = vand.u32 65535, %v667_v15  ;;  %v795_v34 = vshrl.u32 %v668_v24, 16  ;;  %v303_v54 = vld [vmem:[%s5553_s28 + $0xb8] sm:$0xff] }
  0x44   : > { %4917 = vmatpush3.bf16.msra.mxu0 %v5103_v2  ;;  %4970 = vmatpush3.bf16.msra.mxu1 %v5103_v2  ;;  %v778_v36 = vand.u32 65535, %v665_v19  ;;  %v796_v41 = vand.u32 65535, %v668_v24  ;;  %v314_v43 = vpack.c.bf16 %v285_v29, %v284_v26  ;;  %v322_v44 = vpack.c.bf16 %v301_v31, %v300_v30  ;;  %v288_v58 = vld [vmem:[%s5553_s28 + $0x40] sm:$0xff]  ;;  %v289_v60 = vld [vmem:[%s5553_s28 + $0x48] sm:$0xff]  ;;  %v290_v13 = vld [vmem:[%s5553_s28 + $0x50] sm:$0xff]  ;;  %p5302_p8 = pneg %p5301_p13 }
  0x45   : > { %4918 = vmatprep.subr.bf16.mxu0 %v5104_v3  ;;  %4963 = vmatprep.subr.bf16.mxu1 %v5104_v3  ;;  %v791_v33 = vcvt.s32.f32 %v789_v23  ;;  %v779_v37 = vcvt.s32.f32 %v777_v27  ;;  %v793_v40 = vcvt.s32.f32 %v790_v32  ;;  %v797_v42 = vcvt.s32.f32 %v795_v34  ;;  %v304_v61 = vld [vmem:[%s5553_s28 + $0xc0] sm:$0xff]  ;;  %v305_v62 = vld [vmem:[%s5553_s28 + $0xc8] sm:$0xff]  ;;  %v306_v19 = vld [vmem:[%s5553_s28 + $0xd0] sm:$0xff] }
  0x46   : > { %v781_v46 = vcvt.s32.f32 %v778_v36  ;;  %v799_v49 = vcvt.s32.f32 %v796_v41  ;;  %v783_v57 = vshrl.u32 %v666_v38, 16  ;;  %v315_v1 = vpack.c.bf16 %v287_v52, %v286_v50  ;;  %v307_v20 = vld [vmem:[%s5553_s28 + $0xd8] sm:$0xff]  ;;  %v292_v21 = vld [vmem:[%s5553_s28 + $0x60] sm:$0xff]  ;;  %v293_v23 = vld [vmem:[%s5553_s28 + $0x68] sm:$0xff] }
  0x47   : > { %v792_v39 = vmul.f32 65536.0, %v791_v33  ;;  %v780_v45 = vmul.f32 65536.0, %v779_v37  ;;  %v798_v48 = vmul.f32 65536.0, %v797_v42  ;;  %v323_v2 = vpack.c.bf16 %v303_v54, %v302_v53  ;;  %v308_v24 = vld [vmem:[%s5553_s28 + $0xe0] sm:$0xff]  ;;  %v309_v25 = vld [vmem:[%s5553_s28 + $0xe8] sm:$0xff]  ;;  %v294_v30 = vld [vmem:[%s5553_s28 + $0x70] sm:$0xff] }
  0x48   : > { %4919 = vmatpush3.bf16.msra.mxu0 %v5104_v3  ;;  %4971 = vmatpush3.bf16.msra.mxu1 %v5104_v3  ;;  %v784_v6 = vand.u32 65535, %v666_v38  ;;  %v785_v7 = vcvt.s32.f32 %v783_v57  ;;  %v316_v8 = vpack.c.bf16 %v289_v60, %v288_v58  ;;  %v324_v9 = vpack.c.bf16 %v305_v62, %v304_v61  ;;  %v295_v31 = vld [vmem:[%s5553_s28 + $0x78] sm:$0xff]  ;;  %v310_v37 = vld [vmem:[%s5553_s28 + $0xf0] sm:$0xff] }
  0x49   : > { %4920 = vmatprep.subr.bf16.mxu0 %v5105_v10  ;;  %4964 = vmatprep.subr.bf16.mxu1 %v5105_v10  ;;  %v794_v47 = vadd.f32 %v793_v40, %v792_v39  ;;  %v782_v51 = vadd.f32 %v781_v46, %v780_v45  ;;  %v800_v56 = vadd.f32 %v799_v49, %v798_v48  ;;  %v311_v38 = vld [vmem:[%s5553_s28 + $0xf8] sm:$0xff]  ;;  %v5402_v48 = vmov 2102212464  }
  0x4a   : > { %v786_v17 = vmul.f32 65536.0, %v785_v7  ;;  %v787_v18 = vcvt.s32.f32 %v784_v6  ;;  %v325_v29 = vpack.c.bf16 %v307_v20, %v306_v19  ;;  %v318_v34 = vpack.c.bf16 %v293_v23, %v292_v21 }
  0x4b   : > { %v891_v55 = vmul.f32 5.9604645e-08, %v794_v47  ;;  %v889_v59 = vmul.f32 5.9604645e-08, %v782_v51  ;;  %v892_v0 = vmul.f32 5.9604645e-08, %v800_v56  ;;  %v319_v41 = vpack.c.bf16 %v295_v31, %v294_v30 }
  0x4c   : > { %4921 = vmatpush3.bf16.msra.mxu0 %v5105_v10  ;;  %4972 = vmatpush3.bf16.msra.mxu1 %v5105_v10  ;;  %v788_v33 = vadd.f32 %v787_v18, %v786_v17  ;;  %v327_v46 = vpack.c.bf16 %v311_v38, %v310_v37  ;;  %v5403_v52 = vmov 683565275   ;;  %v5404_v54 = vmov 2475754826  }
  0x4d   : > { %4922 = vmatprep.subr.bf16.mxu0 %v5106_v11  ;;  %4965 = vmatprep.subr.bf16.mxu1 %v5106_v11  ;;  %v5613_v63 = vmul.f32 6.2831855, %v891_v55  ;;  %v5615_v3 = vmul.f32 6.2831855, %v889_v59  ;;  %v5618_v5 = vmul.f32 6.2831855, %v892_v0 }
  0x4e   : > { %v5638_v45 = vmul.f32 5.9604645e-08, %v788_v33  ;;  %v5405_v57 = vmov 2131351028   ;;  %v5406_v62 = vmov 920167782  }
  0x4f   : > { %v1306_v4 = vand.u32 2139095040, %v5613_v63  ;;  %v1100_v10 = vand.u32 2139095040, %v5615_v3  ;;  %v1409_v16 = vand.u32 2139095040, %v5618_v5  ;;  %v1303_v47 = vand.u32 2147483647, %v5613_v63 }
  0x50   : > { %4923 = vmatpush3.bf16.msra.mxu0 %v5106_v11  ;;  %4973 = vmatpush3.bf16.msra.mxu1 %v5106_v11  ;;  %v5407_v6 = vmov 1326507024  }
  0x51   : > { %4924 = vmatprep.subr.bf16.mxu0 %v5107_v12  ;;  %4966 = vmatprep.subr.bf16.mxu1 %v5107_v12  ;;  %v1307_v11 = vshrl.u32 %v1306_v4, 23  ;;  %v1410_v32 = vshrl.u32 %v1409_v16, 23  ;;  %v1310_v50 = vand.u32 8388607, %v1303_v47  ;;  %vm5793_vm15 = vcmp.le.f32.partialorder %v1303_v47, 0.7853982 }
  0x53   : > { %v4757_v15 = vadd.s32 4294967169, %v1307_v11  ;;  %v1311_v60 = vor.u32 8388608, %v1310_v50 }
  0x54   : > { %4925 = vmatpush3.bf16.msra.mxu0 %v5107_v12  ;;  %4974 = vmatpush3.bf16.msra.mxu1 %v5107_v12  ;;  %v1101_v12 = vshrl.u32 %v1100_v10, 23 }
  0x55   : > { %4926 = vmatprep.subr.bf16.mxu0 %v5108_v14  ;;  %4967 = vmatprep.subr.bf16.mxu1 %v5108_v14  ;;  %v1313_v26 = vadd.s32 1, %v4757_v15  ;;  %v1097_v15 = vand.u32 2147483647, %v5615_v3 }
  0x56   : > { %v4749_v22 = vadd.s32 4294967169, %v1101_v12  ;;  %v1351_v12 = vshll.u32 %v1311_v60, 8 }
  0x57   : > { %vm1314_vm0 = vcmp.gt.s32.totalorder %v1313_v26, 0 }
  0x58   : > { %4927 = vmatpush3.bf16.msra.mxu0 %v5108_v14  ;;  %4975 = vmatpush3.bf16.msra.mxu1 %v5108_v14  ;;  %v291_v14 = vld [vmem:[%s5553_s28 + $0x58] sm:$0xff]  ;;  %v1315_v36 = vsel %vm1314_vm0, %v1313_v26, 0  ;;  %vm1305_vm0 = vcmp.lt.s32.totalorder %v5613_v63, 0 }
  0x59   : > { %v317_v27 = vpack.c.bf16 %v291_v14, %v290_v13  ;;  %v1317_v39 = vand.u32 31, %v1315_v36  ;;  %v1316_v51 = vshrl.u32 %v1315_v36, 5 }
  0x5b   : > { %4929 = vmatmul.mubr.bf16.vlgmr.msra.gmra.mrb[0].mxu0 %v313_v28  ;;  %4945 = vmatmul.mubr.bf16.vlgmr.msra.gmra.mrb[0].mxu1 %v321_v35  ;;  %v1107_v28 = vadd.s32 1, %v4749_v22  ;;  %v326_v35 = vpack.c.bf16 %v309_v25, %v308_v24  ;;  %v1318_v42 = vsub.s32 32, %v1317_v39  ;;  %v1329_v49 = vshll.u32 %v5402_v48, %v1317_v39 }
  0x5c   : > { %4932 = vmatprep.mubr.bf16.mxu0 %v314_v43  ;;  %4948 = vmatprep.mubr.bf16.mxu1 %v322_v44  ;;  %v5636_v44 = vadd.s32 4294967169, %v1410_v32  ;;  %v1320_v53 = vshll.u32 %v5403_v52, %v1317_v39  ;;  %v1323_v56 = vshll.u32 %v5404_v54, %v1317_v39  ;;  %v1326_v59 = vshll.u32 %v5405_v57, %v1317_v39 }
  0x5d   : > { %vm1108_vm1 = vcmp.gt.s32.totalorder %v1107_v28, 0  ;;  %v1321_v55 = vshrl.u32 %v5404_v54, %v1318_v42  ;;  %v1324_v58 = vshrl.u32 %v5405_v57, %v1318_v42  ;;  %v1327_v61 = vshrl.u32 %v5402_v48, %v1318_v42 }
  0x5e   : > { %v1109_v40 = vsel %vm1108_vm1, %v1107_v28, 0  ;;  %v1330_v0 = vshrl.u32 %v5406_v62, %v1318_v42  ;;  %v1333_v7 = vshrl.u32 %v5407_v6, %v1318_v42  ;;  %vm1335_vm2 = vcmp.lt.s32.totalorder %v1316_v51, 1 }
  0x5f   : > { %v5634_v43 = vand.u32 31, %v1109_v40  ;;  %v1325_v4 = vor.u32 %v1324_v58, %v1323_v56  ;;  %vm1336_vm3 = vcmp.lt.s32.totalorder %v1316_v51, 2  ;;  %vm1337_vm4 = vcmp.lt.s32.totalorder %v1316_v51, 3 }
  0x60   : > { %vm1338_vm5 = vcmp.lt.s32.totalorder %v1316_v51, 4  ;;  %v5656_v16 = vshrl.u32 %v1109_v40, 5  ;;  %v1319_v17 = vshrl.u32 %v5403_v52, %v1318_v42  ;;  %v1104_v24 = vand.u32 8388607, %v1097_v15 }
  0x61   : > { %v1112_v20 = vsub.s32 32, %v5634_v43  ;;  %v1114_v36 = vshll.u32 %v5403_v52, %v5634_v43  ;;  %v1117_v38 = vshll.u32 %v5404_v54, %v5634_v43  ;;  %v1120_v40 = vshll.u32 %v5405_v57, %v5634_v43 }
  0x62   : > { %v1105_v32 = vor.u32 8388608, %v1104_v24  ;;  %v1123_v42 = vshll.u32 %v5402_v48, %v5634_v43  ;;  %vm1129_vm7 = vcmp.lt.s32.totalorder %v5656_v16, 1  ;;  %vm1130_vm8 = vcmp.lt.s32.totalorder %v5656_v16, 2 }
  0x63   : > { %4933 = vmatmul.mubr.bf16.gmra.mrb[4].mxu0 %v315_v1  ;;  %4949 = vmatmul.mubr.bf16.gmra.mrb[4].mxu1 %v323_v2  ;;  %v1332_v1 = vshll.u32 %v5406_v62, %v1317_v39  ;;  %v1322_v2 = vor.u32 %v1321_v55, %v1320_v53  ;;  %v1113_v28 = vshrl.u32 %v5403_v52, %v1112_v20  ;;  %vm1131_vm9 = vcmp.lt.s32.totalorder %v5656_v16, 3 }
  0x64   : > { %4936 = vmatprep.mubr.bf16.mxu0 %v316_v8  ;;  %4952 = vmatprep.mubr.bf16.mxu1 %v324_v9  ;;  %v1328_v8 = vor.u32 %v1327_v61, %v1326_v59  ;;  %v1331_v9 = vor.u32 %v1330_v0, %v1329_v49  ;;  %v1115_v37 = vshrl.u32 %v5404_v54, %v1112_v20  ;;  %vm1132_vm10 = vcmp.lt.s32.totalorder %v5656_v16, 4 }
  0x65   : > { %v1334_v10 = vor.u32 %v1333_v7, %v1332_v1  ;;  %v1343_v11 = vsel %vm1335_vm2, %v1322_v2, %v1325_v4  ;;  %v1339_v25 = vsel %vm1335_vm2, %v1319_v17, %v1322_v2  ;;  %v1118_v39 = vshrl.u32 %v5405_v57, %v1112_v20 }
  0x66   : > { %v1344_v13 = vsel %vm1338_vm5, %v1331_v9, 920167782  ;;  %v1347_v14 = vsel %vm1335_vm2, %v1325_v4, %v1328_v8  ;;  %v1340_v21 = vsel %vm1338_vm5, %v1328_v8, 2102212464  ;;  %v1126_v49 = vshll.u32 %v5406_v62, %v5634_v43 }
  0x67   : > { %v1345_v18 = vsel %vm1337_vm4, %v1328_v8, %v1344_v13  ;;  %v1348_v19 = vsel %vm1338_vm5, %v1334_v10, 1326507024  ;;  %v1341_v26 = vsel %vm1337_vm4, %v1325_v4, %v1340_v21  ;;  %v1116_v50 = vor.u32 %v1115_v37, %v1114_v36  ;;  %v617_v21 = vld [vmem:[%s5588_s8] sm:$0xff] }
  0x68   : > { %v1346_v22 = vsel %vm1336_vm3, %v1343_v11, %v1345_v18  ;;  %v1349_v23 = vsel %vm1337_vm4, %v1331_v9, %v1348_v19  ;;  %v1119_v51 = vor.u32 %v1118_v39, %v1117_v38  ;;  %v1127_v53 = vshrl.u32 %v5407_v6, %v1112_v20  ;;  %v639_v19 = vld [vmem:[%s5588_s8 + $0xb0] sm:$0xff] }
  0x69   : > { %v1133_v60 = vsel %vm1129_vm7, %v1113_v28, %v1116_v50  ;;  %v1145_v10 = vshll.u32 %v1105_v32, 8  ;;  %v1416_v11 = vadd.s32 1, %v5636_v44  ;;  %v5728_v16 = vmul.f32 6.2831855, %v5638_v45 }
  0x6a   : > { %v1128_v59 = vor.u32 %v1127_v53, %v1126_v49  ;;  %v1137_v0 = vsel %vm1129_vm7, %v1116_v50, %v1119_v51  ;;  %vm1099_vm5 = vcmp.lt.s32.totalorder %v5615_v3, 0 }
  0x6b   : > { %4937 = vmatmul.mubr.bf16.gmra.mrb[8].mxu0 %v317_v27  ;;  %4953 = vmatmul.mubr.bf16.gmra.mrb[8].mxu1 %v325_v29  ;;  %v1350_v27 = vsel %vm1336_vm3, %v1347_v14, %v1349_v23  ;;  %v1342_v29 = vsel %vm1336_vm3, %v1339_v25, %v1341_v26  ;;  %v649_v25 = vshrl.u32 %v617_v21, 8  ;;  %vm1417_vm11 = vcmp.gt.s32.totalorder %v1416_v11, 0 }
  0x6c   : > { %4940 = vmatprep.mubr.bf16.mxu0 %v318_v34  ;;  %4956 = vmatprep.mubr.bf16.mxu1 %v326_v35  ;;  %v5670_v30 = vmul.u32.u64.low %v1351_v12, %v1350_v27  ;;  %v5671_v31 = vmul.u32.u64.high %v1351_v12, %v1350_v27, %v5670_v30  ;;  %v5673_v33 = vmul.u32.u64.low %v1351_v12, %v1346_v22  ;;  %v5674_v34 = vmul.u32.u64.high %v1351_v12, %v1346_v22, %v5673_v33 }
  0x6d   : > { %v1358_v35 = vmul.u32 %v1351_v12, %v1342_v29  ;;  %v1142_v9 = vsel %vm1132_vm10, %v1128_v59, 1326507024  ;;  %v619_v12 = vld [vmem:[%s5588_s8 + $0x10] sm:$0xff]  ;;  %v671_v29 = vshrl.u32 %v639_v19, 8  ;;  %v681_v32 = vshrl.u32 %v649_v25, 16 }
  0x6e   : > { %vm1360_vm6 = vc.u32 %v5671_v31, %v5673_v33  ;;  %v1361_v55 = vadd.s32 1, %v5674_v34 }
  0x70   : > { %v1362_v43 = vsel %vm1360_vm6, %v1361_v55, %v5674_v34 }
  0x71   : > { %v1363_v1 = vadd.s32 %v1362_v43, %v1358_v35  ;;  %v620_v35 = vld [vmem:[%s5588_s8 + $0x18] sm:$0xff] }
  0x72   : > { %v652_v50 = vshrl.u32 %v620_v35, 8 }
  0x73   : > { %4941 = vmatmul.mubr.bf16.gmra.mrb[12].mxu0 %v319_v41  ;;  %4957 = vmatmul.mubr.bf16.gmra.mrb[12].mxu1 %v327_v46  ;;  %v1121_v41 = vshrl.u32 %v5402_v48, %v1112_v20  ;;  %v1124_v46 = vshrl.u32 %v5406_v62, %v1112_v20  ;;  %v1364_v13 = vadd.s32 536870912, %v1363_v1  ;;  %v651_v20 = vshrl.u32 %v619_v12, 8 }
  0x75   : > { %v1122_v56 = vor.u32 %v1121_v41, %v1120_v40  ;;  %v1125_v58 = vor.u32 %v1124_v46, %v1123_v42  ;;  %v5720_v24 = vshrl.u32 %v1364_v13, 30  ;;  %v693_v28 = vshrl.u32 %v651_v20, 16 }
  0x76   : > { %v694_v36 = vand.u32 65535, %v651_v20  ;;  %v682_v40 = vand.u32 65535, %v649_v25  ;;  %v683_v41 = vcvt.s32.f32 %v681_v32  ;;  %v5743_v20 = vand.u32 65535, %v671_v29 }
  0x77   : > { %v1134_v61 = vsel %vm1132_vm10, %v1122_v56, 2102212464  ;;  %v1138_v4 = vsel %vm1132_vm10, %v1125_v58, 920167782  ;;  %v1141_v7 = vsel %vm1129_vm7, %v1119_v51, %v1122_v56  ;;  %v1143_v18 = vsel %vm1131_vm9, %v1125_v58, %v1142_v9 }
  0x78   : > { %v1135_v2 = vsel %vm1131_vm9, %v1119_v51, %v1134_v61  ;;  %v1139_v8 = vsel %vm1131_vm9, %v1122_v56, %v1138_v4  ;;  %v1144_v22 = vsel %vm1130_vm8, %v1141_v7, %v1143_v18  ;;  %v1366_v30 = vshll.u32 %v5720_v24, 30 }
  0x79   : > { %v1136_v14 = vsel %vm1130_vm8, %v1133_v60, %v1135_v2  ;;  %v1140_v17 = vsel %vm1130_vm8, %v1137_v0, %v1139_v8  ;;  %v5722_v26 = vmul.u32.u64.low %v1145_v10, %v1144_v22  ;;  %v5723_v27 = vmul.u32.u64.high %v1145_v10, %v1144_v22, %v5722_v26  ;;  %v5737_v0 = vld [vmem:[%s5588_s8 + $0xa0] sm:$0xff] }
  0x7a   : > { %v5716_v23 = vmul.u32.u64.low %v1145_v10, %v1140_v17  ;;  %v5717_v44 = vmul.u32.u64.high %v1145_v10, %v1140_v17, %v5716_v23  ;;  %v1152_v34 = vmul.u32 %v1145_v10, %v1136_v14  ;;  %v695_v37 = vcvt.s32.f32 %v693_v28 }
  0x7b   : > { %v1367_v39 = vsub.s32 %v1363_v1, %v1366_v30  ;;  %v697_v46 = vcvt.s32.f32 %v694_v36  ;;  %v684_v45 = vmul.f32 65536.0, %v683_v41  ;;  %v685_v53 = vcvt.s32.f32 %v682_v40 }
  0x7c   : > { %v1155_v38 = vadd.s32 1, %v5717_v44  ;;  %vm1154_vm12 = vc.u32 %v5723_v27, %v5716_v23  ;;  %v696_v42 = vmul.f32 65536.0, %v695_v37  ;;  %v1203_v58 = vand.u32 2139095040, %v5728_v16 }
  0x7d   : > { %v1369_v51 = vsub.s32 0, %v1367_v39  ;;  %v686_v43 = vadd.f32 %v685_v53, %v684_v45  ;;  %v1418_v61 = vsel %vm1417_vm11, %v1416_v11, 0  ;;  %v699_v2 = vshrl.u32 %v652_v50, 16 }
  0x7e   : > { %v1156_v49 = vsel %vm1154_vm12, %v1155_v38, %v5717_v44  ;;  %v698_v56 = vadd.f32 %v697_v46, %v696_v42  ;;  %v813_v9 = vshrl.u32 %v671_v29, 16  ;;  %v1420_v12 = vand.u32 31, %v1418_v61 }
  0x7f   : > { %v1157_v55 = vadd.s32 %v1156_v49, %v1152_v34  ;;  %v4758_v59 = vmin.u32 %v1369_v51, %v1367_v39  ;;  %v873_v7 = vmul.f32 5.9604645e-08, %v686_v43  ;;  %v1204_v13 = vshrl.u32 %v1203_v58, 23 }
  0x80   : > { %v875_v1 = vmul.f32 5.9604645e-08, %v698_v56  ;;  %v669_v14 = vshrl.u32 %v5737_v0, 8  ;;  %v700_v11 = vand.u32 65535, %v652_v50  ;;  %v701_v21 = vcvt.s32.f32 %v699_v2 }
  0x81   : > { %v1158_v60 = vadd.s32 536870912, %v1157_v55  ;;  %v1371_v4 = vclz %v4758_v59  ;;  %v905_v18 = vsub.f32 1.0, %v873_v7  ;;  %v1406_v22 = vand.u32 2147483647, %v5618_v5 }
  0x82   : > { %v907_v10 = vsub.f32 1.0, %v875_v1  ;;  %v1359_v44 = vadd.s32 %v5673_v33, %v5671_v31  ;;  %v815_v26 = vcvt.s32.f32 %v813_v9  ;;  %v5750_v30 = vsub.s32 32, %v1420_v12 }
  0x83   : > { %v5739_v8 = vshrl.u32 %v1158_v60, 30  ;;  %v4759_v17 = vadd.s32 4294967294, %v1371_v4  ;;  %v4753_v32 = vadd.s32 4294967169, %v1204_v13  ;;  %v702_v37 = vmul.f32 65536.0, %v701_v21 }
  0x84   : > { %5109 = vlog2.f32 %v907_v10  ;;  %v703_v38 = vcvt.s32.f32 %v700_v11  ;;  %v5755_v40 = vand.u32 8388607, %v1406_v22  ;;  %v5759_v31 = vshrl.u32 %v669_v14, 16 }
  0x85   : > { %v1160_v19 = vshll.u32 %v5739_v8, 30  ;;  %vm4760_vm13 = vcmp.lt.s32.totalorder %v4759_v17, 0  ;;  %5111 = vlog2.f32 %v905_v18  ;;  %v5762_v46 = vmul.f32 65536.0, %v815_v26 }
  0x86   : > { %v1374_v28 = vsel %vm4760_vm13, 0, %v4759_v17  ;;  %v1424_v49 = vshrl.u32 %v5404_v54, %v5750_v30  ;;  %v5767_v50 = vadd.s32 1, %v4753_v32  ;;  %v817_v51 = vcvt.s32.f32 %v5743_v20 }
  0x87   : > { %v5748_v25 = vsub.s32 %v1157_v55, %v1160_v19  ;;  %v1375_v34 = vsub.s32 32, %v1374_v28  ;;  %v1376_v29 = vshll.u32 %v1367_v39, %v1374_v28  ;;  %v1379_v35 = vsub.s32 4294967266, %v1374_v28 }
  0x88   : > { %v1423_v39 = vshll.u32 %v5403_v52, %v1420_v12  ;;  %v5770_v56 = vshrl.u32 %v1418_v61, 5  ;;  %v704_v58 = vadd.f32 %v703_v38, %v702_v37  ;;  %v1414_v59 = vor.u32 8388608, %v5755_v40 }
  0x89   : > { %v1163_v36 = vsub.s32 0, %v5748_v25  ;;  %v1377_v33 = vshrl.u32 %v1359_v44, %v1375_v34  ;;  %v1380_v41 = vadd.s32 127, %v1379_v35  ;;  %v1426_v43 = vshll.u32 %v5404_v54, %v1420_v12 }
  0x8a   : > { %v1432_v60 = vshll.u32 %v5402_v48, %v1420_v12  ;;  %v1433_v7 = vshrl.u32 %v5406_v62, %v5750_v30  ;;  %v5777_v10 = vor.u32 %v1424_v49, %v1423_v39  ;;  %v1427_v61 = vshrl.u32 %v5405_v57, %v5750_v30 }
  0x8b   : > { %v4750_v42 = vmin.u32 %v1163_v36, %v5748_v25  ;;  %v1378_v45 = vor.u32 %v1377_v33, %v1376_v29  ;;  %v1381_v53 = vshll.u32 %v1380_v41, 23  ;;  %v1435_v13 = vshll.u32 %v5406_v62, %v1420_v12 }
  0x8c   : > { %v1436_v17 = vshrl.u32 %v5407_v6, %v5750_v30  ;;  %v1153_v11 = vadd.s32 %v5716_v23, %v5723_v27  ;;  %v876_v26 = vmul.f32 5.9604645e-08, %v704_v58  ;;  %v1429_v28 = vshll.u32 %v5405_v57, %v1420_v12 }
  0x8d   : > { %v1165_v55 = vclz %v4750_v42  ;;  %v1382_v1 = vor.u32 4788187, %v1381_v53  ;;  %v1385_v2 = vcvt.s32.f32 %v1378_v45  ;;  %v1430_v32 = vshrl.u32 %v5402_v48, %v5750_v30 }
  0x8e   : > { %v5110_v9 = vpop.eup %5109  ;;  %v1434_v36 = vor.u32 %v1433_v7, %v1432_v60  ;;  %v1437_v27 = vor.u32 %v1436_v17, %v1435_v13  ;;  %v5800_v39 = vor.u32 %v1427_v61, %v1426_v43  ;;  %vm1441_vm1 = vcmp.lt.s32.totalorder %v5770_v56, 4 }
  0x8f   : > { %v4751_v4 = vadd.s32 4294967294, %v1165_v55  ;;  %v926_v18 = vmul.f32 0.6931472, %v5110_v9  ;;  %v1383_v19 = vand.u32 2147483647, %v1382_v1  ;;  %v5112_v21 = vpop.eup %5111  ;;  %v908_v49 = vsub.f32 1.0, %v876_v26 }
  0x90   : > { %v922_v41 = vmul.f32 0.6931472, %v5112_v21  ;;  %v1431_v45 = vor.u32 %v1430_v32, %v1429_v28  ;;  %vm1438_vm2 = vcmp.lt.s32.totalorder %v5770_v56, 1  ;;  %v1389_v53 = vsub.s32 4, %v5720_v24 }
  0x91   : > { %vm4752_vm14 = vcmp.lt.s32.totalorder %v4751_v4, 0  ;;  %v5789_v34 = vmul.f32 -2.0, %v926_v18  ;;  %v1386_v29 = vmul.f32 %v1385_v2, %v1383_v19  ;;  %vm1440_vm3 = vcmp.lt.s32.totalorder %v5770_v56, 3 }
  0x92   : > { %v1168_v44 = vsel %vm4752_vm14, 0, %v4751_v4  ;;  %v1447_v43 = vsel %vm1441_vm1, %v1434_v36, 920167782  ;;  %v1451_v60 = vsel %vm1441_vm1, %v1437_v27, 1326507024  ;;  %v1390_v1 = vsel %vm1305_vm0, %v1389_v53, %v5720_v24 }
  0x93   : > { %v1169_v35 = vsub.s32 32, %v1168_v44  ;;  %v1173_v23 = vsub.s32 4294967266, %v1168_v44  ;;  %5113 = vrsqrt.f32 %v5789_v34  ;;  %v1387_v12 = vxor.u32 2147483648, %v1386_v29 }
  0x94   : > { %v1170_v38 = vshll.u32 %v5748_v25, %v1168_v44  ;;  %v5818_v2 = vmul.f32 -2.0, %v922_v41  ;;  %v1392_v7 = vsel %vm5793_vm15, 0, %v1390_v1  ;;  %v1422_v9 = vshrl.u32 %v5403_v52, %v5750_v30 }
  0x95   : > { %v1171_v33 = vshrl.u32 %v1153_v11, %v1169_v35  ;;  %v1174_v42 = vadd.s32 127, %v1173_v23  ;;  %v1388_v47 = vsel %vm1305_vm0, %v1387_v12, %v1386_v29  ;;  %vm1439_vm4 = vcmp.lt.s32.totalorder %v5770_v56, 2 }
  0x96   : > { %v1391_v25 = vsel %vm5793_vm15, %v5613_v63, %v1388_v47  ;;  %v1446_v61 = vsel %vm1438_vm2, %v5777_v10, %v5800_v39  ;;  %v3062_v13 = vadd.s32 3, %v1392_v7  ;;  %v1448_v24 = vsel %vm1440_vm3, %v1431_v45, %v1447_v43 }
  0x97   : > { %v1175_v55 = vshll.u32 %v1174_v42, 23  ;;  %5115 = vcosq.f32 %v1391_v25  ;;  %v1172_v58 = vor.u32 %v1171_v33, %v1170_v38  ;;  %v1450_v17 = vsel %vm1438_vm2, %v5800_v39, %v1431_v45 }
  0x98   : > { %5117 = vsinq.f32 %v1391_v25  ;;  %v1452_v18 = vsel %vm1440_vm3, %v1434_v36, %v1451_v60  ;;  %v1183_v11 = vsub.s32 4, %v5739_v8  ;;  %v5840_v21 = vshll.u32 %v1414_v59, 8  ;;  %v618_v60 = vld [vmem:[%s5588_s8 + $0x8] sm:$0xff] }
  0x99   : > { %v1176_v4 = vor.u32 4788187, %v1175_v55  ;;  %v1179_v30 = vcvt.s32.f32 %v1172_v58  ;;  %5119 = vlog2.f32 %v908_v49  ;;  %v5845_v44 = vadd.f32 %v817_v51, %v5762_v46 }
  0x9a   : > { %5121 = vrsqrt.f32 %v5818_v2  ;;  %v803_v26 = vcvt.s32.f32 %v5759_v31  ;;  %v1396_v32 = vand.u32 3, %v1392_v7  ;;  %v3063_v29 = vand.u32 3, %v3062_v13 }
  0x9b   : > { %v1177_v19 = vand.u32 2147483647, %v1176_v4  ;;  %v1449_v35 = vsel %vm1439_vm4, %v1446_v61, %v1448_v24  ;;  %v1453_v36 = vsel %vm1439_vm4, %v1450_v17, %v1452_v18  ;;  %v1442_v20 = vsel %vm1438_vm2, %v1422_v9, %v5777_v10 }
  0x9c   : > { %v1443_v46 = vsel %vm1441_vm1, %v1431_v45, 2102212464  ;;  %vm985_vm6 = vcmp.eq.f32.partialorder %v5789_v34, inf  ;;  %vm5862_vm7 = vcmp.le.f32.partialorder %v1097_v15, 0.7853982  ;;  %v1184_v37 = vsel %vm1099_vm5, %v1183_v11, %v5739_v8 }
  0x9d   : > { %v5114_v28 = vpop.eup %5113  ;;  %v1180_v59 = vmul.f32 %v1179_v30, %v1177_v19  ;;  %vm1211_vm8 = vcmp.gt.s32.totalorder %v5767_v50, 0  ;;  %v5871_v10 = vmul.u32.u64.low %v5840_v21, %v1453_v36  ;;  %v5872_v23 = vmul.u32.u64.high %v5840_v21, %v1453_v36, %v5871_v10 }
  0x9e   : > { %v984_v40 = vmul.f32 %v5114_v28, %v5789_v34  ;;  %v5875_v27 = vmul.u32.u64.low %v5840_v21, %v1449_v35  ;;  %v5876_v12 = vmul.u32.u64.high %v5840_v21, %v1449_v35, %v5875_v27  ;;  %v988_v38 = vand.u32 2147483648, %v5789_v34 }
  0x9f   : > { %vm1398_vm9 = vcmp.eq.s32.totalorder %v1396_v32, 0  ;;  %vm1401_vm10 = vcmp.eq.s32.totalorder %v1396_v32, 2  ;;  %vm3068_vm11 = vcmp.eq.s32.totalorder %v3063_v29, 2  ;;  %vm987_vm12 = vcmp.eq.f32.partialorder %v5789_v34, 0.0 }
  0xa0   : > { %v986_v8 = vsel %vm985_vm6, %v5789_v34, %v984_v40  ;;  %vm3065_vm13 = vcmp.eq.s32.totalorder %v3063_v29, 0  ;;  %vm1397_vm14 = vcmp.lt.s32.totalorder %v1396_v32, 2  ;;  %vm3064_vm15 = vcmp.lt.s32.totalorder %v3063_v29, 2 }
  0xa1   : > { %v5116_v15 = vpop.eup %5115  ;;  %v1181_v47 = vxor.u32 2147483648, %v1180_v59  ;;  %vm1395_vm0 = vweird.f32 %v5613_v63  ;;  %v1444_v53 = vsel %vm1440_vm3, %v5800_v39, %v1443_v46  ;;  %v989_v55 = vsel %vm987_vm12, %v988_v38, %v986_v8 }
  0xa2   : > { %v5118_v33 = vpop.eup %5117  ;;  %v1402_v41 = vxor.u32 2147483648, %v5116_v15  ;;  %v1186_v39 = vsel %vm5862_vm7, 0, %v1184_v37  ;;  %v1445_v24 = vsel %vm1439_vm4, %v1442_v20, %v1444_v53  ;;  %v650_v19 = vshrl.u32 %v618_v60, 8 }
  0xa3   : > { %v1399_v42 = vxor.u32 2147483648, %v5118_v33  ;;  %v5120_v25 = vpop.eup %5119  ;;  %v1182_v43 = vsel %vm1099_vm5, %v1181_v47, %v1180_v59  ;;  %v2854_v11 = vadd.s32 3, %v1186_v39  ;;  %v5908_v28 = vand.u32 65535, %v669_v14 }
  0xa4   : > { %v1403_v49 = vsel %vm1401_vm10, %v1402_v41, %v5118_v33  ;;  %v3070_v45 = vsel %vm3068_vm11, %v1402_v41, %v5118_v33  ;;  %v5122_v1 = vpop.eup %5121  ;;  %v1185_v9 = vsel %vm5862_vm7, %v5615_v3, %v1182_v43  ;;  %vm971_vm1 = vcmp.eq.f32.partialorder %v5818_v2, inf }
  0xa5   : > { %v1400_v58 = vsel %vm1398_vm9, %v5116_v15, %v1399_v42  ;;  %v3067_v34 = vsel %vm3065_vm13, %v5116_v15, %v1399_v42  ;;  %5123 = vcosq.f32 %v1185_v9  ;;  %v970_v30 = vmul.f32 %v5122_v1, %v5818_v2 }
  0xa6   : > { %v1404_v4 = vsel %vm1397_vm14, %v1400_v58, %v1403_v49  ;;  %v3071_v7 = vsel %vm3064_vm15, %v3067_v34, %v3070_v45  ;;  %5125 = vsinq.f32 %v1185_v9  ;;  %v1212_v63 = vsel %vm1211_vm8, %v5767_v50, 0 }
  0xa7   : > { %v1405_v61 = vsel %vm1395_vm0, nan, %v1404_v4  ;;  %v3072_v13 = vsel %vm1395_vm0, nan, %v3071_v7  ;;  %v895_v56 = vmul.f32 5.9604645e-08, %v5845_v44  ;;  %v804_v0 = vmul.f32 65536.0, %v803_v26 }
  0xa8   : > { %v5901_v17 = vmul.f32 %v1405_v61, %v989_v55  ;;  %v5903_v18 = vmul.f32 %v3072_v13, %v989_v55  ;;  %v1190_v14 = vand.u32 3, %v1186_v39  ;;  %v928_v32 = vmul.f32 0.6931472, %v5120_v25 }
  0xa9   : > { %v1461_v29 = vmul.u32 %v5840_v21, %v1445_v24  ;;  %vm1463_vm2 = vc.u32 %v5872_v23, %v5875_v27  ;;  %v974_v35 = vand.u32 2147483648, %v5818_v2  ;;  %v1464_v36 = vadd.s32 1, %v5876_v12 }
  0xaa   : > { %4444 = vst [vmem:[%s5911_s10 + $0x10] sm:$0xff] %v5901_v17  ;;  %4460 = vst [vmem:[%s5911_s10 + $0x90] sm:$0xff] %v5903_v18  ;;  %v687_v40 = vshrl.u32 %v650_v19, 16  ;;  %v688_v20 = vand.u32 65535, %v650_v19  ;;  %v972_v50 = vsel %vm971_vm1, %v5818_v2, %v970_v30  ;;  %vm973_vm3 = vcmp.eq.f32.partialorder %v5818_v2, 0.0 }
  0xab   : > { %v2855_v44 = vand.u32 3, %v2854_v11  ;;  %v805_v31 = vcvt.s32.f32 %v5908_v28  ;;  %v1465_v26 = vsel %vm1463_vm2, %v1464_v36, %v5876_v12  ;;  %v5933_v51 = vmul.f32 6.2831855, %v895_v56 }
  0xac   : > { %v689_v46 = vcvt.s32.f32 %v687_v40  ;;  %v691_v21 = vcvt.s32.f32 %v688_v20  ;;  %v5935_v59 = vmul.f32 -2.0, %v928_v32  ;;  %v1466_v37 = vadd.s32 %v1465_v26, %v1461_v29 }
  0xad   : > { %v1200_v10 = vand.u32 2147483647, %v5728_v16  ;;  %v1214_v15 = vand.u32 31, %v1212_v63  ;;  %v975_v38 = vsel %vm973_vm3, %v974_v35, %v972_v50  ;;  %vm1189_vm4 = vweird.f32 %v5615_v3 }
  0xae   : > { %vm1191_vm5 = vcmp.lt.s32.totalorder %v1190_v14, 2  ;;  %v690_v2 = vmul.f32 65536.0, %v689_v46  ;;  %vm1192_vm6 = vcmp.eq.s32.totalorder %v1190_v14, 0  ;;  %vm1195_vm7 = vcmp.eq.s32.totalorder %v1190_v14, 2 }
  0xaf   : > { %v5124_v33 = vpop.eup %5123  ;;  %vm2860_vm8 = vcmp.eq.s32.totalorder %v2855_v44, 2  ;;  %v1467_v12 = vadd.s32 536870912, %v1466_v37  ;;  %vm2857_vm9 = vcmp.eq.s32.totalorder %v2855_v44, 0  ;;  %v1215_v47 = vsub.s32 32, %v1214_v15 }
  0xb0   : > { %v5126_v8 = vpop.eup %5125  ;;  %v1196_v41 = vxor.u32 2147483648, %v5124_v33  ;;  %v692_v42 = vadd.f32 %v691_v21, %v690_v2  ;;  %vm2856_vm10 = vcmp.lt.s32.totalorder %v2855_v44, 2  ;;  %v1207_v53 = vand.u32 8388607, %v1200_v10 }
  0xb1   : > { %v1193_v49 = vxor.u32 2147483648, %v5126_v8  ;;  %v5939_v45 = vshrl.u32 %v1467_v12, 30  ;;  %v5943_v58 = vshrl.u32 %v1212_v63, 5  ;;  %v1217_v34 = vshll.u32 %v5403_v52, %v1214_v15 }
  0xb2   : > { %v1197_v25 = vsel %vm1195_vm7, %v1196_v41, %v5126_v8  ;;  %v2862_v55 = vsel %vm2860_vm8, %v1196_v41, %v5126_v8  ;;  %v1220_v4 = vshll.u32 %v5404_v54, %v1214_v15  ;;  %v874_v39 = vmul.f32 5.9604645e-08, %v692_v42 }
  0xb3   : > { %v1194_v43 = vsel %vm1192_vm6, %v5124_v33, %v1193_v49  ;;  %v2859_v60 = vsel %vm2857_vm9, %v5124_v33, %v1193_v49  ;;  %v1469_v1 = vshll.u32 %v5939_v45, 30  ;;  %v1218_v61 = vshrl.u32 %v5404_v54, %v1215_v47 }
  0xb4   : > { %v1198_v7 = vsel %vm1191_vm5, %v1194_v43, %v1197_v25  ;;  %v2863_v9 = vsel %vm2856_vm10, %v2859_v60, %v2862_v55  ;;  %v1221_v30 = vshrl.u32 %v5405_v57, %v1215_v47  ;;  %v1223_v63 = vshll.u32 %v5405_v57, %v1214_v15 }
  0xb5   : > { %v1199_v13 = vsel %vm1189_vm4, nan, %v1198_v7  ;;  %v2864_v24 = vsel %vm1189_vm4, nan, %v2863_v9  ;;  %v5955_v19 = vsub.s32 %v1466_v37, %v1469_v1  ;;  %v1226_v56 = vshll.u32 %v5402_v48, %v1214_v15 }
  0xb6   : > { %v5958_v11 = vmul.f32 %v1199_v13, %v975_v38  ;;  %v5960_v28 = vmul.f32 %v2864_v24, %v975_v38  ;;  %5127 = vrsqrt.f32 %v5935_v59  ;;  %v1718_v32 = vand.u32 2139095040, %v5933_v51 }
  0xb7   : > { %v1472_v14 = vsub.s32 0, %v5955_v19  ;;  %v806_v3 = vadd.f32 %v805_v31, %v804_v0  ;;  %v1208_v29 = vor.u32 8388608, %v1207_v53  ;;  %v1224_v35 = vshrl.u32 %v5402_v48, %v1215_v47 }
  0xb8   : > { %4442 = vst [vmem:[%s5911_s10] sm:$0xff] %v5958_v11  ;;  %4458 = vst [vmem:[%s5911_s10 + $0x80] sm:$0xff] %v5960_v28  ;;  %v1227_v36 = vshrl.u32 %v5406_v62, %v1215_v47  ;;  %vm1232_vm11 = vcmp.lt.s32.totalorder %v5943_v58, 1  ;;  %v906_v20 = vsub.f32 1.0, %v874_v39  ;;  %v1219_v50 = vor.u32 %v1218_v61, %v1217_v34 }
  0xb9   : > { %v4762_v40 = vmin.u32 %v1472_v14, %v5955_v19  ;;  %v1222_v44 = vor.u32 %v1221_v30, %v1220_v4  ;;  %v1216_v26 = vshrl.u32 %v5403_v52, %v1215_v47  ;;  %v1225_v0 = vor.u32 %v1224_v35, %v1223_v63 }
  0xba   : > { %v1228_v31 = vor.u32 %v1227_v36, %v1226_v56  ;;  %v1229_v46 = vshll.u32 %v5406_v62, %v1214_v15  ;;  %v1462_v21 = vadd.s32 %v5875_v27, %v5872_v23  ;;  %v1230_v38 = vshrl.u32 %v5407_v6, %v1215_v47  ;;  %v623_v27 = vld [vmem:[%s5588_s8 + $0x30] sm:$0xff] }
  0xbb   : > { %v1474_v37 = vclz %v4762_v40  ;;  %vm1235_vm12 = vcmp.lt.s32.totalorder %v5943_v58, 4  ;;  %v1492_v2 = vsub.s32 4, %v5939_v45  ;;  %vm1233_vm13 = vcmp.lt.s32.totalorder %v5943_v58, 2 }
  0xbc   : > { %vm1234_vm14 = vcmp.lt.s32.totalorder %v5943_v58, 3  ;;  %v1237_v33 = vsel %vm1235_vm12, %v1225_v0, 2102212464  ;;  %5129 = vlog2.f32 %v906_v20  ;;  %v1231_v15 = vor.u32 %v1230_v38, %v1229_v46 }
  0xbd   : > { %v4763_v12 = vadd.s32 4294967294, %v1474_v37  ;;  %v1240_v23 = vsel %vm1232_vm11, %v1219_v50, %v1222_v44  ;;  %v1236_v8 = vsel %vm1232_vm11, %v1216_v26, %v1219_v50  ;;  %v1238_v41 = vsel %vm1234_vm14, %v1222_v44, %v1237_v33 }
  0xbe   : > { %v1241_v42 = vsel %vm1235_vm12, %v1228_v31, 920167782  ;;  %v1248_v47 = vshll.u32 %v1208_v29, 8  ;;  %v1244_v53 = vsel %vm1232_vm11, %v1222_v44, %v1225_v0  ;;  %v1245_v25 = vsel %vm1235_vm12, %v1231_v15, 1326507024 }
  0xbf   : > { %vm4764_vm15 = vcmp.lt.s32.totalorder %v4763_v12, 0  ;;  %v1242_v49 = vsel %vm1234_vm14, %v1225_v0, %v1241_v42  ;;  %v1246_v43 = vsel %vm1234_vm14, %v1228_v31, %v1245_v25  ;;  %v655_v60 = vshrl.u32 %v623_v27, 8 }
  0xc0   : > { %v1477_v55 = vsel %vm4764_vm15, 0, %v4763_v12  ;;  %v1243_v34 = vsel %vm1233_vm13, %v1240_v23, %v1242_v49  ;;  %v5128_v1 = vpop.eup %5127  ;;  %v1719_v39 = vshrl.u32 %v1718_v32, 23  ;;  %v1247_v61 = vsel %vm1233_vm13, %v1244_v53, %v1246_v43 }
  0xc1   : > { %v1478_v4 = vsub.s32 32, %v1477_v55  ;;  %v1479_v7 = vshll.u32 %v5955_v19, %v1477_v55  ;;  %v1482_v9 = vsub.s32 4294967266, %v1477_v55  ;;  %vm1408_vm0 = vcmp.lt.s32.totalorder %v5618_v5, 0 }
  0xc2   : > { %v6008_v13 = vmul.u32.u64.low %v1248_v47, %v1243_v34  ;;  %v6009_v24 = vmul.u32.u64.high %v1248_v47, %v1243_v34, %v6008_v13  ;;  %v1239_v56 = vsel %vm1233_vm13, %v1236_v8, %v1238_v41  ;;  %v1493_v19 = vsel %vm1408_vm0, %v1492_v2, %v5939_v45 }
  0xc3   : > { %v1480_v30 = vshrl.u32 %v1462_v21, %v1478_v4  ;;  %v1483_v63 = vadd.s32 127, %v1482_v9  ;;  %v6018_v14 = vmul.u32.u64.low %v1248_v47, %v1247_v61  ;;  %v6019_v32 = vmul.u32.u64.high %v1248_v47, %v1247_v61, %v6018_v14 }
  0xc4   : > { %v717_v29 = vshrl.u32 %v655_v60, 16  ;;  %v4773_v40 = vadd.s32 4294967169, %v1719_v39  ;;  %v893_v20 = vmul.f32 5.9604645e-08, %v806_v3  ;;  %vm6023_vm1 = vcmp.le.f32.partialorder %v1406_v22, 0.7853982 }
  0xc5   : > { %v1481_v35 = vor.u32 %v1480_v30, %v1479_v7  ;;  %v1484_v36 = vshll.u32 %v1483_v63, 23  ;;  %v1255_v58 = vmul.u32 %v1248_v47, %v1239_v56  ;;  %v1258_v44 = vadd.s32 1, %v6009_v24 }
  0xc6   : > { %v5130_v26 = vpop.eup %5129  ;;  %v1495_v31 = vsel %vm6023_vm1, 0, %v1493_v19  ;;  %vm1257_vm2 = vc.u32 %v6019_v32, %v6008_v13  ;;  %v718_v46 = vand.u32 65535, %v655_v60  ;;  %v719_v3 = vcvt.s32.f32 %v717_v29 }
  0xc7   : > { %v1485_v0 = vor.u32 4788187, %v1484_v36  ;;  %v1488_v45 = vcvt.s32.f32 %v1481_v35  ;;  %v1259_v22 = vsel %vm1257_vm2, %v1258_v44, %v6009_v24  ;;  %v1725_v37 = vadd.s32 1, %v4773_v40  ;;  %v6075_v40 = vld [vmem:[%s5588_s8 + $0x20] sm:$0xff] }
  0xc8   : > { %v6033_v38 = vmul.f32 6.2831855, %v893_v20  ;;  %v991_v2 = vmul.f32 %v5128_v1, %v5935_v59  ;;  %vm992_vm3 = vcmp.eq.f32.partialorder %v5935_v59, inf  ;;  %v3166_v33 = vadd.s32 3, %v1495_v31 }
  0xc9   : > { %v1486_v21 = vand.u32 2147483647, %v1485_v0  ;;  %v1260_v12 = vadd.s32 %v1259_v22, %v1255_v58  ;;  %v924_v23 = vmul.f32 0.6931472, %v5130_v26  ;;  %v1715_v27 = vand.u32 2147483647, %v5933_v51 }
  0xca   : > { %vm1726_vm4 = vcmp.gt.s32.totalorder %v1725_v37, 0  ;;  %v720_v41 = vmul.f32 65536.0, %v719_v3  ;;  %v721_v42 = vcvt.s32.f32 %v718_v46  ;;  %v1512_v25 = vand.u32 2139095040, %v6033_v38 }
  0xcb   : > { %v1489_v15 = vmul.f32 %v1488_v45, %v1486_v21  ;;  %v1261_v8 = vadd.s32 536870912, %v1260_v12  ;;  %v1727_v47 = vsel %vm1726_vm4, %v1725_v37, 0  ;;  %v993_v55 = vsel %vm992_vm3, %v5935_v59, %v991_v2 }
  0xcc   : > { %v1729_v53 = vand.u32 31, %v1727_v47  ;;  %vm994_vm5 = vcmp.eq.f32.partialorder %v5935_v59, 0.0  ;;  %v995_v34 = vand.u32 2147483648, %v5935_v59  ;;  %v6046_v1 = vand.u32 3, %v1495_v31 }
  0xcd   : > { %v1490_v49 = vxor.u32 2147483648, %v1489_v15  ;;  %v6042_v43 = vshrl.u32 %v1261_v8, 30  ;;  %v6048_v4 = vand.u32 3, %v3166_v33  ;;  %v6050_v7 = vmul.f32 -2.0, %v924_v23 }
  0xce   : > { %v722_v61 = vadd.f32 %v721_v42, %v720_v41  ;;  %v1722_v24 = vand.u32 8388607, %v1715_v27  ;;  %v1730_v30 = vsub.s32 32, %v1729_v53  ;;  %v6060_v56 = vshrl.u32 %v1512_v25, 23 }
  0xcf   : > { %v1491_v60 = vsel %vm1408_vm0, %v1490_v49, %v1489_v15  ;;  %v1263_v39 = vshll.u32 %v6042_v43, 30  ;;  %v4476_v19 = vlaneseq  ;;  %v6064_v14 = vsel %vm994_vm5, %v995_v34, %v993_v55 }
  0xd0   : > { %v1494_v9 = vsel %vm6023_vm1, %v5618_v5, %v1491_v60  ;;  %vm1504_vm6 = vcmp.eq.s32.totalorder %v6046_v1, 2  ;;  %vm3172_vm7 = vcmp.eq.s32.totalorder %v6048_v4, 2  ;;  %vm1501_vm8 = vcmp.eq.s32.totalorder %v6046_v1, 0 }
  0xd1   : > { %5131 = vcosq.f32 %v1494_v9  ;;  %v6058_v63 = vsub.s32 %v1260_v12, %v1263_v39  ;;  %vm3169_vm9 = vcmp.eq.s32.totalorder %v6048_v4, 0  ;;  %v6072_v35 = vmul.f32 5.9604645e-08, %v722_v61 }
  0xd2   : > { %5133 = vsinq.f32 %v1494_v9  ;;  %v1723_v36 = vor.u32 8388608, %v1722_v24  ;;  %vm1500_vm10 = vcmp.lt.s32.totalorder %v6046_v1, 2  ;;  %vm3168_vm11 = vcmp.lt.s32.totalorder %v6048_v4, 2 }
  0xd3   : > { %5135 = vrsqrt.f32 %v6050_v7  ;;  %v1266_v29 = vsub.s32 0, %v6058_v63  ;;  %v6079_v59 = vshrl.u32 %v1727_v47, 5  ;;  %v1732_v20 = vshll.u32 %v5403_v52, %v1729_v53 }
  0xd4   : > { %v1741_v50 = vshll.u32 %v5402_v48, %v1729_v53  ;;  %v1742_v58 = vshrl.u32 %v5406_v62, %v1730_v30  ;;  %vm1498_vm12 = vweird.f32 %v5618_v5  ;;  %v1733_v26 = vshrl.u32 %v5404_v54, %v1730_v30 }
  0xd5   : > { %v4754_v44 = vmin.u32 %v1266_v29, %v6058_v63  ;;  %v1735_v0 = vshll.u32 %v5404_v54, %v1729_v53  ;;  %v1736_v45 = vshrl.u32 %v5405_v57, %v1730_v30  ;;  %v1256_v31 = vadd.s32 %v6008_v13, %v6019_v32 }
  0xd6   : > { %v1738_v46 = vshll.u32 %v5405_v57, %v1729_v53  ;;  %v1739_v3 = vshrl.u32 %v5402_v48, %v1730_v30  ;;  %v653_v21 = vshrl.u32 %v6075_v40, 8  ;;  %v1731_v37 = vshrl.u32 %v5403_v52, %v1730_v30 }
  0xd7   : > { %v1268_v22 = vclz %v4754_v44  ;;  %v1744_v2 = vshll.u32 %v5406_v62, %v1729_v53  ;;  %v1745_v33 = vshrl.u32 %v5407_v6, %v1730_v30  ;;  %v1286_v12 = vsub.s32 4, %v6042_v43 }
  0xd8   : > { %v911_v15 = vsub.f32 1.0, %v6072_v35  ;;  %v1743_v23 = vor.u32 %v1742_v58, %v1741_v50  ;;  %v6099_v8 = vshll.u32 %v1723_v36, 8  ;;  %v1734_v32 = vor.u32 %v1733_v26, %v1732_v20 }
  0xd9   : > { %v4755_v13 = vadd.s32 4294967294, %v1268_v22  ;;  %v1737_v41 = vor.u32 %v1736_v45, %v1735_v0  ;;  %vm1750_vm13 = vcmp.lt.s32.totalorder %v6079_v59, 4  ;;  %vm1202_vm14 = vcmp.lt.s32.totalorder %v5728_v16, 0 }
  0xda   : > { %v1740_v47 = vor.u32 %v1739_v3, %v1738_v46  ;;  %vm1747_vm15 = vcmp.lt.s32.totalorder %v6079_v59, 1  ;;  %vm1748_vm0 = vcmp.lt.s32.totalorder %v6079_v59, 2  ;;  %vm1749_vm1 = vcmp.lt.s32.totalorder %v6079_v59, 3 }
  0xdb   : > { %v5132_v42 = vpop.eup %5131  ;;  %vm4756_vm2 = vcmp.lt.s32.totalorder %v4755_v13, 0  ;;  %v1746_v25 = vor.u32 %v1745_v33, %v1744_v2  ;;  %v1751_v55 = vsel %vm1747_vm15, %v1731_v37, %v1734_v32  ;;  %v1756_v39 = vsel %vm1750_vm13, %v1743_v23, 920167782 }
  0xdc   : > { %v5134_v49 = vpop.eup %5133  ;;  %v1505_v53 = vxor.u32 2147483648, %v5132_v42  ;;  %v1271_v60 = vsel %vm4756_vm2, 0, %v4755_v13  ;;  %v1752_v9 = vsel %vm1750_vm13, %v1740_v47, 2102212464  ;;  %v1755_v58 = vsel %vm1747_vm15, %v1734_v32, %v1737_v41 }
  0xdd   : > { %v1502_v34 = vxor.u32 2147483648, %v5134_v49  ;;  %v5136_v61 = vpop.eup %5135  ;;  %v1272_v29 = vsub.s32 32, %v1271_v60  ;;  %v1273_v35 = vshll.u32 %v6058_v63, %v1271_v60  ;;  %v1276_v50 = vsub.s32 4294967266, %v1271_v60 }
  0xde   : > { %v1506_v24 = vsel %vm1504_vm6, %v1505_v53, %v5134_v49  ;;  %v3174_v30 = vsel %vm3172_vm7, %v1505_v53, %v5134_v49  ;;  %v1757_v63 = vsel %vm1749_vm1, %v1740_v47, %v1756_v39  ;;  %v1753_v1 = vsel %vm1749_vm1, %v1737_v41, %v1752_v9  ;;  %v4441_v53 = vld [vmem:[%s7825_s3] sm:$0x1] }
  0xdf   : > { %v1503_v36 = vsel %vm1501_vm8, %v5132_v42, %v1502_v34  ;;  %v3171_v20 = vsel %vm3169_vm9, %v5132_v42, %v1502_v34  ;;  %v1274_v0 = vshrl.u32 %v1256_v31, %v1272_v29  ;;  %v1277_v3 = vadd.s32 127, %v1276_v50 }
  0xe0   : > { %v1507_v44 = vsel %vm1500_vm10, %v1503_v36, %v1506_v24  ;;  %v3175_v26 = vsel %vm3168_vm11, %v3171_v20, %v3174_v30  ;;  %5137 = vlog2.f32 %v911_v15  ;;  %v1758_v2 = vsel %vm1748_vm0, %v1755_v58, %v1757_v63 }
  0xe1   : > { %v1508_v45 = vsel %vm1498_vm12, nan, %v1507_v44  ;;  %v3176_v46 = vsel %vm1498_vm12, nan, %v3175_v26  ;;  %v1275_v31 = vor.u32 %v1274_v0, %v1273_v35  ;;  %v1278_v37 = vshll.u32 %v1277_v3, 23 }
  0xe2   : > { %v6136_v22 = vmul.f32 %v1508_v45, %v6064_v14  ;;  %v6139_v4 = vmul.f32 %v3176_v46, %v6064_v14  ;;  %v1759_v5 = vsel %vm1747_vm15, %v1737_v41, %v1740_v47  ;;  %v1760_v33 = vsel %vm1750_vm13, %v1746_v25, 1326507024 }
  0xe3   : > { %v1282_v13 = vcvt.s32.f32 %v1275_v31  ;;  %v1287_v14 = vsel %vm1202_vm14, %v1286_v12, %v6042_v43  ;;  %v1754_v15 = vsel %vm1748_vm0, %v1751_v55, %v1753_v1  ;;  %v1761_v32 = vsel %vm1749_vm1, %v1743_v23, %v1760_v33 }
  0xe4   : > { %4445 = vst [vmem:[%s5911_s10 + $0x18] sm:$0xff] %v6136_v22  ;;  %4461 = vst [vmem:[%s5911_s10 + $0x98] sm:$0xff] %v6139_v4  ;;  %v1279_v42 = vor.u32 4788187, %v1278_v37  ;;  %v1762_v41 = vsel %vm1748_vm0, %v1759_v5, %v1761_v32  ;;  %v6161_v47 = vmul.u32.u64.low %v6099_v8, %v1758_v2  ;;  %v6162_v49 = vmul.u32.u64.high %v6099_v8, %v1758_v2, %v6161_v47 }
  0xe5   : > { %v6169_v43 = vmul.u32.u64.low %v6099_v8, %v1762_v41  ;;  %v6170_v12 = vmul.u32.u64.high %v6099_v8, %v1762_v41, %v6169_v43  ;;  %v6173_v25 = vshrl.u32 %v4476_v19, 7  ;;  %vm6177_vm3 = vcmp.le.f32.partialorder %v1200_v10, 0.7853982 }
  0xe6   : > { %v1280_v23 = vand.u32 2147483647, %v1279_v42  ;;  %v4765_v55 = vadd.s32 4294967169, %v6060_v56  ;;  %v977_v34 = vmul.f32 %v5136_v61, %v6050_v7  ;;  %vm978_vm4 = vcmp.eq.f32.partialorder %v6050_v7, inf }
  0xe7   : > { %v1289_v60 = vsel %vm6177_vm3, 0, %v1287_v14  ;;  %v1770_v9 = vmul.u32 %v6099_v8, %v1754_v15  ;;  %v1773_v39 = vadd.s32 1, %v6162_v49  ;;  %v705_v10 = vshrl.u32 %v653_v21, 16 }
  0xe8   : > { %v1283_v19 = vmul.f32 %v1282_v13, %v1280_v23  ;;  %v1519_v24 = vadd.s32 1, %v4765_v55  ;;  %v6190_v30 = vmul.f32 0.1, %v4441_v53  ;;  %v981_v56 = vand.u32 2147483648, %v6050_v7 }
  0xe9   : > { %vm1772_vm5 = vc.u32 %v6170_v12, %v6161_v47  ;;  %v2958_v29 = vadd.s32 3, %v1289_v60  ;;  %v979_v36 = vsel %vm978_vm4, %v6050_v7, %v977_v34  ;;  %vm980_vm7 = vcmp.eq.f32.partialorder %v6050_v7, 0.0 }
  0xea   : > { %v1284_v61 = vxor.u32 2147483648, %v1283_v19  ;;  %v1774_v35 = vsel %vm1772_vm5, %v1773_v39, %v6162_v49  ;;  %vm1520_vm6 = vcmp.gt.s32.totalorder %v1519_v24, 0  ;;  %v5138_v8 = vpop.eup %5137  ;;  %v4478_v58 = vsub.s32 0, %v6173_v25 }
  0xeb   : > { %v1775_v20 = vadd.s32 %v1774_v35, %v1770_v9  ;;  %v1521_v50 = vsel %vm1520_vm6, %v1519_v24, 0  ;;  %v706_v26 = vand.u32 65535, %v653_v21  ;;  %v707_v0 = vcvt.s32.f32 %v705_v10 }
  0xec   : > { %v1285_v44 = vsel %vm1202_vm14, %v1284_v61, %v1283_v19  ;;  %v1509_v46 = vand.u32 2147483647, %v6033_v38  ;;  %v1523_v3 = vand.u32 31, %v1521_v50  ;;  %v6209_v7 = vsel %vm980_vm7, %v981_v56, %v979_v36 }
  0xed   : > { %v1288_v63 = vsel %vm6177_vm3, %v5728_v16, %v1285_v44  ;;  %v1776_v45 = vadd.s32 536870912, %v1775_v20  ;;  %v6211_v1 = vand.u32 3, %v1289_v60  ;;  %v6213_v31 = vand.u32 3, %v2958_v29 }
  0xee   : > { %5139 = vcosq.f32 %v1288_v63  ;;  %v934_v37 = vmul.f32 0.6931472, %v5138_v8  ;;  %v1524_v21 = vsub.s32 32, %v1523_v3  ;;  %v708_v2 = vmul.f32 65536.0, %v707_v0 }
  0xef   : > { %5141 = vsinq.f32 %v1288_v63  ;;  %v6215_v40 = vshrl.u32 %v1776_v45, 30  ;;  %v709_v5 = vcvt.s32.f32 %v706_v26  ;;  %v6217_v33 = vshrl.u32 %v1521_v50, 5 }
  0xf0   : > { %v1535_v13 = vshll.u32 %v5402_v48, %v1523_v3  ;;  %v1526_v15 = vshll.u32 %v5403_v52, %v1523_v3  ;;  %v1527_v32 = vshrl.u32 %v5404_v54, %v1524_v21  ;;  %v1529_v42 = vshll.u32 %v5404_v54, %v1523_v3 }
  0xf1   : > { %v1778_v14 = vshll.u32 %v6215_v40, 30  ;;  %vm1294_vm8 = vcmp.lt.s32.totalorder %v6211_v1, 2  ;;  %v1530_v41 = vshrl.u32 %v5405_v57, %v1524_v21  ;;  %v1532_v49 = vshll.u32 %v5405_v57, %v1523_v3 }
  0xf2   : > { %v1533_v53 = vshrl.u32 %v5402_v48, %v1524_v21  ;;  %v1536_v43 = vshrl.u32 %v5406_v62, %v1524_v21  ;;  %vm1292_vm9 = vweird.f32 %v5728_v16  ;;  %vm1295_vm10 = vcmp.eq.s32.totalorder %v6211_v1, 0 }
  0xf3   : > { %vm1298_vm11 = vcmp.eq.s32.totalorder %v6211_v1, 2  ;;  %v6232_v59 = vsub.s32 %v1775_v20, %v1778_v14  ;;  %v1516_v23 = vand.u32 8388607, %v1509_v46  ;;  %vm2960_vm12 = vcmp.lt.s32.totalorder %v6213_v31, 2 }
  0xf4   : > { %vm2961_vm13 = vcmp.eq.s32.totalorder %v6213_v31, 0  ;;  %v6238_v55 = vmul.f32 -2.0, %v934_v37  ;;  %v1537_v34 = vor.u32 %v1536_v43, %v1535_v13  ;;  %v710_v9 = vadd.f32 %v709_v5, %v708_v2 }
  0xf5   : > { %v1781_v60 = vsub.s32 0, %v6232_v59  ;;  %v1528_v19 = vor.u32 %v1527_v32, %v1526_v15  ;;  %v1538_v39 = vshll.u32 %v5406_v62, %v1523_v3  ;;  %v1531_v10 = vor.u32 %v1530_v41, %v1529_v42 }
  0xf6   : > { %v1534_v24 = vor.u32 %v1533_v53, %v1532_v49  ;;  %v1539_v56 = vshrl.u32 %v5407_v6, %v1524_v21  ;;  %vm1544_vm14 = vcmp.lt.s32.totalorder %v6217_v33, 4  ;;  %v1517_v29 = vor.u32 8388608, %v1516_v23  ;;  %v640_v49 = vld [vmem:[%s5588_s8 + $0xb8] sm:$0xff] }
  0xf7   : > { %v4774_v61 = vmin.u32 %v1781_v60, %v6232_v59  ;;  %vm1541_vm15 = vcmp.lt.s32.totalorder %v6217_v33, 1  ;;  %vm1543_vm0 = vcmp.lt.s32.totalorder %v6217_v33, 3  ;;  %vm2964_vm1 = vcmp.eq.s32.totalorder %v6213_v31, 2  ;;  %v624_v23 = vld [vmem:[%s5588_s8 + $0x38] sm:$0xff] }
  0xf8   : > { %v5140_v35 = vpop.eup %5139  ;;  %5143 = vrsqrt.f32 %v6238_v55  ;;  %v1771_v8 = vadd.s32 %v6161_v47, %v6170_v12  ;;  %v1550_v36 = vsel %vm1544_vm14, %v1537_v34, 920167782  ;;  %v877_v26 = vmul.f32 5.9604645e-08, %v710_v9 }
  0xf9   : > { %v5142_v20 = vpop.eup %5141  ;;  %v1299_v50 = vxor.u32 2147483648, %v5140_v35  ;;  %v1783_v44 = vclz %v4774_v61  ;;  %vm1542_vm2 = vcmp.lt.s32.totalorder %v6217_v33, 2  ;;  %v1540_v63 = vor.u32 %v1539_v56, %v1538_v39 }
  0xfa   : > { %v1296_v0 = vxor.u32 2147483648, %v5142_v20  ;;  %v1549_v45 = vsel %vm1541_vm15, %v1528_v19, %v1531_v10  ;;  %v1551_v3 = vsel %vm1543_vm0, %v1534_v24, %v1550_v36  ;;  %v1557_v2 = vshll.u32 %v1517_v29, 8 }
  0xfb   : > { %v1300_v47 = vsel %vm1298_vm11, %v1299_v50, %v5142_v20  ;;  %v2966_v12 = vsel %vm2964_vm1, %v1299_v50, %v5142_v20  ;;  %v4775_v37 = vadd.s32 4294967294, %v1783_v44  ;;  %v1525_v14 = vshrl.u32 %v5403_v52, %v1524_v21 }
  0xfc   : > { %v1297_v5 = vsel %vm1295_vm10, %v5140_v35, %v1296_v0  ;;  %v2963_v13 = vsel %vm2961_vm13, %v5140_v35, %v1296_v0  ;;  %v1546_v15 = vsel %vm1544_vm14, %v1534_v24, 2102212464  ;;  %v1552_v41 = vsel %vm1542_vm2, %v1549_v45, %v1551_v3 }
  0xfd   : > { %v1301_v32 = vsel %vm1294_vm8, %v1297_v5, %v1300_v47  ;;  %v2967_v42 = vsel %vm2960_vm12, %v2963_v13, %v2966_v12  ;;  %vm4776_vm3 = vcmp.lt.s32.totalorder %v4775_v37, 0  ;;  %v1554_v1 = vsel %vm1544_vm14, %v1540_v63, 1326507024 }
  0xfe   : > { %v1302_v53 = vsel %vm1292_vm9, nan, %v1301_v32  ;;  %v2968_v21 = vsel %vm1292_vm9, nan, %v2967_v42  ;;  %v1786_v43 = vsel %vm4776_vm3, 0, %v4775_v37  ;;  %v1545_v61 = vsel %vm1541_vm15, %v1525_v14, %v1528_v19 }
  0xff   : > { %v6282_v31 = vmul.f32 %v1302_v53, %v6209_v7  ;;  %v6285_v60 = vmul.f32 %v2968_v21, %v6209_v7  ;;  %v1787_v9 = vsub.s32 32, %v1786_v43  ;;  %v1788_v39 = vshll.u32 %v6232_v59, %v1786_v43 }
 0x100   : > { %v1791_v56 = vsub.s32 4294967266, %v1786_v43  ;;  %v1547_v16 = vsel %vm1543_vm0, %v1531_v10, %v1546_v15  ;;  %v1553_v29 = vsel %vm1541_vm15, %v1531_v10, %v1534_v24  ;;  %v656_v7 = vshrl.u32 %v624_v23, 8 }
 0x101   : > { %4443 = vst [vmem:[%s5911_s10 + $0x8] sm:$0xff] %v6282_v31  ;;  %4459 = vst [vmem:[%s5911_s10 + $0x88] sm:$0xff] %v6285_v60  ;;  %v1789_v35 = vshrl.u32 %v1771_v8, %v1787_v9  ;;  %v672_v36 = vshrl.u32 %v640_v49, 8  ;;  %v1555_v59 = vsel %vm1543_vm0, %v1537_v34, %v1554_v1  ;;  %v6307_v10 = vrot.slane %v6190_v30, %v4478_v58 }
 0x102   : > { %v5144_v20 = vpop.eup %5143  ;;  %v1792_v50 = vadd.s32 127, %v1791_v56  ;;  %v6300_v44 = vmul.u32.u64.low %v1557_v2, %v1552_v41  ;;  %v6301_v19 = vmul.u32.u64.high %v1557_v2, %v1552_v41, %v6300_v44  ;;  %v1548_v8 = vsel %vm1542_vm2, %v1545_v61, %v1547_v16  ;;  %v638_v41 = vld [vmem:[%s5588_s8 + $0xa8] sm:$0xff] }
 0x103   : > { %v1790_v24 = vor.u32 %v1789_v35, %v1788_v39  ;;  %v1556_v0 = vsel %vm1542_vm2, %v1553_v29, %v1555_v59  ;;  %v909_v45 = vsub.f32 1.0, %v877_v26  ;;  %v1801_v47 = vsub.s32 4, %v6215_v40  ;;  %v622_v56 = vld [vmem:[%s5588_s8 + $0x28] sm:$0xff] }
 0x104   : > { %v1793_v63 = vshll.u32 %v1792_v50, 23  ;;  %v6313_v3 = vmul.u32.u64.low %v1557_v2, %v1556_v0  ;;  %v6314_v34 = vmul.u32.u64.high %v1557_v2, %v1556_v0, %v6313_v3  ;;  %v723_v12 = vshrl.u32 %v656_v7, 16 }
 0x105   : > { %v819_v37 = vshrl.u32 %v672_v36, 16  ;;  %v820_v25 = vand.u32 65535, %v672_v36  ;;  %v1797_v58 = vcvt.s32.f32 %v1790_v24  ;;  %v1564_v5 = vmul.u32 %v1557_v2, %v1548_v8 }
 0x106   : > { %v1794_v30 = vor.u32 4788187, %v1793_v63  ;;  %v1567_v13 = vadd.s32 1, %v6301_v19  ;;  %vm1717_vm4 = vcmp.lt.s32.totalorder %v5933_v51, 0  ;;  %5145 = vlog2.f32 %v909_v45 }
 0x107   : > { %v821_v14 = vcvt.s32.f32 %v819_v37  ;;  %v823_v15 = vcvt.s32.f32 %v820_v25  ;;  %vm1566_vm5 = vc.u32 %v6314_v34, %v6300_v44  ;;  %v6323_v26 = vmul.f32 %v6307_v10, %v5901_v17 }
 0x108   : > { %v1795_v33 = vand.u32 2147483647, %v1794_v30  ;;  %v1802_v2 = vsel %vm1717_vm4, %v1801_v47, %v6215_v40  ;;  %v1568_v32 = vsel %vm1566_vm5, %v1567_v13, %v6301_v19  ;;  %v724_v21 = vand.u32 65535, %v656_v7 }
 0x109   : > { %v822_v42 = vmul.f32 65536.0, %v821_v14  ;;  %v1569_v53 = vadd.s32 %v1568_v32, %v1564_v5  ;;  %v725_v43 = vcvt.s32.f32 %v723_v12  ;;  %v6332_v1 = vmul.f32 %v6307_v10, %v5903_v18 }
 0x10a   : > { %v1798_v49 = vmul.f32 %v1797_v58, %v1795_v33  ;;  %v6336_v17 = vmul.f32 %v6307_v10, %v5958_v11  ;;  %vm1716_vm6 = vcmp.le.f32.partialorder %v1715_v27, 0.7853982  ;;  %v670_v61 = vshrl.u32 %v638_v41, 8 }
 0x10b   : > { %v824_v40 = vadd.f32 %v823_v15, %v822_v42  ;;  %v1804_v9 = vsel %vm1716_vm6, 0, %v1802_v2  ;;  %v1570_v39 = vadd.s32 536870912, %v1569_v53  ;;  %v1012_v16 = vmul.f32 %v5144_v20, %v6238_v55 }
 0x10c   : > { %v1799_v23 = vxor.u32 2147483648, %v1798_v49  ;;  %vm1013_vm7 = vcmp.eq.f32.partialorder %v6238_v55, inf  ;;  %vm1015_vm8 = vcmp.eq.f32.partialorder %v6238_v55, 0.0  ;;  %v726_v35 = vmul.f32 65536.0, %v725_v43 }
 0x10d   : > { %v896_v18 = vmul.f32 5.9604645e-08, %v824_v40  ;;  %v6346_v29 = vshrl.u32 %v1570_v39, 30  ;;  %v727_v27 = vcvt.s32.f32 %v724_v21  ;;  %v3478_v36 = vadd.s32 3, %v1804_v9 }
 0x10e   : > { %v1800_v11 = vsel %vm1717_vm4, %v1799_v23, %v1798_v49  ;;  %v654_v59 = vshrl.u32 %v622_v56, 8  ;;  %v1016_v20 = vand.u32 2147483648, %v6238_v55  ;;  %v807_v24 = vshrl.u32 %v670_v61, 16 }
 0x10f   : > { %v1803_v7 = vsel %vm1716_vm6, %v5933_v51, %v1800_v11  ;;  %v6349_v50 = vmul.f32 6.2831855, %v896_v18  ;;  %v1572_v19 = vshll.u32 %v6346_v29, 30  ;;  %v1014_v8 = vsel %vm1013_vm7, %v6238_v55, %v1012_v16 }
 0x110   : > { %5147 = vcosq.f32 %v1803_v7  ;;  %v6354_v0 = vand.u32 3, %v1804_v9  ;;  %v5146_v45 = vpop.eup %5145  ;;  %v6359_v3 = vmul.f32 %v6307_v10, %v5960_v28  ;;  %v6363_v47 = vmul.f32 %v6307_v10, %v6136_v22 }
 0x111   : > { %5149 = vsinq.f32 %v1803_v7  ;;  %v1821_v63 = vand.u32 2139095040, %v6349_v50  ;;  %v6365_v12 = vsub.s32 %v1569_v53, %v1572_v19  ;;  %v728_v37 = vadd.f32 %v727_v27, %v726_v35 }
 0x112   : > { %v6369_v25 = vmul.f32 %v6307_v10, %v6139_v4  ;;  %v6371_v30 = vand.u32 3, %v3478_v36  ;;  %v711_v5 = vshrl.u32 %v654_v59, 16  ;;  %v6375_v13 = vsel %vm1015_vm8, %v1016_v20, %v1014_v8 }
 0x113   : > { %v1822_v58 = vshrl.u32 %v1821_v63, 23  ;;  %v1575_v28 = vsub.s32 0, %v6365_v12  ;;  %v808_v14 = vand.u32 65535, %v670_v61  ;;  %v809_v22 = vcvt.s32.f32 %v807_v24 }
 0x114   : > { %vm1809_vm9 = vcmp.lt.s32.totalorder %v6354_v0, 2  ;;  %v930_v15 = vmul.f32 0.6931472, %v5146_v45  ;;  %v1818_v33 = vand.u32 2147483647, %v6349_v50  ;;  %vm1810_vm10 = vcmp.eq.s32.totalorder %v6354_v0, 0 }
 0x115   : > { %v4777_v2 = vadd.s32 4294967169, %v1822_v58  ;;  %vm1813_vm11 = vcmp.eq.s32.totalorder %v6354_v0, 2  ;;  %v4766_v4 = vmin.u32 %v1575_v28, %v6365_v12  ;;  %v6383_v32 = vmul.f32 5.9604645e-08, %v728_v37 }
 0x116   : > { %vm3480_vm12 = vcmp.lt.s32.totalorder %v6371_v30, 2  ;;  %v6386_v42 = vand.u32 65535, %v654_v59  ;;  %v713_v41 = vcvt.s32.f32 %v711_v5  ;;  %vm3481_vm13 = vcmp.eq.s32.totalorder %v6371_v30, 0 }
 0x117   : > { %v1828_v55 = vadd.s32 1, %v4777_v2  ;;  %v1577_v49 = vclz %v4766_v4  ;;  %v810_v53 = vmul.f32 65536.0, %v809_v22  ;;  %v811_v21 = vcvt.s32.f32 %v808_v14 }
 0x118   : > { %v6391_v43 = vmul.f32 %v6307_v10, %v6282_v31  ;;  %vm3484_vm14 = vcmp.eq.s32.totalorder %v6371_v30, 2  ;;  %v6394_v40 = vmul.f32 -2.0, %v930_v15  ;;  %v6398_v23 = vand.u32 8388607, %v1818_v33  ;;  %v5239_v30 = vld [vmem:[%s5553_s28] sm:$0xff] }
 0x119   : > { %v6402_v39 = vmul.f32 %v6307_v10, %v6285_v60  ;;  %vm1807_vm15 = vweird.f32 %v5933_v51  ;;  %v1565_v56 = vadd.s32 %v6300_v44, %v6314_v34  ;;  %v4767_v31 = vadd.s32 4294967294, %v1577_v49 }
 0x11a   : > { %v5148_v9 = vpop.eup %5147  ;;  %v912_v61 = vsub.f32 1.0, %v6383_v32  ;;  %vm1829_vm0 = vcmp.gt.s32.totalorder %v1828_v55, 0  ;;  %v6408_v11 = vmul.f32 65536.0, %v713_v41  ;;  %v715_v35 = vcvt.s32.f32 %v6386_v42 }
 0x11b   : > { %v5150_v16 = vpop.eup %5149  ;;  %v1814_v18 = vxor.u32 2147483648, %v5148_v9  ;;  %vm4768_vm1 = vcmp.lt.s32.totalorder %v4767_v31, 0  ;;  %v1595_v60 = vsub.s32 4, %v6346_v29  ;;  %v6412_v7 = vadd.f32 %v811_v21, %v810_v53  ;;  %v5237_v53 = vld [vmem:[%s5553_s28 + $0x10] sm:$0xff] }
 0x11c   : > { %v1811_v27 = vxor.u32 2147483648, %v5150_v16  ;;  %v6418_v34 = vsel %vm4768_vm1, 0, %v4767_v31  ;;  %v1826_v59 = vor.u32 8388608, %v6398_v23  ;;  %vm1511_vm2 = vcmp.lt.s32.totalorder %v6033_v38, 0 }
 0x11d   : > { %v1815_v36 = vsel %vm1813_vm11, %v1814_v18, %v5150_v16  ;;  %v3486_v44 = vsel %vm3484_vm14, %v1814_v18, %v5150_v16  ;;  %v1581_v63 = vsub.s32 32, %v6418_v34  ;;  %v6428_v45 = vsel %vm1829_vm0, %v1828_v55, 0 }
 0x11e   : > { %v1812_v24 = vsel %vm1810_vm10, %v5148_v9, %v1811_v27  ;;  %v3483_v8 = vsel %vm3481_vm13, %v5148_v9, %v1811_v27  ;;  %v1582_v22 = vshll.u32 %v6365_v12, %v6418_v34  ;;  %v5238_v9 = vld [vmem:[%s5553_s28 + $0x90] sm:$0xff]  ;;  %vm6442_vm3 = vcmp.le.f32.partialorder %v1509_v46, 0.7853982 }
 0x11f   : > { %v1816_v14 = vsel %vm1809_vm9, %v1812_v24, %v1815_v36  ;;  %v3487_v55 = vsel %vm3480_vm12, %v3483_v8, %v3486_v44  ;;  %v6436_v49 = vshrl.u32 %v1565_v56, %v1581_v63  ;;  %v5240_v44 = vld [vmem:[%s5553_s28 + $0x80] sm:$0xff]  ;;  %5151 = vrsqrt.f32 %v6394_v40 }
 0x120   : > { %5153 = vlog2.f32 %v912_v61  ;;  %v716_v12 = vadd.f32 %v715_v35, %v6408_v11  ;;  %vm999_vm8 = vcmp.eq.f32.partialorder %v6394_v40, inf  ;;  %vm1001_vm9 = vcmp.eq.f32.partialorder %v6394_v40, 0.0 }
 0x121   : > { %vm1601_vm11 = vweird.f32 %v6033_v38 }
 0x122   : > { %v878_v36 = vmul.f32 5.9604645e-08, %v716_v12 }
 0x12e   : > { %v4930_v20 = vpop.f32.mrb[0].mxu0  ;;  %v4946_v19 = vpop.f32.mrb[0].mxu1 }
 0x12f   : > { %v555_v37 = vmul.f32 0.01, %v4930_v20  ;;  %v571_v58 = vmul.f32 0.01, %v4946_v19  ;;  %v426_v5 = vpop.f32.mrb[1].mxu0  ;;  %v490_v28 = vpop.f32.mrb[1].mxu1 }
 0x130   : > { %v553_v15 = vmul.f32 0.01, %v426_v5  ;;  %v569_v2 = vmul.f32 0.01, %v490_v28  ;;  %v4931_v4 = vpop.f32.mrb[2].mxu0  ;;  %v4947_v41 = vpop.f32.mrb[2].mxu1 }
 0x131   : > { %v587_v21 = vadd.f32 %v5237_v53, %v555_v37  ;;  %v603_v0 = vadd.f32 %v5238_v9, %v571_v58  ;;  %v556_v31 = vmul.f32 0.01, %v4931_v4  ;;  %v572_v16 = vmul.f32 0.01, %v4947_v41  ;;  %v429_v18 = vpop.f32.mrb[3].mxu0  ;;  %v493_v27 = vpop.f32.mrb[3].mxu1 }
 0x132   : > { %v585_v56 = vadd.f32 %v5239_v30, %v553_v15  ;;  %v601_v20 = vadd.f32 %v5240_v44, %v569_v2  ;;  %v554_v19 = vmul.f32 0.01, %v429_v18  ;;  %v570_v24 = vmul.f32 0.01, %v493_v27  ;;  %v5241_v37 = vld [vmem:[%s5553_s28 + $0x18] sm:$0xff]  ;;  %v5243_v41 = vld [vmem:[%s5553_s28 + $0x8] sm:$0xff] }
 0x133   : > { %v4499_v8 = vadd.f32 %v6323_v26, %v587_v21  ;;  %v4547_v63 = vadd.f32 %v6332_v1, %v603_v0  ;;  %v588_v58 = vadd.f32 %v5241_v37, %v556_v31  ;;  %v5242_v5 = vld [vmem:[%s5553_s28 + $0x98] sm:$0xff]  ;;  %v5244_v15 = vld [vmem:[%s5553_s28 + $0x88] sm:$0xff]  ;;  %v1832_v30 = vand.u32 31, %v6428_v45 }
 0x134   : > { %v604_v28 = vadd.f32 %v5242_v5, %v572_v16  ;;  %v4497_v46 = vadd.f32 %v6336_v17, %v585_v56  ;;  %v4545_v4 = vadd.f32 %v6359_v3, %v601_v20  ;;  %v586_v53 = vadd.f32 %v5243_v41, %v554_v19  ;;  %v5245_v56 = vld [vmem:[%s5553_s28 + $0x30] sm:$0xff] }
 0x135   : > { %v602_v9 = vadd.f32 %v5244_v15, %v570_v24  ;;  %4515 = vst [vmem:[%s6457_s17 + $0x10] sm:$0xff] %v4499_v8  ;;  %4563 = vst [vmem:[%s6457_s17 + $0x90] sm:$0xff] %v4547_v63  ;;  %v4500_v26 = vadd.f32 %v6363_v47, %v588_v58  ;;  %v1817_v17 = vsel %vm1807_vm15, nan, %v1816_v14  ;;  %v3488_v3 = vsel %vm1807_vm15, nan, %v3487_v55  ;;  %v5246_v20 = vld [vmem:[%s5553_s28 + $0xb0] sm:$0xff] }
 0x136   : > { %v4548_v1 = vadd.f32 %v6369_v25, %v604_v28  ;;  %4513 = vst [vmem:[%s6457_s17] sm:$0xff] %v4497_v46  ;;  %4561 = vst [vmem:[%s6457_s17 + $0x80] sm:$0xff] %v4545_v4  ;;  %v4498_v2 = vadd.f32 %v6391_v43, %v586_v53  ;;  %v4934_v0 = vpop.f32.mrb[4].mxu0  ;;  %v2751_v47 = vmul.f32 %v1817_v17, %v6375_v13  ;;  %v4950_v25 = vpop.f32.mrb[4].mxu1  ;;  %v1585_v16 = vsub.s32 4294967266, %v6418_v34 }
 0x137   : > { %v4546_v21 = vadd.f32 %v6402_v39, %v602_v9  ;;  %v4431_v31 = vmul.f32 %v3488_v3, %v6375_v13  ;;  %4516 = vst [vmem:[%s6457_s17 + $0x18] sm:$0xff] %v4500_v26  ;;  %v559_v51 = vmul.f32 0.01, %v4934_v0  ;;  %v575_v14 = vmul.f32 0.01, %v4950_v25  ;;  %v6475_v55 = vpop.f32.mrb[5].mxu0 }
 0x138   : > { %4564 = vst [vmem:[%s6457_s17 + $0x98] sm:$0xff] %v4548_v1  ;;  %v1596_v43 = vsel %vm1511_vm2, %v1595_v60, %v6346_v29  ;;  %4514 = vst [vmem:[%s6457_s17 + $0x8] sm:$0xff] %v4498_v2  ;;  %v4487_v13 = vmul.f32 %v6307_v10, %v2751_v47  ;;  %v6490_v18 = vpop.f32.mrb[5].mxu1  ;;  %v6492_v27 = vpop.f32.mrb[6].mxu0  ;;  %v1584_v60 = vor.u32 %v6436_v49, %v1582_v22  ;;  %v1586_v19 = vadd.s32 127, %v1585_v16 }
 0x139   : > { %4562 = vst [vmem:[%s6457_s17 + $0x88] sm:$0xff] %v4546_v21  ;;  %4448 = vst [vmem:[%s5911_s10 + $0x30] sm:$0xff] %v2751_v47  ;;  %v4535_v39 = vmul.f32 %v6307_v10, %v4431_v31  ;;  %v591_v44 = vadd.f32 %v5245_v56, %v559_v51  ;;  %v607_v29 = vadd.f32 %v5246_v20, %v575_v14  ;;  %v6501_v24 = vpop.f32.mrb[6].mxu1  ;;  %v6503_v8 = vpop.f32.mrb[7].mxu0  ;;  %v6507_v63 = vsel %vm6442_vm3, 0, %v1596_v43 }
 0x13a   : > { %4464 = vst [vmem:[%s5911_s10 + $0xb0] sm:$0xff] %v4431_v31  ;;  %v894_v34 = vmul.f32 5.9604645e-08, %v6412_v7  ;;  %v6515_v22 = vpop.f32.mrb[7].mxu1  ;;  %v1587_v58 = vshll.u32 %v1586_v19, 23  ;;  %v6519_v5 = vshll.u32 %v1826_v59, 8  ;;  %v1831_v28 = vshrl.u32 %v6428_v45, 5  ;;  %v5152_v47 = vpop.eup %5151 }
 0x13b   : > { %v4503_v49 = vadd.f32 %v4487_v13, %v591_v44  ;;  %v4551_v37 = vadd.f32 %v4535_v39, %v607_v29  ;;  %v1833_v46 = vsub.s32 32, %v1832_v30  ;;  %v1835_v32 = vshll.u32 %v5403_v52, %v1832_v30  ;;  %v5154_v13 = vpop.eup %5153 }
 0x13c   : > { %v1838_v61 = vshll.u32 %v5404_v54, %v1832_v30  ;;  %v1588_v42 = vor.u32 4788187, %v1587_v58  ;;  %v1591_v11 = vcvt.s32.f32 %v1584_v60  ;;  %v1841_v35 = vshll.u32 %v5405_v57, %v1832_v30 }
 0x13d   : > { %4519 = vst [vmem:[%s6457_s17 + $0x30] sm:$0xff] %v4503_v49  ;;  %4567 = vst [vmem:[%s6457_s17 + $0xb0] sm:$0xff] %v4551_v37  ;;  %v1844_v7 = vshll.u32 %v5402_v48, %v1832_v30  ;;  %v1834_v4 = vshrl.u32 %v5403_v52, %v1833_v46  ;;  %v1836_v23 = vshrl.u32 %v5404_v54, %v1833_v46  ;;  %vm1850_vm4 = vcmp.lt.s32.totalorder %v1831_v28, 1 }
 0x13e   : > { %v1839_v59 = vshrl.u32 %v5405_v57, %v1833_v46  ;;  %v1842_v45 = vshrl.u32 %v5402_v48, %v1833_v46  ;;  %v6532_v41 = vpop.f32.mrb[8].mxu0  ;;  %v1589_v53 = vand.u32 2147483647, %v1588_v42  ;;  %v1845_v15 = vshrl.u32 %v5406_v62, %v1833_v46 }
 0x13f   : > { %v1847_v9 = vshll.u32 %v5406_v62, %v1832_v30  ;;  %v1848_v26 = vshrl.u32 %v5407_v6, %v1833_v46  ;;  %v1837_v1 = vor.u32 %v1836_v23, %v1835_v32  ;;  %vm1851_vm5 = vcmp.lt.s32.totalorder %v1831_v28, 2  ;;  %v6568_v23 = vpop.f32.mrb[9].mxu0 }
 0x140   : > { %v1840_v17 = vor.u32 %v1839_v59, %v1838_v61  ;;  %v1843_v3 = vor.u32 %v1842_v45, %v1841_v35  ;;  %v1592_v2 = vmul.f32 %v1591_v11, %v1589_v53  ;;  %v1846_v21 = vor.u32 %v1845_v15, %v1844_v7  ;;  %v6564_v35 = vpop.f32.mrb[8].mxu1  ;;  %v6575_v45 = vld [vmem:[%s5588_s8 + $0x50] sm:$0xff] }
 0x141   : > { %v1849_v0 = vor.u32 %v1848_v26, %v1847_v9  ;;  %vm1852_vm6 = vcmp.lt.s32.totalorder %v1831_v28, 3  ;;  %vm1853_vm7 = vcmp.lt.s32.totalorder %v1831_v28, 4  ;;  %v1854_v25 = vsel %vm1850_vm4, %v1834_v4, %v1837_v1  ;;  %v643_v9 = vld [vmem:[%s5588_s8 + $0xd0] sm:$0xff] }
 0x142   : > { %v1858_v31 = vsel %vm1850_vm4, %v1837_v1, %v1840_v17  ;;  %v1593_v51 = vxor.u32 2147483648, %v1592_v2  ;;  %v1855_v14 = vsel %vm1853_vm7, %v1843_v3, 2102212464  ;;  %v1859_v16 = vsel %vm1853_vm7, %v1846_v21, 920167782 }
 0x143   : > { %v1862_v43 = vsel %vm1850_vm4, %v1840_v17, %v1843_v3  ;;  %v1856_v39 = vsel %vm1852_vm6, %v1840_v17, %v1855_v14  ;;  %v1860_v30 = vsel %vm1852_vm6, %v1843_v3, %v1859_v16  ;;  %v1863_v56 = vsel %vm1853_vm7, %v1849_v0, 1326507024 }
 0x144   : > { %v6539_v44 = vmul.f32 6.2831855, %v894_v34  ;;  %v1594_v20 = vsel %vm1511_vm2, %v1593_v51, %v1592_v2  ;;  %v1857_v29 = vsel %vm1851_vm5, %v1854_v25, %v1856_v39  ;;  %v1861_v60 = vsel %vm1851_vm5, %v1858_v31, %v1860_v30 }
 0x145   : > { %v1864_v19 = vsel %vm1852_vm6, %v1846_v21, %v1863_v56  ;;  %v1597_v49 = vsel %vm6442_vm3, %v6033_v38, %v1594_v20  ;;  %v6551_v58 = vmul.u32.u64.low %v6519_v5, %v1861_v60  ;;  %v6552_v46 = vmul.u32.u64.high %v6519_v5, %v1861_v60, %v6551_v58 }
 0x146   : > { %v1865_v37 = vsel %vm1851_vm5, %v1862_v43, %v1864_v19  ;;  %v998_v34 = vmul.f32 %v5152_v47, %v6394_v40  ;;  %5155 = vcosq.f32 %v1597_v49  ;;  %v3270_v28 = vadd.s32 3, %v6507_v63 }
 0x147   : > { %v6557_v32 = vmul.u32.u64.low %v6519_v5, %v1865_v37  ;;  %v6558_v61 = vmul.u32.u64.high %v6519_v5, %v1865_v37, %v6557_v32  ;;  %5157 = vsinq.f32 %v1597_v49  ;;  %v1873_v42 = vmul.u32 %v6519_v5, %v1857_v29 }
 0x148   : > { %v1615_v11 = vand.u32 2139095040, %v6539_v44  ;;  %v1002_v7 = vand.u32 2147483648, %v6394_v40  ;;  %v1876_v4 = vadd.s32 1, %v6552_v46  ;;  %v1000_v59 = vsel %vm999_vm8, %v6394_v40, %v998_v34  ;;  %v5247_v34 = vld [vmem:[%s5553_s28 + $0x20] sm:$0xff] }
 0x149   : > { %vm1875_vm10 = vc.u32 %v6558_v61, %v6551_v58  ;;  %v1602_v5 = vand.u32 3, %v6507_v63  ;;  %v910_v15 = vsub.f32 1.0, %v878_v36  ;;  %v3271_v26 = vand.u32 3, %v3270_v28 }
 0x14a   : > { %v1616_v12 = vshrl.u32 %v1615_v11, 23  ;;  %v1877_v53 = vsel %vm1875_vm10, %v1876_v4, %v6552_v46  ;;  %v1003_v3 = vsel %vm1001_vm9, %v1002_v7, %v1000_v59  ;;  %v1612_v40 = vand.u32 2147483647, %v6539_v44 }
 0x14b   : > { %v1878_v1 = vadd.s32 %v1877_v53, %v1873_v42  ;;  %v659_v2 = vshrl.u32 %v6575_v45, 8  ;;  %v936_v21 = vmul.f32 0.6931472, %v5154_v13  ;;  %v675_v25 = vshrl.u32 %v643_v9, 8 }
 0x14c   : > { %v4769_v17 = vadd.s32 4294967169, %v1616_v12  ;;  %vm1603_vm12 = vcmp.lt.s32.totalorder %v1602_v5, 2  ;;  %vm1604_vm13 = vcmp.eq.s32.totalorder %v1602_v5, 0  ;;  %vm1607_vm14 = vcmp.eq.s32.totalorder %v1602_v5, 2  ;;  %v5248_v12 = vld [vmem:[%s5553_s28 + $0xa0] sm:$0xff] }
 0x14d   : > { %v1879_v0 = vadd.s32 536870912, %v1878_v1  ;;  %5159 = vlog2.f32 %v910_v15  ;;  %vm3273_vm15 = vcmp.eq.s32.totalorder %v3271_v26, 0  ;;  %vm3276_vm0 = vcmp.eq.s32.totalorder %v3271_v26, 2 }
 0x14e   : > { %v1622_v47 = vadd.s32 1, %v4769_v17  ;;  %v557_v14 = vmul.f32 0.01, %v6475_v55  ;;  %v1619_v43 = vand.u32 8388607, %v1612_v40  ;;  %vm3272_vm2 = vcmp.lt.s32.totalorder %v3271_v26, 2 }
 0x14f   : > { %v6583_v31 = vshrl.u32 %v1879_v0, 30  ;;  %v6588_v30 = vmul.f32 -2.0, %v936_v21  ;;  %v573_v29 = vmul.f32 0.01, %v6490_v18  ;;  %v837_v19 = vshrl.u32 %v675_v25, 16 }
 0x150   : > { %v5156_v63 = vpop.eup %5155  ;;  %vm1623_vm1 = vcmp.gt.s32.totalorder %v1622_v47, 0  ;;  %v589_v32 = vadd.f32 %v5247_v34, %v557_v14  ;;  %v1620_v42 = vor.u32 8388608, %v1619_v43  ;;  %v6604_v4 = vand.u32 65535, %v675_v25 }
 0x151   : > { %v5158_v51 = vpop.eup %5157  ;;  %v1608_v16 = vxor.u32 2147483648, %v5156_v63  ;;  %v1624_v13 = vsel %vm1623_vm1, %v1622_v47, 0  ;;  %v1881_v56 = vshll.u32 %v6583_v31, 30  ;;  %v605_v45 = vadd.f32 %v5248_v12, %v573_v29 }
 0x152   : > { %v1605_v39 = vxor.u32 2147483648, %v5158_v51  ;;  %v1626_v46 = vand.u32 31, %v1624_v13  ;;  %v839_v5 = vcvt.s32.f32 %v837_v19  ;;  %5161 = vrsqrt.f32 %v6588_v30 }
 0x153   : > { %v1609_v20 = vsel %vm1607_vm14, %v1608_v16, %v5158_v51  ;;  %v3278_v60 = vsel %vm3276_vm0, %v1608_v16, %v5158_v51  ;;  %v6595_v37 = vsub.s32 %v1878_v1, %v1881_v56  ;;  %v6609_v26 = vshrl.u32 %v659_v2, 16 }
 0x154   : > { %v1606_v55 = vsel %vm1604_vm13, %v5156_v63, %v1605_v39  ;;  %v3275_v49 = vsel %vm3273_vm15, %v5156_v63, %v1605_v39  ;;  %v1627_v9 = vsub.s32 32, %v1626_v46  ;;  %v6619_v21 = vshll.u32 %v1620_v42, 8 }
 0x155   : > { %v1610_v36 = vsel %vm1603_vm12, %v1606_v55, %v1609_v20  ;;  %v3279_v28 = vsel %vm3272_vm2, %v3275_v49, %v3278_v60  ;;  %v1884_v7 = vsub.s32 0, %v6595_v37  ;;  %v1629_v47 = vshll.u32 %v5403_v52, %v1626_v46 }
 0x156   : > { %v1611_v18 = vsel %vm1601_vm11, nan, %v1610_v36  ;;  %v3280_v11 = vsel %vm1601_vm11, nan, %v3279_v28  ;;  %v6622_v25 = vand.u32 65535, %v659_v2  ;;  %v841_v63 = vcvt.s32.f32 %v6604_v4 }
 0x157   : > { %v2749_v59 = vmul.f32 %v1611_v18, %v1003_v3  ;;  %v4429_v53 = vmul.f32 %v3280_v11, %v1003_v3  ;;  %v4778_v15 = vmin.u32 %v1884_v7, %v6595_v37  ;;  %v6611_v1 = vpop.eup %5159  ;;  %v1874_v3 = vadd.s32 %v6551_v58, %v6558_v61 }
 0x158   : > { %v1625_v16 = vshrl.u32 %v1624_v13, 5  ;;  %v840_v43 = vmul.f32 65536.0, %v839_v5  ;;  %v1628_v56 = vshrl.u32 %v5403_v52, %v1627_v9  ;;  %v1630_v20 = vshrl.u32 %v5404_v54, %v1627_v9 }
 0x159   : > { %4446 = vst [vmem:[%s5911_s10 + $0x20] sm:$0xff] %v2749_v59  ;;  %v4485_v38 = vmul.f32 %v6307_v10, %v2749_v59  ;;  %4462 = vst [vmem:[%s5911_s10 + $0xa0] sm:$0xff] %v4429_v53  ;;  %v4533_v17 = vmul.f32 %v6307_v10, %v4429_v53  ;;  %v1886_v0 = vclz %v4778_v15  ;;  %v1632_v58 = vshll.u32 %v5404_v54, %v1626_v46 }
 0x15a   : > { %v1633_v61 = vshrl.u32 %v5405_v57, %v1627_v9  ;;  %v1635_v2 = vshll.u32 %v5405_v57, %v1626_v46  ;;  %v1636_v29 = vshrl.u32 %v5402_v48, %v1627_v9  ;;  %v1638_v60 = vshll.u32 %v5402_v48, %v1626_v46 }
 0x15b   : > { %v4501_v51 = vadd.f32 %v4485_v38, %v589_v32  ;;  %v4549_v14 = vadd.f32 %v4533_v17, %v605_v45  ;;  %v4779_v39 = vadd.s32 4294967294, %v1886_v0  ;;  %v1631_v13 = vor.u32 %v1630_v20, %v1629_v47 }
 0x15c   : > { %v1639_v19 = vshrl.u32 %v5406_v62, %v1627_v9  ;;  %v1641_v55 = vshll.u32 %v5406_v62, %v1626_v46  ;;  %v1634_v34 = vor.u32 %v1633_v61, %v1632_v58  ;;  %v1637_v32 = vor.u32 %v1636_v29, %v1635_v2  ;;  %v5162_v4 = vpop.eup %5161 }
 0x15d   : > { %4517 = vst [vmem:[%s6457_s17 + $0x20] sm:$0xff] %v4501_v51  ;;  %4565 = vst [vmem:[%s6457_s17 + $0xa0] sm:$0xff] %v4549_v14  ;;  %vm4780_vm3 = vcmp.lt.s32.totalorder %v4779_v39, 0  ;;  %v1642_v36 = vshrl.u32 %v5407_v6, %v1627_v9  ;;  %vm1644_vm4 = vcmp.lt.s32.totalorder %v1625_v16, 1  ;;  %vm1645_vm5 = vcmp.lt.s32.totalorder %v1625_v16, 2 }
 0x15e   : > { %v1889_v49 = vsel %vm4780_vm3, 0, %v4779_v39  ;;  %v1640_v11 = vor.u32 %v1639_v19, %v1638_v60  ;;  %vm1646_vm6 = vcmp.lt.s32.totalorder %v1625_v16, 3  ;;  %vm1647_vm7 = vcmp.lt.s32.totalorder %v1625_v16, 4 }
 0x15f   : > { %v1890_v28 = vsub.s32 32, %v1889_v49  ;;  %v1891_v42 = vshll.u32 %v6595_v37, %v1889_v49  ;;  %v1894_v18 = vsub.s32 4294967266, %v1889_v49  ;;  %v1643_v7 = vor.u32 %v1642_v36, %v1641_v55 }
 0x160   : > { %v1648_v45 = vsel %vm1644_vm4, %v1628_v56, %v1631_v13  ;;  %v1649_v46 = vsel %vm1647_vm7, %v1637_v32, 2102212464  ;;  %v1652_v53 = vsel %vm1644_vm4, %v1631_v13, %v1634_v34  ;;  %v1653_v5 = vsel %vm1647_vm7, %v1640_v11, 920167782 }
 0x161   : > { %v1892_v59 = vshrl.u32 %v1874_v3, %v1890_v28  ;;  %v1895_v12 = vadd.s32 127, %v1894_v18  ;;  %v1656_v15 = vsel %vm1644_vm4, %v1634_v34, %v1637_v32  ;;  %v1650_v17 = vsel %vm1646_vm6, %v1634_v34, %v1649_v46  ;;  %v6681_v46 = vpop.f32.mrb[10].mxu0 }
 0x162   : > { %v1654_v37 = vsel %vm1646_vm6, %v1637_v32, %v1653_v5  ;;  %v1657_v47 = vsel %vm1647_vm7, %v1643_v7, 1326507024  ;;  %v743_v51 = vcvt.s32.f32 %v6609_v26  ;;  %v842_v14 = vadd.f32 %v841_v63, %v840_v43 }
 0x163   : > { %v1893_v38 = vor.u32 %v1892_v59, %v1891_v42  ;;  %v1896_v9 = vshll.u32 %v1895_v12, 23  ;;  %v1655_v0 = vsel %vm1645_vm5, %v1652_v53, %v1654_v37  ;;  %v1904_v56 = vsub.s32 4, %v6583_v31 }
 0x164   : > { %v1658_v20 = vsel %vm1646_vm6, %v1640_v11, %v1657_v47  ;;  %v1651_v58 = vsel %vm1645_vm5, %v1648_v45, %v1650_v17  ;;  %v6647_v2 = vmul.u32.u64.low %v6619_v21, %v1655_v0  ;;  %v6648_v29 = vmul.u32.u64.high %v6619_v21, %v1655_v0, %v6647_v2 }
 0x165   : > { %v1897_v3 = vor.u32 4788187, %v1896_v9  ;;  %v1900_v39 = vcvt.s32.f32 %v1893_v38  ;;  %v1659_v61 = vsel %vm1645_vm5, %v1656_v15, %v1658_v20  ;;  %v899_v63 = vmul.f32 5.9604645e-08, %v842_v14 }
 0x166   : > { %v6652_v13 = vmul.u32.u64.low %v6619_v21, %v1659_v61  ;;  %v6653_v26 = vmul.u32.u64.high %v6619_v21, %v1659_v61, %v6652_v13  ;;  %vm1820_vm8 = vcmp.lt.s32.totalorder %v6349_v50, 0  ;;  %v744_v43 = vmul.f32 65536.0, %v743_v51 }
 0x167   : > { %v1898_v60 = vand.u32 2147483647, %v1897_v3  ;;  %v1667_v55 = vmul.u32 %v6619_v21, %v1651_v58  ;;  %v745_v16 = vcvt.s32.f32 %v6622_v25  ;;  %v6658_v49 = vmul.f32 6.2831855, %v899_v63 }
 0x168   : > { %v1905_v34 = vsel %vm1820_vm8, %v1904_v56, %v6583_v31  ;;  %v1670_v32 = vadd.s32 1, %v6648_v29  ;;  %vm1020_vm9 = vcmp.eq.f32.partialorder %v6588_v30, inf  ;;  %vm1819_vm10 = vcmp.le.f32.partialorder %v1818_v33, 0.7853982  ;;  %v641_v31 = vld [vmem:[%s5588_s8 + $0xc0] sm:$0xff]  ;;  %v6676_v33 = vpop.f32.mrb[9].mxu1 }
 0x169   : > { %v1901_v19 = vmul.f32 %v1900_v39, %v1898_v60  ;;  %vm1669_vm11 = vc.u32 %v6653_v26, %v6647_v2  ;;  %v560_v21 = vmul.f32 0.01, %v6492_v27  ;;  %v1019_v25 = vmul.f32 %v5162_v4, %v6588_v30  ;;  %v5249_v39 = vld [vmem:[%s5553_s28 + $0x38] sm:$0xff] }
 0x16a   : > { %v1671_v28 = vsel %vm1669_vm11, %v1670_v32, %v6648_v29  ;;  %v2130_v42 = vand.u32 2139095040, %v6658_v49  ;;  %v1907_v11 = vsel %vm1819_vm10, 0, %v1905_v34  ;;  %v746_v59 = vadd.f32 %v745_v16, %v744_v43 }
 0x16b   : > { %v1902_v36 = vxor.u32 2147483648, %v1901_v19  ;;  %v1672_v7 = vadd.s32 %v1671_v28, %v1667_v55  ;;  %v932_v45 = vmul.f32 0.6931472, %v6611_v1  ;;  %v2127_v27 = vand.u32 2147483647, %v6658_v49 }
 0x16c   : > { %v2131_v4 = vshrl.u32 %v2130_v42, 23  ;;  %v1023_v53 = vand.u32 2147483648, %v6588_v30  ;;  %v673_v15 = vshrl.u32 %v641_v31, 8  ;;  %v576_v38 = vmul.f32 0.01, %v6501_v24  ;;  %v625_v24 = vld [vmem:[%s5588_s8 + $0x40] sm:$0xff] }
 0x16d   : > { %v1903_v18 = vsel %vm1820_vm8, %v1902_v36, %v1901_v19  ;;  %v1673_v5 = vadd.s32 536870912, %v1672_v7  ;;  %v3582_v9 = vadd.s32 3, %v1907_v11  ;;  %v1021_v1 = vsel %vm1020_vm9, %v6588_v30, %v1019_v25 }
 0x16e   : > { %v1906_v12 = vsel %vm1819_vm10, %v6349_v50, %v1903_v18  ;;  %v4789_v17 = vadd.s32 4294967169, %v2131_v4  ;;  %vm1022_vm12 = vcmp.eq.f32.partialorder %v6588_v30, 0.0  ;;  %v883_v0 = vmul.f32 5.9604645e-08, %v746_v59  ;;  %v5250_v30 = vld [vmem:[%s5553_s28 + $0xb8] sm:$0xff] }
 0x16f   : > { %5163 = vcosq.f32 %v1906_v12  ;;  %v6689_v37 = vshrl.u32 %v1673_v5, 30  ;;  %v1911_v47 = vand.u32 3, %v1907_v11  ;;  %v6691_v51 = vmul.f32 -2.0, %v932_v45 }
 0x170   : > { %5165 = vsinq.f32 %v1906_v12  ;;  %v2134_v14 = vand.u32 8388607, %v2127_v27  ;;  %v2137_v3 = vadd.s32 1, %v4789_v17  ;;  %v6697_v56 = vadd.f32 %v5249_v39, %v560_v21 }
 0x171   : > { %v1675_v20 = vshll.u32 %v6689_v37, 30  ;;  %v825_v58 = vshrl.u32 %v673_v15, 16  ;;  %v1024_v61 = vsel %vm1022_vm12, %v1023_v53, %v1021_v1  ;;  %vm1910_vm13 = vweird.f32 %v6349_v50 }
 0x172   : > { %v6702_v29 = vadd.f32 %v5250_v30, %v576_v38  ;;  %v3583_v60 = vand.u32 3, %v3582_v9  ;;  %vm2138_vm14 = vcmp.gt.s32.totalorder %v2137_v3, 0  ;;  %v915_v63 = vsub.f32 1.0, %v883_v0 }
 0x173   : > { %v6704_v13 = vsub.s32 %v1672_v7, %v1675_v20  ;;  %v2139_v43 = vsel %vm2138_vm14, %v2137_v3, 0  ;;  %v657_v19 = vshrl.u32 %v625_v24, 8  ;;  %vm1912_vm15 = vcmp.lt.s32.totalorder %v1911_v47, 2 }
 0x174   : > { %5167 = vrsqrt.f32 %v6691_v51  ;;  %v2135_v55 = vor.u32 8388608, %v2134_v14  ;;  %v2141_v16 = vand.u32 31, %v2139_v43  ;;  %vm1913_vm0 = vcmp.eq.s32.totalorder %v1911_v47, 0 }
 0x175   : > { %v1678_v34 = vsub.s32 0, %v6704_v13  ;;  %v6708_v32 = vand.u32 65535, %v673_v15  ;;  %v827_v36 = vcvt.s32.f32 %v825_v58  ;;  %vm1916_vm1 = vcmp.eq.s32.totalorder %v1911_v47, 2 }
 0x176   : > { %vm3584_vm2 = vcmp.lt.s32.totalorder %v3583_v60, 2  ;;  %vm3585_vm3 = vcmp.eq.s32.totalorder %v3583_v60, 0  ;;  %vm3588_vm4 = vcmp.eq.s32.totalorder %v3583_v60, 2  ;;  %v1668_v25 = vadd.s32 %v6647_v2, %v6653_v26 }
 0x177   : > { %v4770_v28 = vmin.u32 %v1678_v34, %v6704_v13  ;;  %5169 = vlog2.f32 %v915_v63  ;;  %v6713_v42 = vshrl.u32 %v657_v19, 16  ;;  %v2142_v11 = vsub.s32 32, %v2141_v16 }
 0x178   : > { %v6715_v7 = vshll.u32 %v2135_v55, 8  ;;  %v6717_v59 = vand.u32 65535, %v657_v19  ;;  %v828_v4 = vmul.f32 65536.0, %v827_v36  ;;  %v829_v53 = vcvt.s32.f32 %v6708_v32 }
 0x179   : > { %v5164_v21 = vpop.eup %5163  ;;  %v1680_v45 = vclz %v4770_v28  ;;  %v6722_v26 = vshrl.u32 %v2139_v43, 5  ;;  %v2144_v15 = vshll.u32 %v5403_v52, %v2141_v16  ;;  %v2147_v1 = vshll.u32 %v5404_v54, %v2141_v16 }
 0x17a   : > { %v5166_v31 = vpop.eup %5165  ;;  %v1917_v18 = vxor.u32 2147483648, %v5164_v21  ;;  %v2145_v3 = vshrl.u32 %v5404_v54, %v2142_v11  ;;  %v2150_v24 = vshll.u32 %v5405_v57, %v2141_v16  ;;  %v2143_v58 = vshrl.u32 %v5403_v52, %v2142_v11 }
 0x17b   : > { %v1914_v12 = vxor.u32 2147483648, %v5166_v31  ;;  %v4771_v17 = vadd.s32 4294967294, %v1680_v45  ;;  %v2148_v43 = vshrl.u32 %v5405_v57, %v2142_v11  ;;  %vm1614_vm6 = vcmp.lt.s32.totalorder %v6539_v44, 0 }
 0x17c   : > { %v1918_v5 = vsel %vm1916_vm1, %v1917_v18, %v5166_v31  ;;  %v3590_v2 = vsel %vm3588_vm4, %v1917_v18, %v5166_v31  ;;  %v2146_v32 = vor.u32 %v2145_v3, %v2144_v15  ;;  %v2154_v18 = vshrl.u32 %v5406_v62, %v2142_v11 }
 0x17d   : > { %v1915_v38 = vsel %vm1913_vm0, %v5164_v21, %v1914_v12  ;;  %v3587_v9 = vsel %vm3585_vm3, %v5164_v21, %v1914_v12  ;;  %vm4772_vm5 = vcmp.lt.s32.totalorder %v4771_v17, 0  ;;  %v2151_v21 = vshrl.u32 %v5402_v48, %v2142_v11 }
 0x17e   : > { %v1919_v0 = vsel %vm1912_vm15, %v1915_v38, %v1918_v5  ;;  %v3591_v14 = vsel %vm3584_vm2, %v3587_v9, %v3590_v2  ;;  %v6737_v30 = vpop.eup %5167  ;;  %v1683_v63 = vsel %vm4772_vm5, 0, %v4771_v17  ;;  %v2156_v12 = vshll.u32 %v5406_v62, %v2141_v16 }
 0x17f   : > { %v1920_v39 = vsel %vm1910_vm13, nan, %v1919_v0  ;;  %v3592_v20 = vsel %vm1910_vm13, nan, %v3591_v14  ;;  %v1684_v19 = vsub.s32 32, %v1683_v63  ;;  %v1685_v55 = vshll.u32 %v6704_v13, %v1683_v63 }
 0x180   : > { %v2752_v47 = vmul.f32 %v1920_v39, %v1024_v61  ;;  %v4432_v60 = vmul.f32 %v3592_v20, %v1024_v61  ;;  %v1688_v34 = vsub.s32 4294967266, %v1683_v63  ;;  %v2153_v61 = vshll.u32 %v5402_v48, %v2141_v16 }
 0x181   : > { %v6748_v28 = vpop.eup %5169  ;;  %v1686_v31 = vshrl.u32 %v1668_v25, %v1684_v19  ;;  %v2149_v2 = vor.u32 %v2148_v43, %v2147_v1  ;;  %v2157_v15 = vshrl.u32 %v5407_v6, %v2142_v11  ;;  %vm6757_vm7 = vcmp.le.f32.partialorder %v1612_v40, 0.7853982 }
 0x182   : > { %4449 = vst [vmem:[%s5911_s10 + $0x38] sm:$0xff] %v2752_v47  ;;  %v4488_v36 = vmul.f32 %v6307_v10, %v2752_v47  ;;  %4465 = vst [vmem:[%s5911_s10 + $0xb8] sm:$0xff] %v4432_v60  ;;  %v4536_v50 = vmul.f32 %v6307_v10, %v4432_v60  ;;  %v1689_v13 = vadd.s32 127, %v1688_v34  ;;  %v2152_v17 = vor.u32 %v2151_v21, %v2150_v24 }
 0x183   : > { %v1687_v9 = vor.u32 %v1686_v31, %v1685_v55  ;;  %v2155_v0 = vor.u32 %v2154_v18, %v2153_v61  ;;  %v1698_v16 = vsub.s32 4, %v6689_v37  ;;  %vm2159_vm8 = vcmp.lt.s32.totalorder %v6722_v26, 1 }
 0x184   : > { %v4504_v45 = vadd.f32 %v4488_v36, %v6697_v56  ;;  %v4552_v5 = vadd.f32 %v4536_v50, %v6702_v29  ;;  %v1690_v25 = vshll.u32 %v1689_v13, 23  ;;  %v2158_v56 = vor.u32 %v2157_v15, %v2156_v12 }
 0x185   : > { %v830_v29 = vadd.f32 %v829_v53, %v828_v4  ;;  %v1694_v11 = vcvt.s32.f32 %v1687_v9  ;;  %vm2161_vm9 = vcmp.lt.s32.totalorder %v6722_v26, 3  ;;  %vm2162_vm10 = vcmp.lt.s32.totalorder %v6722_v26, 4 }
 0x186   : > { %4520 = vst [vmem:[%s6457_s17 + $0x38] sm:$0xff] %v4504_v45  ;;  %4568 = vst [vmem:[%s6457_s17 + $0xb8] sm:$0xff] %v4552_v5  ;;  %v1691_v1 = vor.u32 4788187, %v1690_v25  ;;  %vm2160_vm11 = vcmp.lt.s32.totalorder %v6722_v26, 2  ;;  %v2163_v40 = vsel %vm2159_vm8, %v2143_v58, %v2146_v32  ;;  %v2167_v3 = vsel %vm2159_vm8, %v2146_v32, %v2149_v2  ;;  %v6801_v45 = vpop.f32.mrb[10].mxu1 }
 0x187   : > { %v2164_v14 = vsel %vm2162_vm10, %v2152_v17, 2102212464  ;;  %v2168_v20 = vsel %vm2162_vm10, %v2155_v0, 920167782  ;;  %v2171_v47 = vsel %vm2159_vm8, %v2149_v2, %v2152_v17  ;;  %v2172_v53 = vsel %vm2162_vm10, %v2158_v56, 1326507024 }
 0x188   : > { %v1692_v24 = vand.u32 2147483647, %v1691_v1  ;;  %v2165_v39 = vsel %vm2161_vm9, %v2149_v2, %v2164_v14  ;;  %v2169_v4 = vsel %vm2161_vm9, %v2152_v17, %v2168_v20  ;;  %v731_v60 = vcvt.s32.f32 %v6713_v42 }
 0x189   : > { %v897_v63 = vmul.f32 5.9604645e-08, %v830_v29  ;;  %v1699_v58 = vsel %vm1614_vm6, %v1698_v16, %v6689_v37  ;;  %v2170_v19 = vsel %vm2160_vm11, %v2167_v3, %v2169_v4  ;;  %v2173_v55 = vsel %vm2161_vm9, %v2155_v0, %v2172_v53  ;;  %v5251_v29 = vld [vmem:[%s5553_s28 + $0x28] sm:$0xff]  ;;  %v628_v4 = vld [vmem:[%s5588_s8 + $0x58] sm:$0xff] }
 0x18a   : > { %v1695_v43 = vmul.f32 %v1694_v11, %v1692_v24  ;;  %v2166_v34 = vsel %vm2160_vm11, %v2163_v40, %v2165_v39  ;;  %v2174_v32 = vsel %vm2160_vm11, %v2171_v47, %v2173_v55  ;;  %v558_v31 = vmul.f32 0.01, %v6503_v8 }
 0x18b   : > { %v6785_v42 = vmul.u32.u64.low %v6715_v7, %v2170_v19  ;;  %v6786_v36 = vmul.u32.u64.high %v6715_v7, %v2170_v19, %v6785_v42  ;;  %v6790_v37 = vmul.u32.u64.low %v6715_v7, %v2174_v32  ;;  %v6791_v21 = vmul.u32.u64.high %v6715_v7, %v2174_v32, %v6790_v37 }
 0x18c   : > { %v1696_v50 = vxor.u32 2147483648, %v1695_v43  ;;  %v6793_v61 = vmul.f32 6.2831855, %v897_v63  ;;  %v574_v26 = vmul.f32 0.01, %v6515_v22  ;;  %v2182_v18 = vmul.u32 %v6715_v7, %v2166_v34  ;;  %v6811_v22 = vpop.f32.mrb[11].mxu0 }
 0x18d   : > { %v1005_v5 = vmul.f32 %v6737_v30, %v6691_v51  ;;  %v1701_v8 = vsel %vm6757_vm7, 0, %v1699_v58  ;;  %v2185_v15 = vadd.s32 1, %v6786_v36  ;;  %vm2184_vm12 = vc.u32 %v6791_v21, %v6785_v42  ;;  %v644_v30 = vld [vmem:[%s5588_s8 + $0xd8] sm:$0xff] }
 0x18e   : > { %v1697_v13 = vsel %vm1614_vm6, %v1696_v50, %v1695_v43  ;;  %v1924_v12 = vand.u32 2139095040, %v6793_v61  ;;  %v732_v7 = vmul.f32 65536.0, %v731_v60  ;;  %v733_v9 = vcvt.s32.f32 %v6717_v59  ;;  %v5253_v60 = vld [vmem:[%s5553_s28 + $0x50] sm:$0xff] }
 0x18f   : > { %v1700_v2 = vsel %vm6757_vm7, %v6539_v44, %v1697_v13  ;;  %vm1006_vm13 = vcmp.eq.f32.partialorder %v6691_v51, inf  ;;  %v2186_v25 = vsel %vm2184_vm12, %v2185_v15, %v6786_v36  ;;  %v3374_v17 = vadd.s32 3, %v1701_v8 }
 0x190   : > { %5171 = vcosq.f32 %v1700_v2  ;;  %v1925_v38 = vshrl.u32 %v1924_v12, 23  ;;  %v563_v0 = vmul.f32 0.01, %v6532_v41  ;;  %v942_v16 = vmul.f32 0.6931472, %v6748_v28  ;;  %v5252_v28 = vld [vmem:[%s5553_s28 + $0xa8] sm:$0xff] }
 0x191   : > { %5173 = vsinq.f32 %v1700_v2  ;;  %v2187_v56 = vadd.s32 %v2186_v25, %v2182_v18  ;;  %v6822_v1 = vadd.f32 %v5251_v29, %v558_v31  ;;  %v1009_v59 = vand.u32 2147483648, %v6691_v51 }
 0x192   : > { %v4781_v11 = vadd.s32 4294967169, %v1925_v38  ;;  %v676_v40 = vshrl.u32 %v644_v30, 8  ;;  %v1007_v14 = vsel %vm1006_vm13, %v6691_v51, %v1005_v5  ;;  %vm1008_vm14 = vcmp.eq.f32.partialorder %v6691_v51, 0.0 }
 0x193   : > { %v2188_v3 = vadd.s32 536870912, %v2187_v56  ;;  %v734_v24 = vadd.f32 %v733_v9, %v732_v7  ;;  %vm1704_vm15 = vweird.f32 %v6539_v44  ;;  %v1705_v41 = vand.u32 3, %v1701_v8 }
 0x194   : > { %v6829_v39 = vadd.f32 %v5252_v28, %v574_v26  ;;  %v1921_v20 = vand.u32 2147483647, %v6793_v61  ;;  %v1931_v47 = vadd.s32 1, %v4781_v11  ;;  %v3375_v53 = vand.u32 3, %v3374_v17 }
 0x195   : > { %v6834_v63 = vadd.f32 %v5253_v60, %v563_v0  ;;  %v6836_v43 = vmul.f32 -2.0, %v942_v16  ;;  %v6838_v58 = vshrl.u32 %v2188_v3, 30  ;;  %v1010_v51 = vsel %vm1008_vm14, %v1009_v59, %v1007_v14 }
 0x196   : > { %v6841_v19 = vmul.f32 0.01, %v6564_v35  ;;  %vm1932_vm0 = vcmp.gt.s32.totalorder %v1931_v47, 0  ;;  %v843_v55 = vshrl.u32 %v676_v40, 16  ;;  %v881_v32 = vmul.f32 5.9604645e-08, %v734_v24 }
 0x197   : > { %v2190_v34 = vshll.u32 %v6838_v58, 30  ;;  %v1933_v36 = vsel %vm1932_vm0, %v1931_v47, 0  ;;  %v660_v50 = vshrl.u32 %v628_v4, 8  ;;  %vm1706_vm1 = vcmp.lt.s32.totalorder %v1705_v41, 2 }
 0x198   : > { %vm1707_vm2 = vcmp.eq.s32.totalorder %v1705_v41, 0  ;;  %vm1710_vm3 = vcmp.eq.s32.totalorder %v1705_v41, 2  ;;  %v1928_v37 = vand.u32 8388607, %v1921_v20  ;;  %vm3380_vm4 = vcmp.eq.s32.totalorder %v3375_v53, 2 }
 0x199   : > { %5175 = vrsqrt.f32 %v6836_v43  ;;  %v6847_v13 = vsub.s32 %v2187_v56, %v2190_v34  ;;  %v844_v35 = vand.u32 65535, %v676_v40  ;;  %vm3377_vm5 = vcmp.eq.s32.totalorder %v3375_v53, 0 }
 0x19a   : > { %v5172_v31 = vpop.eup %5171  ;;  %v1935_v12 = vand.u32 31, %v1933_v36  ;;  %v845_v5 = vcvt.s32.f32 %v843_v55  ;;  %vm3376_vm6 = vcmp.lt.s32.totalorder %v3375_v53, 2  ;;  %v913_v15 = vsub.f32 1.0, %v881_v32 }
 0x19b   : > { %v5174_v26 = vpop.eup %5173  ;;  %v1711_v18 = vxor.u32 2147483648, %v5172_v31  ;;  %v2193_v8 = vsub.s32 0, %v6847_v13  ;;  %v1929_v30 = vor.u32 8388608, %v1928_v37  ;;  %v6851_v25 = vshrl.u32 %v660_v50, 16 }
 0x19c   : > { %v1708_v2 = vxor.u32 2147483648, %v5174_v26  ;;  %v847_v16 = vcvt.s32.f32 %v844_v35  ;;  %v1936_v59 = vsub.s32 32, %v1935_v12  ;;  %v846_v11 = vmul.f32 65536.0, %v845_v5 }
 0x19d   : > { %v1712_v7 = vsel %vm1710_vm3, %v1711_v18, %v5174_v26  ;;  %v3382_v9 = vsel %vm3380_vm4, %v1711_v18, %v5174_v26  ;;  %v4790_v0 = vmin.u32 %v2193_v8, %v6847_v13  ;;  %5177 = vlog2.f32 %v913_v15 }
 0x19e   : > { %v1709_v38 = vsel %vm1707_vm2, %v5172_v31, %v1708_v2  ;;  %v3379_v17 = vsel %vm3377_vm5, %v5172_v31, %v1708_v2  ;;  %v6860_v47 = vand.u32 65535, %v660_v50  ;;  %v749_v41 = vcvt.s32.f32 %v6851_v25 }
 0x19f   : > { %v1713_v56 = vsel %vm1706_vm1, %v1709_v38, %v1712_v7  ;;  %v3383_v29 = vsel %vm3376_vm6, %v3379_v17, %v3382_v9  ;;  %v2195_v3 = vclz %v4790_v0  ;;  %v2183_v4 = vadd.s32 %v6785_v42, %v6791_v21 }
 0x1a0   : > { %v1714_v40 = vsel %vm1704_vm15, nan, %v1713_v56  ;;  %v3384_v14 = vsel %vm1704_vm15, nan, %v3383_v29  ;;  %v1938_v60 = vshll.u32 %v5403_v52, %v1935_v12  ;;  %v6866_v55 = vshll.u32 %v1929_v30, 8 }
 0x1a1   : > { %v2750_v24 = vmul.f32 %v1714_v40, %v1010_v51  ;;  %v4430_v28 = vmul.f32 %v3384_v14, %v1010_v51  ;;  %v4791_v53 = vadd.s32 4294967294, %v2195_v3  ;;  %v1939_v51 = vshrl.u32 %v5404_v54, %v1936_v59 }
 0x1a2   : > { %v848_v32 = vadd.f32 %v847_v16, %v846_v11  ;;  %v1934_v42 = vshrl.u32 %v1933_v36, 5  ;;  %v1941_v21 = vshll.u32 %v5404_v54, %v1935_v12  ;;  %v1942_v37 = vshrl.u32 %v5405_v57, %v1936_v59 }
 0x1a3   : > { %4447 = vst [vmem:[%s5911_s10 + $0x28] sm:$0xff] %v2750_v24  ;;  %v4486_v44 = vmul.f32 %v6307_v10, %v2750_v24  ;;  %4463 = vst [vmem:[%s5911_s10 + $0xa8] sm:$0xff] %v4430_v28  ;;  %v4534_v34 = vmul.f32 %v6307_v10, %v4430_v28  ;;  %v6873_v50 = vpop.eup %5175  ;;  %vm4792_vm7 = vcmp.lt.s32.totalorder %v4791_v53, 0  ;;  %v1944_v18 = vshll.u32 %v5405_v57, %v1935_v12 }
 0x1a4   : > { %v2198_v26 = vsel %vm4792_vm7, 0, %v4791_v53  ;;  %v1940_v15 = vor.u32 %v1939_v51, %v1938_v60  ;;  %v1945_v36 = vshrl.u32 %v5402_v48, %v1936_v59  ;;  %v1947_v7 = vshll.u32 %v5402_v48, %v1935_v12 }
 0x1a5   : > { %v4502_v31 = vadd.f32 %v4486_v44, %v6822_v1  ;;  %v4550_v35 = vadd.f32 %v4534_v34, %v6829_v39  ;;  %v2199_v5 = vsub.s32 32, %v2198_v26  ;;  %v2200_v2 = vshll.u32 %v6847_v13, %v2198_v26 }
 0x1a6   : > { %v2203_v8 = vsub.s32 4294967266, %v2198_v26  ;;  %v1948_v9 = vshrl.u32 %v5406_v62, %v1936_v59  ;;  %v1950_v1 = vshll.u32 %v5406_v62, %v1935_v12  ;;  %v1943_v38 = vor.u32 %v1942_v37, %v1941_v21 }
 0x1a7   : > { %4518 = vst [vmem:[%s6457_s17 + $0x28] sm:$0xff] %v4502_v31  ;;  %4566 = vst [vmem:[%s6457_s17 + $0xa8] sm:$0xff] %v4550_v35  ;;  %v2201_v30 = vshrl.u32 %v2183_v4, %v2199_v5  ;;  %v1951_v17 = vshrl.u32 %v5407_v6, %v1936_v59  ;;  %vm2129_vm8 = vcmp.lt.s32.totalorder %v6658_v49, 0  ;;  %v1937_v13 = vshrl.u32 %v5403_v52, %v1936_v59  ;;  %v5178_v56 = vpop.eup %5177 }
 0x1a8   : > { %v2204_v39 = vadd.s32 127, %v2203_v8  ;;  %v1946_v0 = vor.u32 %v1945_v36, %v1944_v18  ;;  %v1949_v16 = vor.u32 %v1948_v9, %v1947_v7  ;;  %vm1953_vm9 = vcmp.lt.s32.totalorder %v1934_v42, 1  ;;  %v626_v18 = vld [vmem:[%s5588_s8 + $0x48] sm:$0xff] }
 0x1a9   : > { %v2202_v29 = vor.u32 %v2201_v30, %v2200_v2  ;;  %v2213_v40 = vsub.s32 4, %v6838_v58  ;;  %v1952_v14 = vor.u32 %v1951_v17, %v1950_v1  ;;  %vm1954_vm10 = vcmp.lt.s32.totalorder %v1934_v42, 2  ;;  %v642_v36 = vld [vmem:[%s5588_s8 + $0xc8] sm:$0xff] }
 0x1aa   : > { %v2205_v11 = vshll.u32 %v2204_v39, 23  ;;  %vm1955_vm11 = vcmp.lt.s32.totalorder %v1934_v42, 3  ;;  %vm1956_vm12 = vcmp.lt.s32.totalorder %v1934_v42, 4  ;;  %v900_v12 = vmul.f32 5.9604645e-08, %v848_v32  ;;  %v5254_v42 = vld [vmem:[%s5553_s28 + $0xd0] sm:$0xff] }
 0x1ab   : > { %v2209_v24 = vcvt.s32.f32 %v2202_v29  ;;  %v1958_v28 = vsel %vm1956_vm12, %v1946_v0, 2102212464  ;;  %v1961_v4 = vsel %vm1953_vm9, %v1940_v15, %v1943_v38  ;;  %v1957_v59 = vsel %vm1953_vm9, %v1937_v13, %v1940_v15 }
 0x1ac   : > { %v2206_v3 = vor.u32 4788187, %v2205_v11  ;;  %v1962_v53 = vsel %vm1956_vm12, %v1949_v16, 920167782  ;;  %v1965_v60 = vsel %vm1953_vm9, %v1943_v38, %v1946_v0  ;;  %v1966_v44 = vsel %vm1956_vm12, %v1952_v14, 1326507024 }
 0x1ad   : > { %v1959_v51 = vsel %vm1955_vm11, %v1943_v38, %v1958_v28  ;;  %v1963_v21 = vsel %vm1955_vm11, %v1946_v0, %v1962_v53  ;;  %v1967_v37 = vsel %vm1955_vm11, %v1949_v16, %v1966_v44  ;;  %v750_v35 = vmul.f32 65536.0, %v749_v41  ;;  %v6923_v38 = vpop.f32.mrb[11].mxu1 }
 0x1ae   : > { %v2207_v34 = vand.u32 2147483647, %v2206_v3  ;;  %v1964_v31 = vsel %vm1954_vm10, %v1961_v4, %v1963_v21  ;;  %v1968_v32 = vsel %vm1954_vm10, %v1965_v60, %v1967_v37  ;;  %v751_v26 = vcvt.s32.f32 %v6860_v47 }
 0x1af   : > { %v6901_v2 = vmul.u32.u64.low %v6866_v55, %v1968_v32  ;;  %v6902_v8 = vmul.u32.u64.high %v6866_v55, %v1968_v32, %v6901_v2  ;;  %v6904_v15 = vmul.f32 6.2831855, %v900_v12  ;;  %vm6909_vm13 = vcmp.le.f32.partialorder %v2127_v27, 0.7853982 }
 0x1b0   : > { %v2210_v5 = vmul.f32 %v2209_v24, %v2207_v34  ;;  %v1960_v25 = vsel %vm1954_vm10, %v1957_v59, %v1959_v51  ;;  %v6915_v41 = vmul.u32.u64.low %v6866_v55, %v1964_v31  ;;  %v6916_v47 = vmul.u32.u64.high %v6866_v55, %v1964_v31, %v6915_v41  ;;  %v6947_v24 = vpop.f32.mrb[12].mxu0 }
 0x1b1   : > { %v2214_v1 = vsel %vm2129_vm8, %v2213_v40, %v6838_v58  ;;  %v2233_v30 = vand.u32 2139095040, %v6904_v15  ;;  %v658_v39 = vshrl.u32 %v626_v18, 8  ;;  %v1040_v27 = vmul.f32 %v6873_v50, %v6836_v43 }
 0x1b2   : > { %v2211_v9 = vxor.u32 2147483648, %v2210_v5  ;;  %v6929_v17 = vadd.f32 %v5254_v42, %v6841_v19  ;;  %v752_v13 = vadd.f32 %v751_v26, %v750_v35  ;;  %v674_v0 = vshrl.u32 %v642_v36, 8 }
 0x1b3   : > { %v938_v29 = vmul.f32 0.6931472, %v5178_v56  ;;  %v1976_v58 = vmul.u32 %v6866_v55, %v1960_v25  ;;  %vm1978_vm14 = vc.u32 %v6902_v8, %v6915_v41  ;;  %v2216_v50 = vsel %vm6909_vm13, 0, %v2214_v1 }
 0x1b4   : > { %v2212_v16 = vsel %vm2129_vm8, %v2211_v9, %v2210_v5  ;;  %v1979_v19 = vadd.s32 1, %v6916_v47  ;;  %v2234_v40 = vshrl.u32 %v2233_v30, 23  ;;  %vm1041_vm15 = vcmp.eq.f32.partialorder %v6836_v43, inf }
 0x1b5   : > { %v2215_v11 = vsel %vm6909_vm13, %v6658_v49, %v2212_v16  ;;  %v6944_v56 = vmul.f32 0.01, %v6568_v23  ;;  %v735_v55 = vshrl.u32 %v658_v39, 16  ;;  %v831_v3 = vshrl.u32 %v674_v0, 16 }
 0x1b6   : > { %5179 = vcosq.f32 %v2215_v11  ;;  %v1980_v14 = vsel %vm1978_vm14, %v1979_v19, %v6916_v47  ;;  %v4793_v12 = vadd.s32 4294967169, %v2234_v40  ;;  %vm1043_vm0 = vcmp.eq.f32.partialorder %v6836_v43, 0.0 }
 0x1b7   : > { %5181 = vsinq.f32 %v2215_v11  ;;  %v1044_v28 = vand.u32 2147483648, %v6836_v43  ;;  %v3894_v4 = vadd.s32 3, %v2216_v50  ;;  %v1981_v59 = vadd.s32 %v1980_v14, %v1976_v58 }
 0x1b8   : > { %v1042_v53 = vsel %vm1041_vm15, %v6836_v43, %v1040_v27  ;;  %v6952_v60 = vmul.f32 -2.0, %v938_v29  ;;  %v884_v23 = vmul.f32 5.9604645e-08, %v752_v13  ;;  %v2240_v44 = vadd.s32 1, %v4793_v12 }
 0x1b9   : > { %v2220_v34 = vand.u32 3, %v2216_v50  ;;  %v1982_v51 = vadd.s32 536870912, %v1981_v59  ;;  %v736_v21 = vand.u32 65535, %v658_v39  ;;  %v737_v37 = vcvt.s32.f32 %v735_v55 }
 0x1ba   : > { %vm2219_vm1 = vweird.f32 %v6658_v49  ;;  %v2230_v31 = vand.u32 2147483647, %v6904_v15  ;;  %vm2241_vm2 = vcmp.gt.s32.totalorder %v2240_v44, 0  ;;  %v832_v32 = vand.u32 65535, %v674_v0 }
 0x1bb   : > { %v833_v35 = vcvt.s32.f32 %v831_v3  ;;  %v3895_v26 = vand.u32 3, %v3894_v4  ;;  %v6956_v18 = vshrl.u32 %v1982_v51, 30  ;;  %v6959_v5 = vmul.f32 0.01, %v6676_v33 }
 0x1bc   : > { %v2242_v2 = vsel %vm2241_vm2, %v2240_v44, 0  ;;  %v1045_v36 = vsel %vm1043_vm0, %v1044_v28, %v1042_v53  ;;  %5183 = vrsqrt.f32 %v6952_v60  ;;  %v916_v7 = vsub.f32 1.0, %v884_v23 }
 0x1bd   : > { %v2244_v25 = vand.u32 31, %v2242_v2  ;;  %vm2221_vm3 = vcmp.lt.s32.totalorder %v2220_v34, 2  ;;  %v1984_v47 = vshll.u32 %v6956_v18, 30  ;;  %v738_v9 = vmul.f32 65536.0, %v737_v37 }
 0x1be   : > { %v739_v1 = vcvt.s32.f32 %v736_v21  ;;  %vm2222_vm4 = vcmp.eq.s32.totalorder %v2220_v34, 0  ;;  %v2237_v30 = vand.u32 8388607, %v2230_v31  ;;  %v834_v39 = vmul.f32 65536.0, %v833_v35 }
 0x1bf   : > { %v835_v33 = vcvt.s32.f32 %v832_v32  ;;  %vm2225_vm5 = vcmp.eq.s32.totalorder %v2220_v34, 2  ;;  %vm3896_vm6 = vcmp.lt.s32.totalorder %v3895_v26, 2  ;;  %vm3900_vm7 = vcmp.eq.s32.totalorder %v3895_v26, 2 }
 0x1c0   : > { %v5180_v27 = vpop.eup %5179  ;;  %v6967_v43 = vsub.s32 %v1981_v59, %v1984_v47  ;;  %vm3897_vm8 = vcmp.eq.s32.totalorder %v3895_v26, 0  ;;  %5185 = vlog2.f32 %v916_v7  ;;  %v2245_v0 = vsub.s32 32, %v2244_v25 }
 0x1c1   : > { %v5182_v42 = vpop.eup %5181  ;;  %v2226_v13 = vxor.u32 2147483648, %v5180_v27  ;;  %v1977_v29 = vadd.s32 %v6915_v41, %v6902_v8  ;;  %v6972_v11 = vadd.f32 %v739_v1, %v738_v9  ;;  %v2238_v40 = vor.u32 8388608, %v2237_v30 }
 0x1c2   : > { %v2223_v16 = vxor.u32 2147483648, %v5182_v42  ;;  %v1987_v58 = vsub.s32 0, %v6967_v43  ;;  %v836_v55 = vadd.f32 %v835_v33, %v834_v39  ;;  %v2247_v28 = vshll.u32 %v5403_v52, %v2244_v25 }
 0x1c3   : > { %v2227_v50 = vsel %vm2225_vm5, %v2226_v13, %v5182_v42  ;;  %v3902_v19 = vsel %vm3900_vm7, %v2226_v13, %v5182_v42  ;;  %v2248_v8 = vshrl.u32 %v5404_v54, %v2245_v0  ;;  %v2250_v41 = vshll.u32 %v5404_v54, %v2244_v25 }
 0x1c4   : > { %v2224_v14 = vsel %vm2222_vm4, %v5180_v27, %v2223_v16  ;;  %v3899_v12 = vsel %vm3897_vm8, %v5180_v27, %v2223_v16  ;;  %v4782_v3 = vmin.u32 %v1987_v58, %v6967_v43  ;;  %v2251_v51 = vshrl.u32 %v5405_v57, %v2245_v0 }
 0x1c5   : > { %v2228_v4 = vsel %vm2221_vm3, %v2224_v14, %v2227_v50  ;;  %v3903_v59 = vsel %vm3896_vm6, %v3899_v12, %v3902_v19  ;;  %v6988_v32 = vshll.u32 %v2238_v40, 8  ;;  %v898_v35 = vmul.f32 5.9604645e-08, %v836_v55 }
 0x1c6   : > { %v2229_v53 = vsel %vm2219_vm1, nan, %v2228_v4  ;;  %v3904_v23 = vsel %vm2219_vm1, nan, %v3903_v59  ;;  %v1989_v44 = vclz %v4782_v3  ;;  %v6986_v21 = vpop.eup %5183  ;;  %v2243_v7 = vshrl.u32 %v2242_v2, 5 }
 0x1c7   : > { %v2755_v34 = vmul.f32 %v2229_v53, %v1045_v36  ;;  %v4435_v37 = vmul.f32 %v3904_v23, %v1045_v36  ;;  %v2253_v47 = vshll.u32 %v5405_v57, %v2244_v25  ;;  %v2254_v9 = vshrl.u32 %v5402_v48, %v2245_v0 }
 0x1c8   : > { %v4783_v26 = vadd.s32 4294967294, %v1989_v44  ;;  %v2246_v30 = vshrl.u32 %v5403_v52, %v2245_v0  ;;  %v2249_v36 = vor.u32 %v2248_v8, %v2247_v28  ;;  %v2252_v39 = vor.u32 %v2251_v51, %v2250_v41 }
 0x1c9   : > { %4452 = vst [vmem:[%s5911_s10 + $0x50] sm:$0xff] %v2755_v34  ;;  %v4491_v49 = vmul.f32 %v6307_v10, %v2755_v34  ;;  %4468 = vst [vmem:[%s5911_s10 + $0xd0] sm:$0xff] %v4435_v37  ;;  %v4539_v1 = vmul.f32 %v6307_v10, %v4435_v37  ;;  %v2256_v33 = vshll.u32 %v5402_v48, %v2244_v25  ;;  %vm2262_vm10 = vcmp.lt.s32.totalorder %v2243_v7, 1 }
 0x1ca   : > { %vm4784_vm9 = vcmp.lt.s32.totalorder %v4783_v26, 0  ;;  %v2257_v2 = vshrl.u32 %v5406_v62, %v2245_v0  ;;  %v6999_v27 = vpop.eup %5185  ;;  %v2259_v58 = vshll.u32 %v5406_v62, %v2244_v25  ;;  %v2255_v55 = vor.u32 %v2254_v9, %v2253_v47 }
 0x1cb   : > { %v4507_v42 = vadd.f32 %v4491_v49, %v6834_v63  ;;  %v4555_v13 = vadd.f32 %v4539_v1, %v6929_v17  ;;  %v1992_v16 = vsel %vm4784_vm9, 0, %v4783_v26  ;;  %v2260_v12 = vshrl.u32 %v5407_v6, %v2245_v0  ;;  %v647_v26 = vld [vmem:[%s5588_s8 + $0xf0] sm:$0xff] }
 0x1cc   : > { %v1993_v50 = vsub.s32 32, %v1992_v16  ;;  %v1994_v19 = vshll.u32 %v6967_v43, %v1992_v16  ;;  %v1997_v40 = vsub.s32 4294967266, %v1992_v16  ;;  %v2258_v14 = vor.u32 %v2257_v2, %v2256_v33  ;;  %v631_v2 = vld [vmem:[%s5588_s8 + $0x70] sm:$0xff] }
 0x1cd   : > { %4523 = vst [vmem:[%s6457_s17 + $0x50] sm:$0xff] %v4507_v42  ;;  %4571 = vst [vmem:[%s6457_s17 + $0xd0] sm:$0xff] %v4555_v13  ;;  %vm2263_vm11 = vcmp.lt.s32.totalorder %v2243_v7, 2  ;;  %vm2264_vm12 = vcmp.lt.s32.totalorder %v2243_v7, 3  ;;  %vm2265_vm13 = vcmp.lt.s32.totalorder %v2243_v7, 4  ;;  %v2261_v63 = vor.u32 %v2260_v12, %v2259_v58  ;;  %v5255_v13 = vld [vmem:[%s5553_s28 + $0x40] sm:$0xff] }
 0x1ce   : > { %v1995_v3 = vshrl.u32 %v1977_v29, %v1993_v50  ;;  %v1998_v28 = vadd.s32 127, %v1997_v40  ;;  %v2266_v17 = vsel %vm2262_vm10, %v2246_v30, %v2249_v36  ;;  %v2267_v25 = vsel %vm2265_vm13, %v2255_v55, 2102212464  ;;  %v5256_v40 = vld [vmem:[%s5553_s28 + $0xc0] sm:$0xff]  ;;  %v7049_v12 = vpop.f32.mrb[13].mxu0 }
 0x1cf   : > { %v2270_v43 = vsel %vm2262_vm10, %v2249_v36, %v2252_v39  ;;  %v2268_v8 = vsel %vm2264_vm12, %v2252_v39, %v2267_v25  ;;  %v2271_v41 = vsel %vm2265_vm13, %v2258_v14, 920167782  ;;  %v2007_v0 = vsub.s32 4, %v6956_v18 }
 0x1d0   : > { %v1996_v4 = vor.u32 %v1995_v3, %v1994_v19  ;;  %v1999_v59 = vshll.u32 %v1998_v28, 23  ;;  %v2272_v29 = vsel %vm2264_vm12, %v2255_v55, %v2271_v41  ;;  %v2274_v53 = vsel %vm2262_vm10, %v2252_v39, %v2255_v55  ;;  %v7040_v19 = vpop.f32.mrb[12].mxu1 }
 0x1d1   : > { %v2275_v23 = vsel %vm2265_vm13, %v2261_v63, 1326507024  ;;  %v2273_v34 = vsel %vm2263_vm11, %v2270_v43, %v2272_v29  ;;  %v2269_v47 = vsel %vm2263_vm11, %v2266_v17, %v2268_v8  ;;  %vm1923_vm14 = vcmp.lt.s32.totalorder %v6793_v61, 0 }
 0x1d2   : > { %v2000_v44 = vor.u32 4788187, %v1999_v59  ;;  %v2003_v51 = vcvt.s32.f32 %v1996_v4  ;;  %v2276_v37 = vsel %vm2264_vm12, %v2258_v14, %v2275_v23  ;;  %v7029_v33 = vmul.f32 6.2831855, %v898_v35 }
 0x1d3   : > { %v2277_v9 = vsel %vm2263_vm11, %v2274_v53, %v2276_v37  ;;  %v7020_v49 = vmul.u32.u64.low %v6988_v32, %v2273_v34  ;;  %v7021_v1 = vmul.u32.u64.high %v6988_v32, %v2273_v34, %v7020_v49  ;;  %v679_v42 = vshrl.u32 %v647_v26, 8 }
 0x1d4   : > { %v2001_v30 = vand.u32 2147483647, %v2000_v44  ;;  %v7025_v36 = vmul.u32.u64.low %v6988_v32, %v2277_v9  ;;  %v7026_v39 = vmul.u32.u64.high %v6988_v32, %v2277_v9, %v7025_v36  ;;  %v7034_v7 = vadd.f32 %v5255_v13, %v6944_v56 }
 0x1d5   : > { %v2008_v58 = vsel %vm1923_vm14, %v2007_v0, %v6956_v18  ;;  %v2285_v50 = vmul.u32 %v6988_v32, %v2269_v47  ;;  %v7044_v55 = vadd.f32 %v5256_v40, %v6959_v5  ;;  %v2288_v35 = vadd.s32 1, %v7021_v1 }
 0x1d6   : > { %v2004_v16 = vmul.f32 %v2003_v51, %v2001_v30  ;;  %v882_v14 = vmul.f32 5.9604645e-08, %v6972_v11  ;;  %v2027_v56 = vand.u32 2139095040, %v7029_v33  ;;  %vm1922_vm15 = vcmp.le.f32.partialorder %v1921_v20, 0.7853982 }
 0x1d7   : > { %vm2287_vm0 = vc.u32 %v7026_v39, %v7020_v49  ;;  %v663_v32 = vshrl.u32 %v631_v2, 8  ;;  %vm1027_vm1 = vcmp.eq.f32.partialorder %v6952_v60, inf  ;;  %v2010_v5 = vsel %vm1922_vm15, 0, %v2008_v58 }
 0x1d8   : > { %v2005_v18 = vxor.u32 2147483648, %v2004_v16  ;;  %v2289_v3 = vsel %vm2287_vm0, %v2288_v35, %v7021_v1  ;;  %v861_v28 = vshrl.u32 %v679_v42, 16  ;;  %v2024_v17 = vand.u32 2147483647, %v7029_v33 }
 0x1d9   : > { %v2290_v63 = vadd.s32 %v2289_v3, %v2285_v50  ;;  %v2028_v25 = vshrl.u32 %v2027_v56, 23  ;;  %v1026_v20 = vmul.f32 %v6986_v21, %v6952_v60  ;;  %v944_v4 = vmul.f32 0.6931472, %v6999_v27 }
 0x1da   : > { %v2006_v11 = vsel %vm1923_vm14, %v2005_v18, %v2004_v16  ;;  %v914_v59 = vsub.f32 1.0, %v882_v14  ;;  %v3686_v8 = vadd.s32 3, %v2010_v5  ;;  %vm1029_vm2 = vcmp.eq.f32.partialorder %v6952_v60, 0.0 }
 0x1db   : > { %v2009_v43 = vsel %vm1922_vm15, %v6793_v61, %v2006_v11  ;;  %v2291_v41 = vadd.s32 536870912, %v2290_v63  ;;  %v4785_v0 = vadd.s32 4294967169, %v2028_v25  ;;  %v862_v29 = vand.u32 65535, %v679_v42 }
 0x1dc   : > { %5187 = vcosq.f32 %v2009_v43  ;;  %v863_v53 = vcvt.s32.f32 %v861_v28  ;;  %v2031_v44 = vand.u32 8388607, %v2024_v17  ;;  %v765_v51 = vshrl.u32 %v663_v32, 16 }
 0x1dd   : > { %5189 = vsinq.f32 %v2009_v43  ;;  %v7065_v23 = vshrl.u32 %v2291_v41, 30  ;;  %v2034_v21 = vadd.s32 1, %v4785_v0  ;;  %v1028_v27 = vsel %vm1027_vm1, %v6952_v60, %v1026_v20 }
 0x1de   : > { %v1030_v34 = vand.u32 2147483648, %v6952_v60  ;;  %v2014_v37 = vand.u32 3, %v2010_v5  ;;  %v7073_v26 = vmul.f32 -2.0, %v944_v4  ;;  %v3687_v47 = vand.u32 3, %v3686_v8 }
 0x1df   : > { %v2293_v9 = vshll.u32 %v7065_v23, 30  ;;  %5191 = vlog2.f32 %v914_v59  ;;  %vm2035_vm3 = vcmp.gt.s32.totalorder %v2034_v21, 0  ;;  %vm2013_vm4 = vweird.f32 %v6793_v61 }
 0x1e0   : > { %v2036_v1 = vsel %vm2035_vm3, %v2034_v21, 0  ;;  %v7077_v30 = vand.u32 65535, %v663_v32  ;;  %v864_v36 = vmul.f32 65536.0, %v863_v53  ;;  %v865_v2 = vcvt.s32.f32 %v862_v29 }
 0x1e1   : > { %v7079_v42 = vsub.s32 %v2290_v63, %v2293_v9  ;;  %v2032_v13 = vor.u32 8388608, %v2031_v44  ;;  %v2038_v16 = vand.u32 31, %v2036_v1  ;;  %v767_v58 = vcvt.s32.f32 %v765_v51 }
 0x1e2   : > { %v1031_v50 = vsel %vm1029_vm2, %v1030_v34, %v1028_v27  ;;  %vm2015_vm5 = vcmp.lt.s32.totalorder %v2014_v37, 2  ;;  %vm2016_vm6 = vcmp.eq.s32.totalorder %v2014_v37, 0  ;;  %5193 = vrsqrt.f32 %v7073_v26 }
 0x1e3   : > { %vm2019_vm7 = vcmp.eq.s32.totalorder %v2014_v37, 2  ;;  %vm3688_vm8 = vcmp.lt.s32.totalorder %v3687_v47, 2  ;;  %v2296_v40 = vsub.s32 0, %v7079_v42  ;;  %v2039_v35 = vsub.s32 32, %v2038_v16 }
 0x1e4   : > { %vm3689_vm9 = vcmp.eq.s32.totalorder %v3687_v47, 0  ;;  %vm3692_vm10 = vcmp.eq.s32.totalorder %v3687_v47, 2  ;;  %v2286_v14 = vadd.s32 %v7020_v49, %v7026_v39  ;;  %v866_v56 = vadd.f32 %v865_v2, %v864_v36 }
 0x1e5   : > { %v4794_v32 = vmin.u32 %v2296_v40, %v7079_v42  ;;  %v7088_v60 = vshll.u32 %v2032_v13, 8  ;;  %v7090_v5 = vmul.f32 65536.0, %v767_v58  ;;  %v769_v3 = vcvt.s32.f32 %v7077_v30 }
 0x1e6   : > { %v5188_v18 = vpop.eup %5187  ;;  %v7093_v63 = vshrl.u32 %v2036_v1, 5  ;;  %v2041_v25 = vshll.u32 %v5403_v52, %v2038_v16  ;;  %v2044_v20 = vshll.u32 %v5404_v54, %v2038_v16  ;;  %v2042_v39 = vshrl.u32 %v5404_v54, %v2039_v35 }
 0x1e7   : > { %v5190_v28 = vpop.eup %5189  ;;  %v2020_v11 = vxor.u32 2147483648, %v5188_v18  ;;  %v2298_v49 = vclz %v4794_v32  ;;  %v2045_v4 = vshrl.u32 %v5405_v57, %v2039_v35  ;;  %v2047_v41 = vshll.u32 %v5405_v57, %v2038_v16 }
 0x1e8   : > { %v2017_v43 = vxor.u32 2147483648, %v5190_v28  ;;  %v7102_v0 = vmul.f32 5.9604645e-08, %v866_v56  ;;  %v2040_v51 = vshrl.u32 %v5403_v52, %v2039_v35  ;;  %v2043_v9 = vor.u32 %v2042_v39, %v2041_v25 }
 0x1e9   : > { %v2021_v59 = vsel %vm2019_vm7, %v2020_v11, %v5190_v28  ;;  %v3694_v8 = vsel %vm3692_vm10, %v2020_v11, %v5190_v28  ;;  %v7104_v29 = vpop.eup %5191  ;;  %v4795_v21 = vadd.s32 4294967294, %v2298_v49  ;;  %v2046_v1 = vor.u32 %v2045_v4, %v2044_v20 }
 0x1ea   : > { %v2018_v53 = vsel %vm2016_vm6, %v5188_v18, %v2017_v43  ;;  %v3691_v44 = vsel %vm3689_vm9, %v5188_v18, %v2017_v43  ;;  %v2048_v13 = vshrl.u32 %v5402_v48, %v2039_v35  ;;  %v2050_v47 = vshll.u32 %v5402_v48, %v2038_v16 }
 0x1eb   : > { %v2022_v27 = vsel %vm2015_vm5, %v2018_v53, %v2021_v59  ;;  %v3695_v34 = vsel %vm3688_vm8, %v3691_v44, %v3694_v8  ;;  %vm4796_vm11 = vcmp.lt.s32.totalorder %v4795_v21, 0  ;;  %v2051_v20 = vshrl.u32 %v5406_v62, %v2039_v35  ;;  %v645_v44 = vld [vmem:[%s5588_s8 + $0xe0] sm:$0xff] }
 0x1ec   : > { %v2023_v36 = vsel %vm2013_vm4, nan, %v2022_v27  ;;  %v3696_v2 = vsel %vm2013_vm4, nan, %v3695_v34  ;;  %v7116_v58 = vpop.eup %5193  ;;  %v2301_v56 = vsel %vm4796_vm11, 0, %v4795_v21  ;;  %v2049_v11 = vor.u32 %v2048_v13, %v2047_v41 }
 0x1ed   : > { %v2753_v40 = vmul.f32 %v2023_v36, %v1031_v50  ;;  %v4433_v37 = vmul.f32 %v3696_v2, %v1031_v50  ;;  %v2302_v18 = vsub.s32 32, %v2301_v56  ;;  %v2303_v32 = vshll.u32 %v7079_v42, %v2301_v56 }
 0x1ee   : > { %v2306_v28 = vsub.s32 4294967266, %v2301_v56  ;;  %v2053_v50 = vshll.u32 %v5406_v62, %v2038_v16  ;;  %vm2232_vm12 = vcmp.lt.s32.totalorder %v6904_v15, 0  ;;  %v2054_v42 = vshrl.u32 %v5407_v6, %v2039_v35 }
 0x1ef   : > { %4450 = vst [vmem:[%s5911_s10 + $0x40] sm:$0xff] %v2753_v40  ;;  %v4489_v25 = vmul.f32 %v6307_v10, %v2753_v40  ;;  %4466 = vst [vmem:[%s5911_s10 + $0xc0] sm:$0xff] %v4433_v37  ;;  %v4537_v61 = vmul.f32 %v6307_v10, %v4433_v37  ;;  %v2304_v43 = vshrl.u32 %v2286_v14, %v2302_v18  ;;  %vm2056_vm13 = vcmp.lt.s32.totalorder %v7093_v63, 1 }
 0x1f0   : > { %v2307_v49 = vadd.s32 127, %v2306_v28  ;;  %v2052_v59 = vor.u32 %v2051_v20, %v2050_v47  ;;  %vm2057_vm14 = vcmp.lt.s32.totalorder %v7093_v63, 2  ;;  %v2055_v53 = vor.u32 %v2054_v42, %v2053_v50 }
 0x1f1   : > { %v4505_v39 = vadd.f32 %v4489_v25, %v7034_v7  ;;  %v4553_v4 = vadd.f32 %v4537_v61, %v7044_v55  ;;  %v2305_v8 = vor.u32 %v2304_v43, %v2303_v32  ;;  %vm2058_vm15 = vcmp.lt.s32.totalorder %v7093_v63, 3 }
 0x1f2   : > { %v2308_v41 = vshll.u32 %v2307_v49, 23  ;;  %vm2059_vm0 = vcmp.lt.s32.totalorder %v7093_v63, 4  ;;  %v2060_v16 = vsel %vm2056_vm13, %v2040_v51, %v2043_v9  ;;  %v2064_v35 = vsel %vm2056_vm13, %v2043_v9, %v2046_v1 }
 0x1f3   : > { %4521 = vst [vmem:[%s6457_s17 + $0x40] sm:$0xff] %v4505_v39  ;;  %4569 = vst [vmem:[%s6457_s17 + $0xc0] sm:$0xff] %v4553_v4  ;;  %v2068_v14 = vsel %vm2056_vm13, %v2046_v1, %v2049_v11  ;;  %v2312_v7 = vcvt.s32.f32 %v2305_v8  ;;  %v2061_v27 = vsel %vm2059_vm0, %v2049_v11, 2102212464  ;;  %v2065_v55 = vsel %vm2059_vm0, %v2052_v59, 920167782 }
 0x1f4   : > { %v2309_v21 = vor.u32 4788187, %v2308_v41  ;;  %v2316_v34 = vsub.s32 4, %v7065_v23  ;;  %v2062_v36 = vsel %vm2058_vm15, %v2046_v1, %v2061_v27  ;;  %v2066_v2 = vsel %vm2058_vm15, %v2049_v11, %v2065_v55  ;;  %v7182_v39 = vpop.f32.mrb[14].mxu0  ;;  %v629_v41 = vld [vmem:[%s5588_s8 + $0x60] sm:$0xff] }
 0x1f5   : > { %v2069_v13 = vsel %vm2059_vm0, %v2055_v53, 1326507024  ;;  %v2067_v51 = vsel %vm2057_vm14, %v2064_v35, %v2066_v2  ;;  %v677_v37 = vshrl.u32 %v645_v44, 8  ;;  %v2063_v56 = vsel %vm2057_vm14, %v2060_v16, %v2062_v36  ;;  %v5257_v2 = vld [vmem:[%s5553_s28 + $0x58] sm:$0xff] }
 0x1f6   : > { %v2310_v40 = vand.u32 2147483647, %v2309_v21  ;;  %v2070_v9 = vsel %vm2058_vm15, %v2052_v59, %v2069_v13  ;;  %v7151_v1 = vmul.u32.u64.low %v7088_v60, %v2067_v51  ;;  %v7152_v18 = vmul.u32.u64.high %v7088_v60, %v2067_v51, %v7151_v1 }
 0x1f7   : > { %v2071_v47 = vsel %vm2057_vm14, %v2068_v14, %v2070_v9  ;;  %v7160_v25 = vmul.f32 6.2831855, %v7102_v0  ;;  %v564_v61 = vmul.f32 0.01, %v6681_v46  ;;  %vm7165_vm1 = vcmp.le.f32.partialorder %v2230_v31, 0.7853982 }
 0x1f8   : > { %v2313_v32 = vmul.f32 %v2312_v7, %v2310_v40  ;;  %v7156_v28 = vmul.u32.u64.low %v7088_v60, %v2071_v47  ;;  %v7157_v11 = vmul.u32.u64.high %v7088_v60, %v2071_v47, %v7156_v28  ;;  %v2317_v20 = vsel %vm2232_vm12, %v2316_v34, %v7065_v23  ;;  %v7175_v46 = vpop.f32.mrb[13].mxu1 }
 0x1f9   : > { %v580_v50 = vmul.f32 0.01, %v6801_v45  ;;  %v2079_v49 = vmul.u32 %v7088_v60, %v2063_v56  ;;  %v2542_v0 = vand.u32 2139095040, %v7160_v25  ;;  %v849_v42 = vshrl.u32 %v677_v37, 16 }
 0x1fa   : > { %v2314_v43 = vxor.u32 2147483648, %v2313_v32  ;;  %v1047_v31 = vmul.f32 %v7116_v58, %v7073_v26  ;;  %vm1048_vm2 = vcmp.eq.f32.partialorder %v7073_v26, inf  ;;  %vm1050_vm3 = vcmp.eq.f32.partialorder %v7073_v26, 0.0 }
 0x1fb   : > { %v2082_v23 = vadd.s32 1, %v7152_v18  ;;  %v2319_v60 = vsel %vm7165_vm1, 0, %v2317_v20  ;;  %vm2081_vm4 = vc.u32 %v7157_v11, %v7151_v1  ;;  %v770_v58 = vadd.f32 %v769_v3, %v7090_v5 }
 0x1fc   : > { %v2315_v45 = vsel %vm2232_vm12, %v2314_v43, %v2313_v32  ;;  %v2543_v8 = vshrl.u32 %v2542_v0, 23  ;;  %v850_v53 = vand.u32 65535, %v677_v37  ;;  %v940_v16 = vmul.f32 0.6931472, %v7104_v29  ;;  %v5258_v37 = vld [vmem:[%s5553_s28 + $0xd8] sm:$0xff] }
 0x1fd   : > { %v2318_v4 = vsel %vm7165_vm1, %v6904_v15, %v2315_v45  ;;  %v2083_v59 = vsel %vm2081_vm4, %v2082_v23, %v7152_v18  ;;  %v851_v14 = vcvt.s32.f32 %v849_v42  ;;  %v1051_v44 = vand.u32 2147483648, %v7073_v26 }
 0x1fe   : > { %5195 = vcosq.f32 %v2318_v4  ;;  %v2084_v35 = vadd.s32 %v2083_v59, %v2079_v49  ;;  %v2539_v30 = vand.u32 2147483647, %v7160_v25  ;;  %v4805_v5 = vadd.s32 4294967169, %v2543_v8 }
 0x1ff   : > { %5197 = vsinq.f32 %v2318_v4  ;;  %v1049_v3 = vsel %vm1048_vm2, %v7073_v26, %v1047_v31  ;;  %v3998_v21 = vadd.s32 3, %v2319_v60  ;;  %v661_v27 = vshrl.u32 %v629_v41, 8 }
 0x200   : > { %v2085_v7 = vadd.s32 536870912, %v2084_v35  ;;  %v887_v55 = vmul.f32 5.9604645e-08, %v770_v58  ;;  %v2549_v34 = vadd.s32 1, %v4805_v5  ;;  %v852_v36 = vmul.f32 65536.0, %v851_v14 }
 0x201   : > { %v853_v29 = vcvt.s32.f32 %v850_v53  ;;  %v7205_v13 = vadd.f32 %v5257_v2, %v564_v61  ;;  %v2323_v40 = vand.u32 3, %v2319_v60  ;;  %v7207_v51 = vmul.f32 -2.0, %v940_v16 }
 0x202   : > { %v7209_v9 = vshrl.u32 %v2085_v7, 30  ;;  %v7212_v56 = vadd.f32 %v5258_v37, %v580_v50  ;;  %v7215_v47 = vmul.f32 0.01, %v6811_v22  ;;  %v2546_v18 = vand.u32 8388607, %v2539_v30 }
 0x203   : > { %vm2550_vm5 = vcmp.gt.s32.totalorder %v2549_v34, 0  ;;  %v1052_v32 = vsel %vm1050_vm3, %v1051_v44, %v1049_v3  ;;  %vm2322_vm6 = vweird.f32 %v6904_v15  ;;  %v3999_v28 = vand.u32 3, %v3998_v21 }
 0x204   : > { %v2087_v61 = vshll.u32 %v7209_v9, 30  ;;  %v919_v63 = vsub.f32 1.0, %v887_v55  ;;  %v2551_v20 = vsel %vm2550_vm5, %v2549_v34, 0  ;;  %v7223_v43 = vshrl.u32 %v661_v27, 16 }
 0x205   : > { %v854_v50 = vadd.f32 %v853_v29, %v852_v36  ;;  %vm2324_vm7 = vcmp.lt.s32.totalorder %v2323_v40, 2  ;;  %5199 = vrsqrt.f32 %v7207_v51  ;;  %v7228_v49 = vand.u32 65535, %v661_v27 }
 0x206   : > { %v7226_v22 = vsub.s32 %v2084_v35, %v2087_v61  ;;  %vm2325_vm8 = vcmp.eq.s32.totalorder %v2323_v40, 0  ;;  %vm2328_vm9 = vcmp.eq.s32.totalorder %v2323_v40, 2  ;;  %v2547_v26 = vor.u32 8388608, %v2546_v18 }
 0x207   : > { %v2553_v0 = vand.u32 31, %v2551_v20  ;;  %vm4000_vm10 = vcmp.lt.s32.totalorder %v3999_v28, 2  ;;  %vm4001_vm11 = vcmp.eq.s32.totalorder %v3999_v28, 0  ;;  %vm4004_vm12 = vcmp.eq.s32.totalorder %v3999_v28, 2 }
 0x208   : > { %v5196_v42 = vpop.eup %5195  ;;  %v2090_v31 = vsub.s32 0, %v7226_v22  ;;  %5201 = vlog2.f32 %v919_v63  ;;  %v755_v60 = vcvt.s32.f32 %v7223_v43  ;;  %v901_v58 = vmul.f32 5.9604645e-08, %v854_v50 }
 0x209   : > { %v5198_v23 = vpop.eup %5197  ;;  %v2329_v45 = vxor.u32 2147483648, %v5196_v42  ;;  %v2080_v59 = vadd.s32 %v7151_v1, %v7157_v11  ;;  %v757_v41 = vcvt.s32.f32 %v7228_v49  ;;  %v2554_v35 = vsub.s32 32, %v2553_v0 }
 0x20a   : > { %v2326_v4 = vxor.u32 2147483648, %v5198_v23  ;;  %v4786_v8 = vmin.u32 %v2090_v31, %v7226_v22  ;;  %v7237_v14 = vshll.u32 %v2547_v26, 8  ;;  %v2110_v21 = vsub.s32 4, %v7209_v9 }
 0x20b   : > { %v2330_v53 = vsel %vm2328_vm9, %v2329_v45, %v5198_v23  ;;  %v4006_v16 = vsel %vm4004_vm12, %v2329_v45, %v5198_v23  ;;  %v7244_v11 = vshrl.u32 %v2551_v20, 5  ;;  %v7246_v27 = vmul.f32 6.2831855, %v901_v58 }
 0x20c   : > { %v2327_v44 = vsel %vm2325_vm8, %v5196_v42, %v2326_v4  ;;  %v4003_v5 = vsel %vm4001_vm11, %v5196_v42, %v2326_v4  ;;  %v2092_v3 = vclz %v4786_v8  ;;  %v2556_v29 = vshll.u32 %v5403_v52, %v2553_v0 }
 0x20d   : > { %v2331_v7 = vsel %vm2324_vm7, %v2327_v44, %v2330_v53  ;;  %v4007_v1 = vsel %vm4000_vm10, %v4003_v5, %v4006_v16  ;;  %v2557_v37 = vshrl.u32 %v5404_v54, %v2554_v35  ;;  %v2559_v18 = vshll.u32 %v5404_v54, %v2553_v0 }
 0x20e   : > { %v2332_v55 = vsel %vm2322_vm6, nan, %v2331_v7  ;;  %v4008_v34 = vsel %vm2322_vm6, nan, %v4007_v1  ;;  %v4787_v36 = vadd.s32 4294967294, %v2092_v3  ;;  %v2560_v61 = vshrl.u32 %v5405_v57, %v2554_v35 }
 0x20f   : > { %v2756_v2 = vmul.f32 %v2332_v55, %v1052_v32  ;;  %v4436_v40 = vmul.f32 %v4008_v34, %v1052_v32  ;;  %v5200_v28 = vpop.eup %5199  ;;  %v2562_v63 = vshll.u32 %v5405_v57, %v2553_v0  ;;  %v2563_v20 = vshrl.u32 %v5402_v48, %v2554_v35 }
 0x210   : > { %vm4788_vm13 = vcmp.lt.s32.totalorder %v4787_v36, 0  ;;  %v2555_v26 = vshrl.u32 %v5403_v52, %v2554_v35  ;;  %v2565_v45 = vshll.u32 %v5402_v48, %v2553_v0  ;;  %v2558_v53 = vor.u32 %v2557_v37, %v2556_v29 }
 0x211   : > { %4453 = vst [vmem:[%s5911_s10 + $0x58] sm:$0xff] %v2756_v2  ;;  %v4492_v15 = vmul.f32 %v6307_v10, %v2756_v2  ;;  %4469 = vst [vmem:[%s5911_s10 + $0xd8] sm:$0xff] %v4436_v40  ;;  %v4540_v50 = vmul.f32 %v6307_v10, %v4436_v40  ;;  %v2095_v32 = vsel %vm4788_vm13, 0, %v4787_v36  ;;  %v2561_v16 = vor.u32 %v2560_v61, %v2559_v18 }
 0x212   : > { %v2096_v42 = vsub.s32 32, %v2095_v32  ;;  %v2097_v31 = vshll.u32 %v7226_v22, %v2095_v32  ;;  %v2100_v23 = vsub.s32 4294967266, %v2095_v32  ;;  %v5202_v58 = vpop.eup %5201  ;;  %v2564_v3 = vor.u32 %v2563_v20, %v2562_v63 }
 0x213   : > { %v4508_v4 = vadd.f32 %v4492_v15, %v7205_v13  ;;  %v4556_v8 = vadd.f32 %v4540_v50, %v7212_v56  ;;  %v2566_v7 = vshrl.u32 %v5406_v62, %v2554_v35  ;;  %v2568_v1 = vshll.u32 %v5406_v62, %v2553_v0 }
 0x214   : > { %v2098_v44 = vshrl.u32 %v2080_v59, %v2096_v42  ;;  %v2101_v5 = vadd.s32 127, %v2100_v23  ;;  %v2569_v22 = vshrl.u32 %v5407_v6, %v2554_v35  ;;  %vm2571_vm14 = vcmp.lt.s32.totalorder %v7244_v11, 1 }
 0x215   : > { %4524 = vst [vmem:[%s6457_s17 + $0x58] sm:$0xff] %v4508_v4  ;;  %4572 = vst [vmem:[%s6457_s17 + $0xd8] sm:$0xff] %v4556_v8  ;;  %vm2572_vm15 = vcmp.lt.s32.totalorder %v7244_v11, 2  ;;  %v2567_v56 = vor.u32 %v2566_v7, %v2565_v45  ;;  %vm2573_vm0 = vcmp.lt.s32.totalorder %v7244_v11, 3  ;;  %vm2574_vm1 = vcmp.lt.s32.totalorder %v7244_v11, 4  ;;  %v7309_v8 = vld [vmem:[%s5588_s8 + $0x78] sm:$0xff] }
 0x216   : > { %v2099_v13 = vor.u32 %v2098_v44, %v2097_v31  ;;  %v2102_v55 = vshll.u32 %v2101_v5, 23  ;;  %v2570_v59 = vor.u32 %v2569_v22, %v2568_v1  ;;  %v2575_v34 = vsel %vm2571_vm14, %v2555_v26, %v2558_v53  ;;  %v7315_v5 = vpop.f32.mrb[14].mxu1 }
 0x217   : > { %v2579_v0 = vsel %vm2571_vm14, %v2558_v53, %v2561_v16  ;;  %v2576_v29 = vsel %vm2574_vm1, %v2564_v3, 2102212464  ;;  %v2580_v2 = vsel %vm2574_vm1, %v2567_v56, 920167782  ;;  %v2583_v18 = vsel %vm2571_vm14, %v2561_v16, %v2564_v3 }
 0x218   : > { %v2103_v36 = vor.u32 4788187, %v2102_v55  ;;  %v2106_v35 = vcvt.s32.f32 %v2099_v13  ;;  %v2577_v40 = vsel %vm2573_vm0, %v2561_v16, %v2576_v29  ;;  %v2581_v37 = vsel %vm2573_vm0, %v2564_v3, %v2580_v2 }
 0x219   : > { %v2584_v61 = vsel %vm2574_vm1, %v2570_v59, 1326507024  ;;  %v2582_v20 = vsel %vm2572_vm15, %v2579_v0, %v2581_v37  ;;  %v756_v50 = vmul.f32 65536.0, %v755_v60  ;;  %v2578_v32 = vsel %vm2572_vm15, %v2575_v34, %v2577_v40 }
 0x21a   : > { %v2104_v63 = vand.u32 2147483647, %v2103_v36  ;;  %v2585_v15 = vsel %vm2573_vm0, %v2567_v56, %v2584_v61  ;;  %v7291_v42 = vmul.u32.u64.low %v7237_v14, %v2582_v20  ;;  %v7292_v31 = vmul.u32.u64.high %v7237_v14, %v2582_v20, %v7291_v42 }
 0x21b   : > { %v2586_v26 = vsel %vm2572_vm15, %v2583_v18, %v2585_v15  ;;  %vm2026_vm2 = vcmp.lt.s32.totalorder %v7029_v33, 0  ;;  %vm1034_vm3 = vcmp.eq.f32.partialorder %v7207_v51, inf  ;;  %v578_v60 = vmul.f32 0.01, %v6923_v38  ;;  %v5259_v18 = vld [vmem:[%s5553_s28 + $0x48] sm:$0xff] }
 0x21c   : > { %v2107_v23 = vmul.f32 %v2106_v35, %v2104_v63  ;;  %v7297_v45 = vmul.u32.u64.low %v7237_v14, %v2586_v26  ;;  %v7298_v4 = vmul.u32.u64.high %v7237_v14, %v2586_v26, %v7297_v45  ;;  %v2111_v43 = vsel %vm2026_vm2, %v2110_v21, %v7209_v9  ;;  %v648_v21 = vld [vmem:[%s5588_s8 + $0xf8] sm:$0xff]  ;;  %v5260_v15 = vld [vmem:[%s5553_s28 + $0xc8] sm:$0xff] }
 0x21d   : > { %v2336_v11 = vand.u32 2139095040, %v7246_v27  ;;  %v1033_v53 = vmul.f32 %v5200_v28, %v7207_v51  ;;  %vm2025_vm4 = vcmp.le.f32.partialorder %v2024_v17, 0.7853982  ;;  %v2594_v44 = vmul.u32 %v7237_v14, %v2578_v32  ;;  %v7326_v14 = vpop.f32.mrb[15].mxu0 }
 0x21e   : > { %v2108_v16 = vxor.u32 2147483648, %v2107_v23  ;;  %v950_v3 = vmul.f32 0.6931472, %v5202_v58  ;;  %v2597_v7 = vadd.s32 1, %v7292_v31  ;;  %v758_v38 = vadd.f32 %v757_v41, %v756_v50 }
 0x21f   : > { %v2337_v9 = vshrl.u32 %v2336_v11, 23  ;;  %v2113_v28 = vsel %vm2025_vm4, 0, %v2111_v43  ;;  %vm2596_vm5 = vc.u32 %v7298_v4, %v7291_v42  ;;  %v664_v17 = vshrl.u32 %v7309_v8, 8 }
 0x220   : > { %v2109_v1 = vsel %vm2026_vm2, %v2108_v16, %v2107_v23  ;;  %v2598_v22 = vsel %vm2596_vm5, %v2597_v7, %v7292_v31  ;;  %v2333_v49 = vand.u32 2147483647, %v7246_v27  ;;  %vm1036_vm6 = vcmp.eq.f32.partialorder %v7207_v51, 0.0 }
 0x221   : > { %v2112_v58 = vsel %vm2025_vm4, %v7029_v33, %v2109_v1  ;;  %v4797_v41 = vadd.s32 4294967169, %v2337_v9  ;;  %v2599_v13 = vadd.s32 %v2598_v22, %v2594_v44  ;;  %v680_v55 = vshrl.u32 %v648_v21, 8 }
 0x222   : > { %5203 = vcosq.f32 %v2112_v58  ;;  %v1037_v56 = vand.u32 2147483648, %v7207_v51  ;;  %v3790_v59 = vadd.s32 3, %v2113_v28  ;;  %v1035_v0 = vsel %vm1034_vm3, %v7207_v51, %v1033_v53 }
 0x223   : > { %5205 = vsinq.f32 %v2112_v58  ;;  %v2343_v34 = vadd.s32 1, %v4797_v41  ;;  %v7336_v36 = vmul.f32 -2.0, %v950_v3  ;;  %v2600_v35 = vadd.s32 536870912, %v2599_v13 }
 0x224   : > { %v885_v29 = vmul.f32 5.9604645e-08, %v758_v38  ;;  %v2117_v2 = vand.u32 3, %v2113_v28  ;;  %v2340_v40 = vand.u32 8388607, %v2333_v49  ;;  %v771_v37 = vshrl.u32 %v664_v17, 16 }
 0x225   : > { %vm2344_vm7 = vcmp.gt.s32.totalorder %v2343_v34, 0  ;;  %v7342_v61 = vadd.f32 %v5259_v18, %v7215_v47  ;;  %v7344_v63 = vshrl.u32 %v2600_v35, 30  ;;  %v867_v20 = vshrl.u32 %v680_v55, 16 }
 0x226   : > { %vm2116_vm8 = vweird.f32 %v7029_v33  ;;  %v7348_v50 = vadd.f32 %v5260_v15, %v578_v60  ;;  %v3791_v32 = vand.u32 3, %v3790_v59  ;;  %v2345_v26 = vsel %vm2344_vm7, %v2343_v34, 0 }
 0x227   : > { %v1038_v31 = vsel %vm1036_vm6, %v1037_v56, %v1035_v0  ;;  %5207 = vrsqrt.f32 %v7336_v36  ;;  %v2602_v23 = vshll.u32 %v7344_v63, 30  ;;  %v917_v45 = vsub.f32 1.0, %v885_v29 }
 0x228   : > { %vm2118_vm9 = vcmp.lt.s32.totalorder %v2117_v2, 2  ;;  %v2341_v47 = vor.u32 8388608, %v2340_v40  ;;  %v773_v43 = vcvt.s32.f32 %v771_v37  ;;  %v7354_v11 = vand.u32 65535, %v680_v55 }
 0x229   : > { %vm2119_vm10 = vcmp.eq.s32.totalorder %v2117_v2, 0  ;;  %v7356_v8 = vsub.s32 %v2599_v13, %v2602_v23  ;;  %v2347_v60 = vand.u32 31, %v2345_v26  ;;  %v869_v53 = vcvt.s32.f32 %v867_v20 }
 0x22a   : > { %vm2122_vm11 = vcmp.eq.s32.totalorder %v2117_v2, 2  ;;  %vm3792_vm12 = vcmp.lt.s32.totalorder %v3791_v32, 2  ;;  %vm3793_vm13 = vcmp.eq.s32.totalorder %v3791_v32, 0  ;;  %vm3796_vm14 = vcmp.eq.s32.totalorder %v3791_v32, 2 }
 0x22b   : > { %v2595_v16 = vadd.s32 %v7291_v42, %v7298_v4  ;;  %v2605_v44 = vsub.s32 0, %v7356_v8  ;;  %5209 = vlog2.f32 %v917_v45  ;;  %v7361_v3 = vand.u32 65535, %v664_v17 }
 0x22c   : > { %v5204_v51 = vpop.eup %5203  ;;  %v7363_v9 = vshll.u32 %v2341_v47, 8  ;;  %v7365_v21 = vmul.f32 65536.0, %v773_v43  ;;  %v871_v1 = vcvt.s32.f32 %v7354_v11  ;;  %v2348_v22 = vsub.s32 32, %v2347_v60 }
 0x22d   : > { %v5206_v7 = vpop.eup %5205  ;;  %v2123_v38 = vxor.u32 2147483648, %v5204_v51  ;;  %v4806_v58 = vmin.u32 %v2605_v44, %v7356_v8  ;;  %v870_v41 = vmul.f32 65536.0, %v869_v53  ;;  %v7371_v13 = vshrl.u32 %v2345_v26, 5 }
 0x22e   : > { %v2120_v28 = vxor.u32 2147483648, %v5206_v7  ;;  %v2350_v17 = vshll.u32 %v5403_v52, %v2347_v60  ;;  %v2353_v34 = vshll.u32 %v5404_v54, %v2347_v60  ;;  %v2356_v29 = vshll.u32 %v5405_v57, %v2347_v60 }
 0x22f   : > { %v2124_v42 = vsel %vm2122_vm11, %v2123_v38, %v5206_v7  ;;  %v3798_v4 = vsel %vm3796_vm14, %v2123_v38, %v5206_v7  ;;  %v2607_v59 = vclz %v4806_v58  ;;  %v2359_v40 = vshll.u32 %v5402_v48, %v2347_v60 }
 0x230   : > { %v2121_v55 = vsel %vm2119_vm10, %v5204_v51, %v2120_v28  ;;  %v3795_v56 = vsel %vm3793_vm13, %v5204_v51, %v2120_v28  ;;  %v2351_v2 = vshrl.u32 %v5404_v54, %v2348_v22  ;;  %v2349_v23 = vshrl.u32 %v5403_v52, %v2348_v22 }
 0x231   : > { %v2125_v0 = vsel %vm2118_vm9, %v2121_v55, %v2124_v42  ;;  %v3799_v35 = vsel %vm3792_vm12, %v3795_v56, %v3798_v4  ;;  %v7381_v37 = vpop.eup %5207  ;;  %v4807_v15 = vadd.s32 4294967294, %v2607_v59  ;;  %v2354_v45 = vshrl.u32 %v5405_v57, %v2348_v22 }
 0x232   : > { %v2126_v18 = vsel %vm2116_vm8, nan, %v2125_v0  ;;  %v3800_v20 = vsel %vm2116_vm8, nan, %v3799_v35  ;;  %v2357_v47 = vshrl.u32 %v5402_v48, %v2348_v22  ;;  %v2360_v43 = vshrl.u32 %v5406_v62, %v2348_v22 }
 0x233   : > { %v2754_v26 = vmul.f32 %v2126_v18, %v1038_v31  ;;  %v4434_v32 = vmul.f32 %v3800_v20, %v1038_v31  ;;  %vm4808_vm15 = vcmp.lt.s32.totalorder %v4807_v15, 0  ;;  %v2362_v11 = vshll.u32 %v5406_v62, %v2347_v60 }
 0x234   : > { %v2610_v51 = vsel %vm4808_vm15, 0, %v4807_v15  ;;  %v2363_v31 = vshrl.u32 %v5407_v6, %v2348_v22  ;;  %v2352_v58 = vor.u32 %v2351_v2, %v2350_v17  ;;  %v2355_v4 = vor.u32 %v2354_v45, %v2353_v34 }
 0x235   : > { %4451 = vst [vmem:[%s5911_s10 + $0x48] sm:$0xff] %v2754_v26  ;;  %v4490_v33 = vmul.f32 %v6307_v10, %v2754_v26  ;;  %4467 = vst [vmem:[%s5911_s10 + $0xc8] sm:$0xff] %v4434_v32  ;;  %v4538_v53 = vmul.f32 %v6307_v10, %v4434_v32  ;;  %v7398_v44 = vpop.eup %5209  ;;  %v2611_v7 = vsub.s32 32, %v2610_v51  ;;  %v2612_v38 = vshll.u32 %v7356_v8, %v2610_v51 }
 0x236   : > { %v2615_v28 = vsub.s32 4294967266, %v2610_v51  ;;  %v2361_v55 = vor.u32 %v2360_v43, %v2359_v40  ;;  %v2358_v0 = vor.u32 %v2357_v47, %v2356_v29  ;;  %vm2365_vm0 = vcmp.lt.s32.totalorder %v7371_v13, 1 }
 0x237   : > { %v4506_v60 = vadd.f32 %v4490_v33, %v7342_v61  ;;  %v4554_v42 = vadd.f32 %v4538_v53, %v7348_v50  ;;  %v2613_v56 = vshrl.u32 %v2595_v16, %v2611_v7  ;;  %v2364_v22 = vor.u32 %v2363_v31, %v2362_v11 }
 0x238   : > { %v2616_v59 = vadd.s32 127, %v2615_v28  ;;  %vm2367_vm1 = vcmp.lt.s32.totalorder %v7371_v13, 3  ;;  %vm2368_vm2 = vcmp.lt.s32.totalorder %v7371_v13, 4  ;;  %v872_v8 = vadd.f32 %v871_v1, %v870_v41 }
 0x239   : > { %4522 = vst [vmem:[%s6457_s17 + $0x48] sm:$0xff] %v4506_v60  ;;  %4570 = vst [vmem:[%s6457_s17 + $0xc8] sm:$0xff] %v4554_v42  ;;  %v2614_v17 = vor.u32 %v2613_v56, %v2612_v38  ;;  %vm2366_vm3 = vcmp.lt.s32.totalorder %v7371_v13, 2  ;;  %v2370_v61 = vsel %vm2368_vm2, %v2358_v0, 2102212464  ;;  %v2369_v50 = vsel %vm2365_vm0, %v2349_v23, %v2352_v58  ;;  %v7456_v42 = vpop.f32.mrb[15].mxu1 }
 0x23a   : > { %v2617_v35 = vshll.u32 %v2616_v59, 23  ;;  %v2371_v16 = vsel %vm2367_vm1, %v2355_v4, %v2370_v61  ;;  %v2373_v34 = vsel %vm2365_vm0, %v2352_v58, %v2355_v4  ;;  %v2374_v29 = vsel %vm2368_vm2, %v2361_v55, 920167782  ;;  %v646_v58 = vld [vmem:[%s5588_s8 + $0xe8] sm:$0xff] }
 0x23b   : > { %v2621_v41 = vcvt.s32.f32 %v2614_v17  ;;  %v2375_v40 = vsel %vm2367_vm1, %v2358_v0, %v2374_v29  ;;  %v2377_v18 = vsel %vm2365_vm0, %v2355_v4, %v2358_v0  ;;  %v2625_v20 = vsub.s32 4, %v7344_v63 }
 0x23c   : > { %v2618_v1 = vor.u32 4788187, %v2617_v35  ;;  %v2376_v15 = vsel %vm2366_vm3, %v2373_v34, %v2375_v40  ;;  %v2378_v2 = vsel %vm2368_vm2, %v2364_v22, 1326507024  ;;  %v904_v26 = vmul.f32 5.9604645e-08, %v872_v8 }
 0x23d   : > { %v2379_v23 = vsel %vm2367_vm1, %v2361_v55, %v2378_v2  ;;  %v7431_v45 = vmul.u32.u64.low %v7363_v9, %v2376_v15  ;;  %v7432_v47 = vmul.u32.u64.high %v7363_v9, %v2376_v15, %v7431_v45  ;;  %v2372_v43 = vsel %vm2366_vm3, %v2369_v50, %v2371_v16  ;;  %v5261_v2 = vld [vmem:[%s5553_s28 + $0x70] sm:$0xff] }
 0x23e   : > { %v2619_v32 = vand.u32 2147483647, %v2618_v1  ;;  %v2380_v11 = vsel %vm2366_vm3, %v2377_v18, %v2379_v23  ;;  %v775_v33 = vcvt.s32.f32 %v7361_v3  ;;  %v7440_v53 = vmul.f32 6.2831855, %v904_v26 }
 0x23f   : > { %vm2541_vm4 = vcmp.lt.s32.totalorder %v7160_v25, 0  ;;  %v7444_v31 = vmul.u32.u64.low %v7363_v9, %v2380_v11  ;;  %v7445_v7 = vmul.u32.u64.high %v7363_v9, %v2380_v11, %v7444_v31  ;;  %vm2540_vm5 = vcmp.le.f32.partialorder %v2539_v30, 0.7853982 }
 0x240   : > { %v2622_v51 = vmul.f32 %v2621_v41, %v2619_v32  ;;  %v2626_v38 = vsel %vm2541_vm4, %v2625_v20, %v7344_v63  ;;  %v2645_v28 = vand.u32 2139095040, %v7440_v53  ;;  %v2388_v13 = vmul.u32 %v7363_v9, %v2372_v43  ;;  %v5262_v32 = vld [vmem:[%s5553_s28 + $0xf0] sm:$0xff] }
 0x241   : > { %v2391_v60 = vadd.s32 1, %v7432_v47  ;;  %v1068_v4 = vmul.f32 %v7381_v37, %v7336_v36  ;;  %vm1069_vm6 = vcmp.eq.f32.partialorder %v7336_v36, inf  ;;  %v776_v63 = vadd.f32 %v775_v33, %v7365_v21 }
 0x242   : > { %v2623_v3 = vxor.u32 2147483648, %v2622_v51  ;;  %v2646_v55 = vshrl.u32 %v2645_v28, 23  ;;  %v2628_v59 = vsel %vm2540_vm5, 0, %v2626_v38  ;;  %vm2390_vm7 = vc.u32 %v7445_v7, %v7431_v45 }
 0x243   : > { %v678_v30 = vshrl.u32 %v646_v58, 8  ;;  %v2392_v0 = vsel %vm2390_vm7, %v2391_v60, %v7432_v47  ;;  %v2642_v22 = vand.u32 2147483647, %v7440_v53  ;;  %v567_v8 = vmul.f32 0.01, %v6947_v24 }
 0x244   : > { %v2624_v56 = vsel %vm2541_vm4, %v2623_v3, %v2622_v51  ;;  %v4809_v37 = vadd.s32 4294967169, %v2646_v55  ;;  %v946_v21 = vmul.f32 0.6931472, %v7398_v44  ;;  %v2393_v17 = vadd.s32 %v2392_v0, %v2388_v13 }
 0x245   : > { %v2627_v9 = vsel %vm2540_vm5, %v7160_v25, %v2624_v56  ;;  %v583_v35 = vmul.f32 0.01, %v7040_v19  ;;  %v4310_v61 = vadd.s32 3, %v2628_v59  ;;  %v1070_v16 = vsel %vm1069_vm6, %v7336_v36, %v1068_v4 }
 0x246   : > { %5211 = vcosq.f32 %v2627_v9  ;;  %v2652_v50 = vadd.s32 1, %v4809_v37  ;;  %vm1071_vm8 = vcmp.eq.f32.partialorder %v7336_v36, 0.0  ;;  %v1072_v34 = vand.u32 2147483648, %v7336_v36 }
 0x247   : > { %5213 = vsinq.f32 %v2627_v9  ;;  %v2394_v24 = vadd.s32 536870912, %v2393_v17  ;;  %v7477_v29 = vmul.f32 5.9604645e-08, %v776_v63  ;;  %v2649_v44 = vand.u32 8388607, %v2642_v22 }
 0x248   : > { %vm2653_vm9 = vcmp.gt.s32.totalorder %v2652_v50, 0  ;;  %v855_v19 = vshrl.u32 %v678_v30, 16  ;;  %v2632_v1 = vand.u32 3, %v2628_v59  ;;  %v7481_v41 = vmul.f32 -2.0, %v946_v21 }
 0x249   : > { %v7483_v40 = vshrl.u32 %v2394_v24, 30  ;;  %v2654_v18 = vsel %vm2653_vm9, %v2652_v50, 0  ;;  %v4311_v20 = vand.u32 3, %v4310_v61  ;;  %v7486_v26 = vadd.f32 %v5261_v2, %v567_v8 }
 0x24a   : > { %v2656_v15 = vand.u32 31, %v2654_v18  ;;  %vm2631_vm10 = vweird.f32 %v7160_v25  ;;  %v7490_v23 = vadd.f32 %v5262_v32, %v583_v35  ;;  %v1073_v43 = vsel %vm1071_vm8, %v1072_v34, %v1070_v16 }
 0x24b   : > { %v2396_v47 = vshll.u32 %v7483_v40, 30  ;;  %v2650_v11 = vor.u32 8388608, %v2649_v44  ;;  %v7495_v33 = vand.u32 65535, %v678_v30  ;;  %v857_v51 = vcvt.s32.f32 %v855_v19 }
 0x24c   : > { %vm2633_vm11 = vcmp.lt.s32.totalorder %v2632_v1, 2  ;;  %5215 = vrsqrt.f32 %v7481_v41  ;;  %v920_v38 = vsub.f32 1.0, %v7477_v29  ;;  %vm2634_vm12 = vcmp.eq.s32.totalorder %v2632_v1, 0 }
 0x24d   : > { %v7498_v31 = vsub.s32 %v2393_v17, %v2396_v47  ;;  %vm2637_vm13 = vcmp.eq.s32.totalorder %v2632_v1, 2  ;;  %vm4312_vm14 = vcmp.lt.s32.totalorder %v4311_v20, 2  ;;  %v2657_v28 = vsub.s32 32, %v2656_v15 }
 0x24e   : > { %vm4313_vm15 = vcmp.eq.s32.totalorder %v4311_v20, 0  ;;  %vm4316_vm0 = vcmp.eq.s32.totalorder %v4311_v20, 2  ;;  %v2389_v36 = vadd.s32 %v7431_v45, %v7445_v7  ;;  %v7504_v4 = vshll.u32 %v2650_v11, 8 }
 0x24f   : > { %v2399_v3 = vsub.s32 0, %v7498_v31  ;;  %v858_v63 = vmul.f32 65536.0, %v857_v51  ;;  %v859_v55 = vcvt.s32.f32 %v7495_v33  ;;  %v7508_v30 = vshrl.u32 %v2654_v18, 5 }
 0x250   : > { %v5212_v58 = vpop.eup %5211  ;;  %v2659_v9 = vshll.u32 %v5403_v52, %v2656_v15  ;;  %v2660_v45 = vshrl.u32 %v5404_v54, %v2657_v28  ;;  %v2662_v7 = vshll.u32 %v5404_v54, %v2656_v15  ;;  %v2665_v35 = vshll.u32 %v5405_v57, %v2656_v15 }
 0x251   : > { %v5214_v13 = vpop.eup %5213  ;;  %v2638_v60 = vxor.u32 2147483648, %v5212_v58  ;;  %v4798_v59 = vmin.u32 %v2399_v3, %v7498_v31  ;;  %v2658_v16 = vshrl.u32 %v5403_v52, %v2657_v28  ;;  %v2663_v34 = vshrl.u32 %v5405_v57, %v2657_v28 }
 0x252   : > { %v2635_v56 = vxor.u32 2147483648, %v5214_v13  ;;  %v2666_v18 = vshrl.u32 %v5402_v48, %v2657_v28  ;;  %v2661_v32 = vor.u32 %v2660_v45, %v2659_v9  ;;  %v2668_v20 = vshll.u32 %v5402_v48, %v2656_v15 }
 0x253   : > { %v2639_v0 = vsel %vm2637_vm13, %v2638_v60, %v5214_v13  ;;  %v4318_v37 = vsel %vm4316_vm0, %v2638_v60, %v5214_v13  ;;  %v2401_v17 = vclz %v4798_v59  ;;  %v2669_v11 = vshrl.u32 %v5406_v62, %v2657_v28 }
 0x254   : > { %v2636_v8 = vsel %vm2634_vm12, %v5212_v58, %v2635_v56  ;;  %v4315_v21 = vsel %vm4313_vm15, %v5212_v58, %v2635_v56  ;;  %v2671_v33 = vshll.u32 %v5406_v62, %v2656_v15  ;;  %v2672_v51 = vshrl.u32 %v5407_v6, %v2657_v28 }
 0x255   : > { %v2640_v61 = vsel %vm2633_vm11, %v2636_v8, %v2639_v0  ;;  %v4319_v50 = vsel %vm4312_vm14, %v4315_v21, %v4318_v37  ;;  %v4799_v19 = vadd.s32 4294967294, %v2401_v17  ;;  %v2664_v3 = vor.u32 %v2663_v34, %v2662_v7 }
 0x256   : > { %v2641_v24 = vsel %vm2631_vm10, nan, %v2640_v61  ;;  %v4320_v44 = vsel %vm2631_vm10, nan, %v4319_v50  ;;  %v7527_v47 = vpop.eup %5215  ;;  %v2667_v59 = vor.u32 %v2666_v18, %v2665_v35  ;;  %v2670_v28 = vor.u32 %v2669_v11, %v2668_v20 }
 0x257   : > { %v2759_v2 = vmul.f32 %v2641_v24, %v1073_v43  ;;  %v4439_v1 = vmul.f32 %v4320_v44, %v1073_v43  ;;  %vm4800_vm1 = vcmp.lt.s32.totalorder %v4799_v19, 0  ;;  %v2673_v0 = vor.u32 %v2672_v51, %v2671_v33 }
 0x258   : > { %v2404_v43 = vsel %vm4800_vm1, 0, %v4799_v19  ;;  %vm2674_vm2 = vcmp.lt.s32.totalorder %v7508_v30, 1  ;;  %v860_v8 = vadd.f32 %v859_v55, %v858_v63  ;;  %vm2675_vm3 = vcmp.lt.s32.totalorder %v7508_v30, 2 }
 0x259   : > { %4456 = vst [vmem:[%s5911_s10 + $0x70] sm:$0xff] %v2759_v2  ;;  %v4495_v25 = vmul.f32 %v6307_v10, %v2759_v2  ;;  %4472 = vst [vmem:[%s5911_s10 + $0xf0] sm:$0xff] %v4439_v1  ;;  %v4543_v58 = vmul.f32 %v6307_v10, %v4439_v1  ;;  %v2405_v13 = vsub.s32 32, %v2404_v43  ;;  %v2406_v60 = vshll.u32 %v7498_v31, %v2404_v43 }
 0x25a   : > { %v2409_v56 = vsub.s32 4294967266, %v2404_v43  ;;  %vm2676_vm4 = vcmp.lt.s32.totalorder %v7508_v30, 3  ;;  %vm2677_vm5 = vcmp.lt.s32.totalorder %v7508_v30, 4  ;;  %v2678_v31 = vsel %vm2674_vm2, %v2658_v16, %v2661_v32 }
 0x25b   : > { %v4511_v9 = vadd.f32 %v4495_v25, %v7486_v26  ;;  %v4559_v15 = vadd.f32 %v4543_v58, %v7490_v23  ;;  %v2407_v37 = vshrl.u32 %v2389_v36, %v2405_v13  ;;  %v2679_v21 = vsel %vm2677_vm5, %v2667_v59, 2102212464  ;;  %v630_v13 = vld [vmem:[%s5588_s8 + $0x68] sm:$0xff]  ;;  %s5408_s8 = smov [#allocation6]  }
 0x25c   : > { %v2410_v45 = vadd.s32 127, %v2409_v56  ;;  %v2682_v23 = vsel %vm2674_vm2, %v2661_v32, %v2664_v3  ;;  %v2680_v36 = vsel %vm2676_vm4, %v2664_v3, %v2679_v21  ;;  %v2683_v17 = vsel %vm2677_vm5, %v2670_v28, 920167782  ;;  %s5303_s7 = sshll.u32 %s5408_s8, 4  ;;  %s5304_s7 = int_to_ptr.vmem [resolvable:$false] %s5303_s7 }
 0x25d   : > { %4527 = vst [vmem:[%s6457_s17 + $0x70] sm:$0xff] %v4511_v9  ;;  %4575 = vst [vmem:[%s6457_s17 + $0xf0] sm:$0xff] %v4559_v15  ;;  %v2408_v7 = vor.u32 %v2407_v37, %v2406_v60  ;;  %v2686_v35 = vsel %vm2674_vm2, %v2664_v3, %v2667_v59  ;;  %v2687_v61 = vsel %vm2677_vm5, %v2673_v0, 1326507024  ;;  %v2419_v50 = vsub.s32 4, %v7483_v40  ;;  %s5305_s9 = scalar_lea.vmem %s5304_s7, 8192  ;;  %p5306_p10 = scmp.lt.s32.totalorder %s7730_s26, %s5304_s7 }
 0x25e   : > { %v2411_v26 = vshll.u32 %v2410_v45, 23  ;;  %v2684_v34 = vsel %vm2676_vm4, %v2667_v59, %v2683_v17  ;;  %v2681_v16 = vsel %vm2675_vm3, %v2678_v31, %v2680_v36  ;;  %v2688_v44 = vsel %vm2676_vm4, %v2670_v28, %v2687_v61  ;;  %v5263_v17 = vld [vmem:[%s5553_s28 + $0x60] sm:$0xff]  ;;  %p5307_p0 = scmp.lt.s32.totalorder %s5305_s9, %s5299_s29 }
 0x25f   : > { %v2415_v55 = vcvt.s32.f32 %v2408_v7  ;;  %v2685_v24 = vsel %vm2675_vm3, %v2682_v23, %v2684_v34  ;;  %v902_v19 = vmul.f32 5.9604645e-08, %v860_v8  ;;  %v2689_v2 = vsel %vm2675_vm3, %v2686_v35, %v2688_v44  ;;  %v5264_v61 = vld [vmem:[%s5553_s28 + $0xe0] sm:$0xff] }
 0x260   : > { %v2412_v63 = vor.u32 4788187, %v2411_v26  ;;  %v7559_v1 = vmul.u32.u64.low %v7504_v4, %v2685_v24  ;;  %v7560_v32 = vmul.u32.u64.high %v7504_v4, %v2685_v24, %v7559_v1  ;;  %vm2334_vm6 = vcmp.le.f32.partialorder %v2333_v49, 0.7853982  ;;  %p5308_p2 = por %p5307_p0, %p5306_p10 }
 0x261   : > { %v7564_v20 = vmul.u32.u64.low %v7504_v4, %v2689_v2  ;;  %v7565_v11 = vmul.u32.u64.high %v7504_v4, %v2689_v2, %v7564_v20  ;;  %v7567_v33 = vmul.f32 6.2831855, %v902_v19  ;;  %vm2335_vm7 = vcmp.lt.s32.totalorder %v7246_v27, 0 }
 0x262   : > { %v2413_v18 = vand.u32 2147483647, %v2412_v63  ;;  %v2697_v30 = vmul.u32 %v7504_v4, %v2681_v16  ;;  %v2420_v43 = vsel %vm2335_vm7, %v2419_v50, %v7483_v40  ;;  %5217 = vlog2.f32 %v920_v38  ;;  %p5309_p4 = pnand %p5308_p2, %p5302_p8 }
 0x263   : > { %v2439_v25 = vand.u32 2139095040, %v7567_v33  ;;  %v2700_v3 = vadd.s32 1, %v7560_v32  ;;  %vm2699_vm8 = vc.u32 %v7565_v11, %v7559_v1  ;;  %v2422_v59 = vsel %vm2334_vm6, 0, %v2420_v43 }
 0x264   : > { %v2416_v51 = vmul.f32 %v2415_v55, %v2413_v18  ;;  %v1054_v40 = vmul.f32 %v7527_v47, %v7481_v41  ;;  %v662_v29 = vshrl.u32 %v630_v13, 8  ;;  %vm1055_vm9 = vcmp.eq.f32.partialorder %v7481_v41, inf }
 0x265   : > { %v2440_v60 = vshrl.u32 %v2439_v25, 23  ;;  %v2701_v56 = vsel %vm2699_vm8, %v2700_v3, %v7560_v32  ;;  %v4102_v0 = vadd.s32 3, %v2422_v59  ;;  %v565_v37 = vmul.f32 0.01, %v7049_v12 }
 0x266   : > { %v2417_v58 = vxor.u32 2147483648, %v2416_v51  ;;  %v2702_v9 = vadd.s32 %v2701_v56, %v2697_v30  ;;  %v581_v45 = vmul.f32 0.01, %v7175_v46  ;;  %v1056_v31 = vsel %vm1055_vm9, %v7481_v41, %v1054_v40 }
 0x267   : > { %v4801_v15 = vadd.s32 4294967169, %v2440_v60  ;;  %vm1057_vm11 = vcmp.eq.f32.partialorder %v7481_v41, 0.0  ;;  %v1058_v47 = vand.u32 2147483648, %v7481_v41  ;;  %v2436_v7 = vand.u32 2147483647, %v7567_v33 }
 0x268   : > { %v2418_v49 = vsel %vm2335_vm7, %v2417_v58, %v2416_v51  ;;  %v2703_v38 = vadd.s32 536870912, %v2702_v9  ;;  %v2426_v26 = vand.u32 3, %v2422_v59  ;;  %v7595_v23 = vshrl.u32 %v662_v29, 16 }
 0x269   : > { %v2421_v4 = vsel %vm2334_vm6, %v7246_v27, %v2418_v49  ;;  %v2446_v28 = vadd.s32 1, %v4801_v15  ;;  %v4103_v46 = vand.u32 3, %v4102_v0  ;;  %v597_v35 = vadd.f32 %v5263_v17, %v565_v37 }
 0x26a   : > { %5219 = vcosq.f32 %v2421_v4  ;;  %v7588_v8 = vshrl.u32 %v2703_v38, 30  ;;  %vm2425_vm12 = vweird.f32 %v7246_v27  ;;  %v613_v63 = vadd.f32 %v5264_v61, %v581_v45 }
 0x26b   : > { %5221 = vsinq.f32 %v2421_v4  ;;  %vm2447_vm10 = vcmp.gt.s32.totalorder %v2446_v28, 0  ;;  %v1059_v50 = vsel %vm1057_vm11, %v1058_v47, %v1056_v31  ;;  %v7602_v41 = vand.u32 65535, %v662_v29 }
 0x26c   : > { %v2705_v21 = vshll.u32 %v7588_v8, 30  ;;  %v2448_v12 = vsel %vm2447_vm10, %v2446_v28, 0  ;;  %v5218_v36 = vpop.eup %5217  ;;  %v7606_v34 = vand.u32 8388607, %v2436_v7  ;;  %vm2427_vm13 = vcmp.lt.s32.totalorder %v2426_v26, 2 }
 0x26d   : > { %v2450_v16 = vand.u32 31, %v2448_v12  ;;  %v952_v24 = vmul.f32 0.6931472, %v5218_v36  ;;  %v761_v19 = vcvt.s32.f32 %v7595_v23  ;;  %vm2428_vm14 = vcmp.eq.s32.totalorder %v2426_v26, 0 }
 0x26e   : > { %v7600_v55 = vsub.s32 %v2702_v9, %v2705_v21  ;;  %vm2431_vm15 = vcmp.eq.s32.totalorder %v2426_v26, 2  ;;  %vm4104_vm0 = vcmp.lt.s32.totalorder %v4103_v46, 2  ;;  %vm4108_vm1 = vcmp.eq.s32.totalorder %v4103_v46, 2 }
 0x26f   : > { %vm4105_vm2 = vcmp.eq.s32.totalorder %v4103_v46, 0  ;;  %v2698_v20 = vadd.s32 %v7559_v1, %v7565_v11  ;;  %v2444_v25 = vor.u32 8388608, %v7606_v34  ;;  %v7614_v58 = vshrl.u32 %v2448_v12, 5 }
 0x270   : > { %v2708_v44 = vsub.s32 0, %v7600_v55  ;;  %v2451_v43 = vsub.s32 32, %v2450_v16  ;;  %v2453_v49 = vshll.u32 %v5403_v52, %v2450_v16  ;;  %v2456_v59 = vshll.u32 %v5404_v54, %v2450_v16 }
 0x271   : > { %v2459_v1 = vshll.u32 %v5405_v57, %v2450_v16  ;;  %v2462_v26 = vshll.u32 %v5402_v48, %v2450_v16  ;;  %v2465_v21 = vshll.u32 %v5406_v62, %v2450_v16  ;;  %v7639_v16 = vmul.f32 -2.0, %v952_v24 }
 0x272   : > { %v4810_v51 = vmin.u32 %v2708_v44, %v7600_v55  ;;  %v2452_v40 = vshrl.u32 %v5403_v52, %v2451_v43  ;;  %v2454_v28 = vshrl.u32 %v5404_v54, %v2451_v43  ;;  %v2457_v0 = vshrl.u32 %v5405_v57, %v2451_v43 }
 0x273   : > { %v2460_v31 = vshrl.u32 %v5402_v48, %v2451_v43  ;;  %v2463_v52 = vshrl.u32 %v5406_v62, %v2451_v43  ;;  %v2466_v48 = vshrl.u32 %v5407_v6, %v2451_v43  ;;  %vm2468_vm4 = vcmp.lt.s32.totalorder %v7614_v58, 1 }
 0x274   : > { %v5220_v18 = vpop.eup %5219  ;;  %v2710_v60 = vclz %v4810_v51  ;;  %v2455_v46 = vor.u32 %v2454_v28, %v2453_v49  ;;  %v2458_v17 = vor.u32 %v2457_v0, %v2456_v59  ;;  %vm2470_vm5 = vcmp.lt.s32.totalorder %v7614_v58, 3 }
 0x275   : > { %v5222_v2 = vpop.eup %5221  ;;  %v2432_v32 = vxor.u32 2147483648, %v5220_v18  ;;  %v2464_v62 = vor.u32 %v2463_v52, %v2462_v26  ;;  %vm2471_vm6 = vcmp.lt.s32.totalorder %v7614_v58, 4  ;;  %vm2469_vm7 = vcmp.lt.s32.totalorder %v7614_v58, 2 }
 0x276   : > { %v2429_v30 = vxor.u32 2147483648, %v5222_v2  ;;  %v4811_v15 = vadd.s32 4294967294, %v2710_v60  ;;  %v2472_v24 = vsel %vm2468_vm4, %v2452_v40, %v2455_v46  ;;  %5223 = vrsqrt.f32 %v7639_v16 }
 0x277   : > { %v2433_v3 = vsel %vm2431_vm15, %v2432_v32, %v5222_v2  ;;  %v4110_v13 = vsel %vm4108_vm1, %v2432_v32, %v5222_v2  ;;  %v2467_v32 = vor.u32 %v2466_v48, %v2465_v21  ;;  %v2477_v51 = vsel %vm2471_vm6, %v2464_v62, 920167782 }
 0x278   : > { %v2430_v56 = vsel %vm2428_vm14, %v5220_v18, %v2429_v30  ;;  %v4107_v4 = vsel %vm4105_vm2, %v5220_v18, %v2429_v30  ;;  %vm4812_vm3 = vcmp.lt.s32.totalorder %v4811_v15, 0  ;;  %v2461_v18 = vor.u32 %v2460_v31, %v2459_v1 }
 0x279   : > { %v2434_v11 = vsel %vm2427_vm13, %v2430_v56, %v2433_v3  ;;  %v4111_v9 = vsel %vm4104_vm0, %v4107_v4, %v4110_v13  ;;  %v2713_v47 = vsel %vm4812_vm3, 0, %v4811_v15  ;;  %v2481_v49 = vsel %vm2471_vm6, %v2467_v32, 1326507024 }
 0x27a   : > { %v2435_v29 = vsel %vm2425_vm12, nan, %v2434_v11  ;;  %v4112_v38 = vsel %vm2425_vm12, nan, %v4111_v9  ;;  %v2714_v57 = vsub.s32 32, %v2713_v47  ;;  %v2715_v12 = vshll.u32 %v7600_v55, %v2713_v47 }
 0x27b   : > { %v2757_v37 = vmul.f32 %v2435_v29, %v1059_v50  ;;  %v4437_v45 = vmul.f32 %v4112_v38, %v1059_v50  ;;  %v2718_v36 = vsub.s32 4294967266, %v2713_v47  ;;  %v2473_v6 = vsel %vm2471_vm6, %v2461_v18, 2102212464 }
 0x27c   : > { %v2716_v34 = vshrl.u32 %v2698_v20, %v2714_v57  ;;  %v2476_v20 = vsel %vm2468_vm4, %v2455_v46, %v2458_v17  ;;  %v2474_v43 = vsel %vm2470_vm5, %v2458_v17, %v2473_v6  ;;  %v2478_v3 = vsel %vm2470_vm5, %v2461_v18, %v2477_v51 }
 0x27d   : > { %4454 = vst [vmem:[%s5911_s10 + $0x60] sm:$0xff] %v2757_v37  ;;  %v4493_v27 = vmul.f32 %v6307_v10, %v2757_v37  ;;  %4470 = vst [vmem:[%s5911_s10 + $0xe0] sm:$0xff] %v4437_v45  ;;  %v4541_v54 = vmul.f32 %v6307_v10, %v4437_v45  ;;  %v2719_v44 = vadd.s32 127, %v2718_v36  ;;  %v2480_v13 = vsel %vm2468_vm4, %v2458_v17, %v2461_v18 }
 0x27e   : > { %v2717_v2 = vor.u32 %v2716_v34, %v2715_v12  ;;  %v2479_v60 = vsel %vm2469_vm7, %v2476_v20, %v2478_v3  ;;  %v2482_v4 = vsel %vm2470_vm5, %v2464_v62, %v2481_v49  ;;  %v762_v11 = vmul.f32 65536.0, %v761_v19  ;;  %v5266_v49 = vld [vmem:[%s5553_s28 + $0xf8] sm:$0xff] }
 0x27f   : > { %v4509_v61 = vadd.f32 %v4493_v27, %v597_v35  ;;  %v4557_v50 = vadd.f32 %v4541_v54, %v613_v63  ;;  %v2720_v55 = vshll.u32 %v2719_v44, 23  ;;  %v2484_v35 = vshll.u32 %v2444_v25, 8 }
 0x280   : > { %v2724_v63 = vcvt.s32.f32 %v2717_v2  ;;  %v2728_v25 = vsub.s32 4, %v7588_v8  ;;  %v763_v9 = vcvt.s32.f32 %v7602_v41  ;;  %v2475_v15 = vsel %vm2469_vm7, %v2472_v24, %v2474_v43 }
 0x281   : > { %4525 = vst [vmem:[%s6457_s17 + $0x60] sm:$0xff] %v4509_v61  ;;  %4573 = vst [vmem:[%s6457_s17 + $0xe0] sm:$0xff] %v4557_v50  ;;  %v2721_v30 = vor.u32 4788187, %v2720_v55  ;;  %v7662_v59 = vmul.u32.u64.low %v2484_v35, %v2479_v60  ;;  %v7663_v1 = vmul.u32.u64.high %v2484_v35, %v2479_v60, %v7662_v59  ;;  %v2483_v40 = vsel %vm2469_vm7, %v2480_v13, %v2482_v4 }
 0x282   : > { %v7674_v38 = vmul.u32.u64.low %v2484_v35, %v2483_v40  ;;  %v7675_v28 = vmul.u32.u64.high %v2484_v35, %v2483_v40, %v7674_v38  ;;  %vm2643_vm8 = vcmp.le.f32.partialorder %v2642_v22, 0.7853982  ;;  %vm2644_vm9 = vcmp.lt.s32.totalorder %v7440_v53, 0 }
 0x283   : > { %v2722_v56 = vand.u32 2147483647, %v2721_v30  ;;  %v2729_v41 = vsel %vm2644_vm9, %v2728_v25, %v7588_v8  ;;  %v2491_v19 = vmul.u32 %v2484_v35, %v2475_v15  ;;  %v2494_v0 = vadd.s32 1, %v7663_v1  ;;  %v5224_v8 = vpop.eup %5223  ;;  %v5265_v25 = vld [vmem:[%s5553_s28 + $0x78] sm:$0xff] }
 0x284   : > { %v764_v37 = vadd.f32 %v763_v9, %v762_v11  ;;  %vm2493_vm10 = vc.u32 %v7675_v28, %v7662_v59  ;;  %v2731_v31 = vsel %vm2643_vm8, 0, %v2729_v41  ;;  %v1075_v46 = vmul.f32 %v5224_v8, %v7639_v16 }
 0x285   : > { %v2725_v29 = vmul.f32 %v2724_v63, %v2722_v56  ;;  %v2495_v47 = vsel %vm2493_vm10, %v2494_v0, %v7663_v1  ;;  %v4414_v52 = vadd.s32 3, %v2731_v31  ;;  %v2735_v57 = vand.u32 3, %v2731_v31 }
 0x286   : > { %v2496_v22 = vadd.s32 %v2495_v47, %v2491_v19  ;;  %v886_v26 = vmul.f32 5.9604645e-08, %v764_v37  ;;  %vm1076_vm11 = vcmp.eq.f32.partialorder %v7639_v16, inf  ;;  %v568_v48 = vmul.f32 0.01, %v7182_v39 }
 0x287   : > { %v2726_v23 = vxor.u32 2147483648, %v2725_v29  ;;  %v4415_v12 = vand.u32 3, %v4414_v52  ;;  %vm1078_vm12 = vcmp.eq.f32.partialorder %v7639_v16, 0.0  ;;  %v1079_v50 = vand.u32 2147483648, %v7639_v16 }
 0x288   : > { %v2497_v21 = vadd.s32 536870912, %v2496_v22  ;;  %v918_v54 = vsub.f32 1.0, %v886_v26  ;;  %vm2740_vm13 = vcmp.eq.s32.totalorder %v2735_v57, 2  ;;  %v1077_v44 = vsel %vm1076_vm11, %v7639_v16, %v1075_v46 }
 0x289   : > { %v2727_v58 = vsel %vm2644_vm9, %v2726_v23, %v2725_v29  ;;  %vm4420_vm14 = vcmp.eq.s32.totalorder %v4415_v12, 2  ;;  %vm2737_vm15 = vcmp.eq.s32.totalorder %v2735_v57, 0  ;;  %vm4417_vm0 = vcmp.eq.s32.totalorder %v4415_v12, 0 }
 0x28a   : > { %v2730_v45 = vsel %vm2643_vm8, %v7440_v53, %v2727_v58  ;;  %v7686_v27 = vshrl.u32 %v2497_v21, 30  ;;  %vm2736_vm1 = vcmp.lt.s32.totalorder %v2735_v57, 2  ;;  %vm4416_vm2 = vcmp.lt.s32.totalorder %v4415_v12, 2 }
 0x28b   : > { %5225 = vcosq.f32 %v2730_v45  ;;  %vm2734_vm3 = vweird.f32 %v7440_v53  ;;  %v584_v55 = vmul.f32 0.01, %v7315_v5  ;;  %v1080_v35 = vsel %vm1078_vm12, %v1079_v50, %v1077_v44 }
 0x28c   : > { %5227 = vsinq.f32 %v2730_v45  ;;  %v2499_v36 = vshll.u32 %v7686_v27, 30  ;;  %v600_v53 = vadd.f32 %v5265_v25, %v568_v48  ;;  %v2492_v16 = vadd.s32 %v7662_v59, %v7675_v28 }
 0x28d   : > { %5229 = vlog2.f32 %v918_v54  ;;  %v616_v56 = vadd.f32 %v5266_v49, %v584_v55  ;;  %v2522_v47 = vsub.s32 4, %v7686_v27  ;;  %vm2438_vm5 = vcmp.lt.s32.totalorder %v7567_v33, 0 }
 0x28e   : > { %v2500_v17 = vsub.s32 %v2496_v22, %v2499_v36  ;;  %vm2437_vm6 = vcmp.le.f32.partialorder %v2436_v7, 0.7853982 }
 0x28f   : > { %v2523_v52 = vsel %vm2438_vm5, %v2522_v47, %v7686_v27 }
 0x290   : > { %v2502_v34 = vsub.s32 0, %v2500_v17  ;;  %v2525_v54 = vsel %vm2437_vm6, 0, %v2523_v52 }
 0x291   : > { %v4206_v57 = vadd.s32 3, %v2525_v54  ;;  %v2529_v36 = vand.u32 3, %v2525_v54 }
 0x292   : > { %v4802_v39 = vmin.u32 %v2502_v34, %v2500_v17  ;;  %v566_v34 = vmul.f32 0.01, %v7326_v14 }
 0x293   : > { %v4207_v46 = vand.u32 3, %v4206_v57  ;;  %vm2534_vm9 = vcmp.eq.s32.totalorder %v2529_v36, 2  ;;  %vm2531_vm11 = vcmp.eq.s32.totalorder %v2529_v36, 0 }
 0x294   : > { %v2504_v20 = vclz %v4802_v39 }
 0x295   : > { %v5226_v61 = vpop.eup %5225  ;;  %vm4212_vm10 = vcmp.eq.s32.totalorder %v4207_v46, 2  ;;  %vm4209_vm12 = vcmp.eq.s32.totalorder %v4207_v46, 0 }
 0x296   : > { %v5228_v62 = vpop.eup %5227  ;;  %v2741_v18 = vxor.u32 2147483648, %v5226_v61  ;;  %v4803_v13 = vadd.s32 4294967294, %v2504_v20  ;;  %v5268_v20 = vld [vmem:[%s5553_s28 + $0xe8] sm:$0xff] }
 0x297   : > { %v2738_v2 = vxor.u32 2147483648, %v5228_v62  ;;  %v5230_v4 = vpop.eup %5229 }
 0x298   : > { %v2742_v32 = vsel %vm2740_vm13, %v2741_v18, %v5228_v62  ;;  %v4422_v6 = vsel %vm4420_vm14, %v2741_v18, %v5228_v62  ;;  %vm4804_vm4 = vcmp.lt.s32.totalorder %v4803_v13, 0  ;;  %v948_v41 = vmul.f32 0.6931472, %v5230_v4 }
 0x299   : > { %v2739_v63 = vsel %vm2737_vm15, %v5226_v61, %v2738_v2  ;;  %v4419_v24 = vsel %vm4417_vm0, %v5226_v61, %v2738_v2  ;;  %v2507_v9 = vsel %vm4804_vm4, 0, %v4803_v13  ;;  %vm2530_vm13 = vcmp.lt.s32.totalorder %v2529_v36, 2 }
 0x29a   : > { %v2743_v51 = vsel %vm2736_vm1, %v2739_v63, %v2742_v32  ;;  %v4423_v30 = vsel %vm4416_vm2, %v4419_v24, %v4422_v6  ;;  %v2508_v15 = vsub.s32 32, %v2507_v9  ;;  %v2509_v40 = vshll.u32 %v2500_v17, %v2507_v9  ;;  %v5267_v63 = vld [vmem:[%s5553_s28 + $0x68] sm:$0xff]  ;;  %s4583_s28 = scalar_lea.sflag [#allocation7], %s5546_s23 }
 0x29b   : > { %v2744_v43 = vsel %vm2734_vm3, nan, %v2743_v51  ;;  %v4424_v3 = vsel %vm2734_vm3, nan, %v4423_v30  ;;  %v2512_v29 = vsub.s32 4294967266, %v2507_v9  ;;  %v966_v37 = vmul.f32 -2.0, %v948_v41 }
 0x29c   : > { %v2760_v60 = vmul.f32 %v2744_v43, %v1080_v35  ;;  %v4440_v5 = vmul.f32 %v4424_v3, %v1080_v35  ;;  %v2510_v19 = vshrl.u32 %v2492_v16, %v2508_v15  ;;  %vm4208_vm14 = vcmp.lt.s32.totalorder %v4207_v46, 2 }
 0x29d   : > { %v2513_v0 = vadd.s32 127, %v2512_v29  ;;  %5231 = vrsqrt.f32 %v966_v37  ;;  %vm1062_vm7 = vcmp.eq.f32.partialorder %v966_v37, inf  ;;  %vm1064_vm8 = vcmp.eq.f32.partialorder %v966_v37, 0.0 }
 0x29e   : > { %4457 = vst [vmem:[%s5911_s10 + $0x78] sm:$0xff] %v2760_v60  ;;  %v4496_v1 = vmul.f32 %v6307_v10, %v2760_v60  ;;  %4473 = vst [vmem:[%s5911_s10 + $0xf8] sm:$0xff] %v4440_v5  ;;  %v4544_v11 = vmul.f32 %v6307_v10, %v4440_v5  ;;  %v2511_v59 = vor.u32 %v2510_v19, %v2509_v40  ;;  %v1065_v61 = vand.u32 2147483648, %v966_v37 }
 0x29f   : > { %v2514_v28 = vshll.u32 %v2513_v0, 23  ;;  %vm2528_vm15 = vweird.f32 %v7567_v33  ;;  %v582_v18 = vmul.f32 0.01, %v7456_v42  ;;  %v598_v24 = vadd.f32 %v5267_v63, %v566_v34 }
 0x2a0   : > { %v4512_v38 = vadd.f32 %v4496_v1, %v600_v53  ;;  %v4560_v23 = vadd.f32 %v4544_v11, %v616_v56  ;;  %v2518_v45 = vcvt.s32.f32 %v2511_v59 }
 0x2a1   : > { %v2515_v58 = vor.u32 4788187, %v2514_v28  ;;  %v614_v51 = vadd.f32 %v5268_v20, %v582_v18 }
 0x2a2   : > { %4528 = vst [vmem:[%s6457_s17 + $0x78] sm:$0xff] %v4512_v38  ;;  %4576 = vst [vmem:[%s6457_s17 + $0xf8] sm:$0xff] %v4560_v23 }
 0x2a3   : > { %v2516_v31 = vand.u32 2147483647, %v2515_v58 }
 0x2a5   : > { %v2519_v22 = vmul.f32 %v2518_v45, %v2516_v31 }
 0x2a7   : > { %v2520_v26 = vxor.u32 2147483648, %v2519_v22  ;;  %v5232_v12 = vpop.eup %5231 }
 0x2a8   : > { %v1061_v17 = vmul.f32 %v5232_v12, %v966_v37 }
 0x2a9   : > { %v2521_v21 = vsel %vm2438_vm5, %v2520_v26, %v2519_v22 }
 0x2aa   : > { %v2524_v8 = vsel %vm2437_vm6, %v7567_v33, %v2521_v21  ;;  %v1063_v27 = vsel %vm1062_vm7, %v966_v37, %v1061_v17 }
 0x2ab   : > { %5233 = vcosq.f32 %v2524_v8  ;;  %v1066_v39 = vsel %vm1064_vm8, %v1065_v61, %v1063_v27 }
 0x2ac   : > { %5235 = vsinq.f32 %v2524_v8 }
 0x2b5   : > { %v5234_v48 = vpop.eup %5233 }
 0x2b6   : > { %v5236_v7 = vpop.eup %5235  ;;  %v2535_v50 = vxor.u32 2147483648, %v5234_v48 }
 0x2b7   : > { %v2532_v62 = vxor.u32 2147483648, %v5236_v7 }
 0x2b8   : > { %v2536_v44 = vsel %vm2534_vm9, %v2535_v50, %v5236_v7  ;;  %v4214_v2 = vsel %vm4212_vm10, %v2535_v50, %v5236_v7 }
 0x2b9   : > { %v2533_v32 = vsel %vm2531_vm11, %v5234_v48, %v2532_v62  ;;  %v4211_v55 = vsel %vm4209_vm12, %v5234_v48, %v2532_v62 }
 0x2ba   : > { %v2537_v14 = vsel %vm2530_vm13, %v2533_v32, %v2536_v44  ;;  %v4215_v6 = vsel %vm4208_vm14, %v4211_v55, %v4214_v2 }
 0x2bb   : > { %v2538_v35 = vsel %vm2528_vm15, nan, %v2537_v14  ;;  %v4216_v33 = vsel %vm2528_vm15, nan, %v4215_v6 }
 0x2bc   : > { %v2758_v42 = vmul.f32 %v2538_v35, %v1066_v39  ;;  %v4438_v30 = vmul.f32 %v4216_v33, %v1066_v39 }
 0x2be   : > { %4455 = vst [vmem:[%s5911_s10 + $0x68] sm:$0xff] %v2758_v42  ;;  %v4494_v43 = vmul.f32 %v6307_v10, %v2758_v42  ;;  %4471 = vst [vmem:[%s5911_s10 + $0xe8] sm:$0xff] %v4438_v30  ;;  %v4542_v3 = vmul.f32 %v6307_v10, %v4438_v30 }
 0x2bf   : > { %5312 = shalt.err (!%p5309_p4)
}
 0x2c0   : > { %s5313_s10 = scalar_lea.hbm %s7728_s15, 4096  ;;  %s5317_s12 = scalar_lea.hbm %s7827_s5, 8192 }
 0x2c1   : > { %p5314_p5 = scmp.ne.s32.totalorder %s7728_s15, %s5313_s10  ;;  %p5318_p1 = scmp.lt.u32.totalorder %s7728_s15, %s7827_s5 }
 0x2c2   : > { %p5319_p3 = scmp.lt.u32.totalorder %s5317_s12, %s5313_s10  ;;  %p5321_p11 = scmp.lt.u32.totalorder %s5313_s10, %s7728_s15 }
 0x2c3   : > { %p5315_p7 = pnand %p5314_p5, %p7850_p12 }
 0x2c4   : > { %p5320_p6 = por %p5319_p3, %p5318_p1 }
 0x2c5   : > { %p5316_p9 = pneg %p5315_p7 }
 0x2c6   : > { %p5322_p13 = por %p5321_p11, %p5320_p6 }
 0x2c8   : > { %p5323_p8 = pnand %p5322_p13, %p5316_p9 }
 0x2ca   : > { %5326 = shalt.err (!%p5323_p8)
}
 0x2cb   : > { %s5409_s29 = smov 128   ;;  %s5410_s7 = smov 8   ;;  %v4510_v10 = vadd.f32 %v4494_v43, %v598_v24  ;;  %v4558_v13 = vadd.f32 %v4542_v3, %v614_v51 }
 0x2cc   : > { %5043 = dma.vmem_to_hbm [thread:$0]  (%p7850_p12), %s7730_s26, 4096, %s7728_s15, %s4583_s28, %s5409_s29, %s5409_s29, %s5410_s7  }
 0x2cd   : > { %s7769_s11 = scalar_lea.hbm %s7826_s4, %s4886_s25  ;;  %4526 = vst [vmem:[%s6457_s17 + $0x68] sm:$0xff] %v4510_v10  ;;  %4574 = vst [vmem:[%s6457_s17 + $0xe8] sm:$0xff] %v4558_v13  ;;  %s4578_s13 = scalar_lea.sflag [#allocation4], %s5546_s23 }
 0x2ce   : > { %s5327_s12 = scalar_lea.vmem %s7773_s16, 4096  ;;  %s5411_s22 = smov [#allocation5]  }
 0x2cf   : > { %p5328_p10 = scmp.ne.s32.totalorder %s7773_s16, %s5327_s12  ;;  %s5331_s26 = sshll.u32 %s5411_s22, 4  ;;  %s5332_s26 = int_to_ptr.vmem [resolvable:$false] %s5331_s26 }
 0x2d0   : > { %s5333_s15 = scalar_lea.vmem %s5332_s26, 8192  ;;  %p5334_p4 = scmp.lt.s32.totalorder %s7773_s16, %s5332_s26 }
 0x2d1   : > { %p5329_p0 = pnand %p5328_p10, %p7850_p12  ;;  %p5335_p5 = scmp.lt.s32.totalorder %s5333_s15, %s5327_s12 }
 0x2d3   : > { %p5330_p2 = pneg %p5329_p0  ;;  %p5336_p7 = por %p5335_p5, %p5334_p4 }
 0x2d5   : > { %p5337_p9 = pnand %p5336_p7, %p5330_p2 }
 0x2d7   : > { %5340 = shalt.err (!%p5337_p9)
}
 0x2d8   : > { %s5341_s17 = scalar_lea.hbm %s7769_s11, 4096  ;;  %s5345_s14 = scalar_lea.hbm %s7826_s4, 8192 }
 0x2d9   : > { %p5342_p1 = scmp.ne.s32.totalorder %s7769_s11, %s5341_s17  ;;  %p5346_p11 = scmp.lt.u32.totalorder %s7769_s11, %s7826_s4 }
 0x2da   : > { %p5347_p13 = scmp.lt.u32.totalorder %s5345_s14, %s5341_s17  ;;  %p5349_p10 = scmp.lt.u32.totalorder %s5341_s17, %s7769_s11 }
 0x2db   : > { %p5343_p3 = pnand %p5342_p1, %p7850_p12 }
 0x2dc   : > { %p5348_p8 = por %p5347_p13, %p5346_p11 }
 0x2dd   : > { %p5344_p6 = pneg %p5343_p3 }
 0x2de   : > { %p5350_p0 = por %p5349_p10, %p5348_p8 }
 0x2e0   : > { %p5351_p2 = pnand %p5350_p0, %p5344_p6 }
 0x2e2   : > { %5354 = shalt.err (!%p5351_p2)
}
 0x2e3   : > { %5042 = dma.vmem_to_hbm [thread:$0]  (%p7850_p12), %s7773_s16, 4096, %s7769_s11, %s4578_s13, %s5409_s29, %s5409_s29, %s5410_s7  }
 0x2e4 PF: > { %s4627_s10 = sand.u32 1, %s5385_s18   ;;  %p7851_p4 = scmp.ne.s32.totalorder %s7832_s6, 0 }
 0x2e5   : > { %p7852_p5 = scmp.ge.s32.totalorder %s5397_s21, 2  ;;  %s4628_s12 = scalar_lea.sflag [#allocation4], %s4627_s10 }
 0x2e7   : > { %p5051_p7 = pnand %p7852_p5, %p7851_p4 }
 0x2e9   : > { %5376 = dma.done.wait (!%p5051_p7), %s4628_s12, 4096  }
 0x2ea   : > { %5378 = vsyncadd (!%p5051_p7), %s4628_s12, 4294963200  ;;  %s4637_s30 = scalar_lea.sflag [#allocation7], %s4627_s10 }
 0x2eb   : > { %5380 = dma.done.wait (!%p5051_p7), %s4637_s30, 4096  }
 0x2ec   : > { %5382 = vsyncadd (!%p5051_p7), %s4637_s30, 4294963200  ;;  %p22_p12 = scmp.ge.s32.totalorder %s5467_s24, 4   ;;  %s7853_s18 = smov %s5389_s19 }
 0x2ed   : > { %s7854_s19 = smov %s5393_s20  ;;  %s7855_s20 = smov %s5479_s27 }
 0x2ee   : > { %s7856_s21 = smov %s5467_s24  ;;  %24 = sbr.rel (!%p22_p12) target bundleno = 7 (0x7), region = 101 }
 0x2f5   :  { %4642 = vsyncpa [#allocation3], 1 }
 0x2f6   :  { %4644 = vsyncpa [#allocation3 + $0x1], 1 }
 0x2f7   :  { %4645 = vsyncpa [#allocation4], 1 }
 0x2f8   :  { %4647 = vsyncpa [#allocation4 + $0x1], 1 }
 0x2f9   :  { %4648 = vsyncpa [#allocation7], 1 }
 0x2fa   :  { %4650 = vsyncpa [#allocation7 + $0x1], 1 }

</bundles_post_ra>
